<compile_context>
chip_gen: v6e
topology: v6e:2x2x1
jax: 0.10.0
libtpu: 0.0.40
codegen_flags: <defaults>
</compile_context>

<pallas_src>
import functools
import math

import jax
import jax.numpy as jnp
from jax.experimental import pallas as pl
from jax.experimental.pallas import tpu as pltpu


# -----------------------------------------------------------------------------
# Generation-aware defaults
# -----------------------------------------------------------------------------
def _tpu_defaults():
    kind = ""
    try:
        kind = jax.devices()[0].device_kind.lower()
    except Exception:
        pass
    if ("v5" in kind) or ("v6" in kind):
        # 128 MiB physical VMEM: bigger streaming tiles, higher scoped limit.
        return 512, 96 * 1024 * 1024
    # v7x (64 MiB VMEM) / unknown: conservative.
    return 256, 48 * 1024 * 1024


_ROW_TILE_TARGET, _VMEM_LIMIT = _tpu_defaults()


def _round_up(x, m):
    return ((x + m - 1) // m) * m


def _pick_row_tile(m):
    """8-aligned row tile, capped so the grid has >=2 steps when possible."""
    half = _round_up(max((m + 1) // 2, 8), 8)
    return max(8, min(_ROW_TILE_TARGET, half))


def _cparams(n_parallel=1):
    return pltpu.CompilerParams(
        dimension_semantics=("parallel",) * n_parallel,
        vmem_limit_bytes=_VMEM_LIMIT,
    )


# -----------------------------------------------------------------------------
# Kernel 1: fused self-attention block (+ cross-attn query projections)
#   per batch item: QK/V proj -> per-head softmax attention -> out-proj
#   -> +residual -> LayerNorm(norm2) -> sampling-offset & attention-weight proj
# -----------------------------------------------------------------------------
def _self_attn_kernel(tgt_ref, qpos_ref, wqk_ref, bqk_ref, wv_ref, bv_ref,
                      wo_ref, bo_ref, g2_ref, be2_ref,
                      woff_ref, boff_ref, wattn_ref, battn_ref,
                      tgt_out_ref, off_ref, logit_ref, *, n_heads, eps):
    tgt = tgt_ref[0].astype(jnp.float32)            # (Lq, D)
    qpos = qpos_ref[0].astype(jnp.float32)
    qp = (tgt + qpos).astype(jnp.bfloat16)

    # Fused Q/K projection (1/sqrt(Dh) scale pre-folded into the Q half).
    qk = jnp.dot(qp, wqk_ref[...], preferred_element_type=jnp.float32) + bqk_ref[...]
    v = jnp.dot(tgt.astype(jnp.bfloat16), wv_ref[...],
                preferred_element_type=jnp.float32) + bv_ref[...]

    Lq, D = tgt.shape
    Dh = D // n_heads
    q = qk[:, :D].astype(jnp.bfloat16)
    k = qk[:, D:].astype(jnp.bfloat16)
    vb = v.astype(jnp.bfloat16)

    head_outs = []
    for h in range(n_heads):                        # static loop; lane slices
        sl = slice(h * Dh, (h + 1) * Dh)
        s = jnp.dot(q[:, sl], k[:, sl].T,
                    preferred_element_type=jnp.float32)          # (Lq, Lq)
        s = s - jnp.max(s, axis=-1, keepdims=True)
        pexp = jnp.exp(s)
        pr = pexp * pl.reciprocal(jnp.sum(pexp, axis=-1, keepdims=True),
                                  approx=True)
        head_outs.append(jnp.dot(pr.astype(jnp.bfloat16), vb[:, sl],
                                 preferred_element_type=jnp.float32))
    attn = jnp.concatenate(head_outs, axis=-1)      # (Lq, D), already head-merged

    y = jnp.dot(attn.astype(jnp.bfloat16), wo_ref[...],
                preferred_element_type=jnp.float32) + bo_ref[...]
    y = y + tgt                                     # residual
    mu = jnp.mean(y, axis=-1, keepdims=True)
    var = jnp.mean((y - mu) * (y - mu), axis=-1, keepdims=True)
    tgt_new = (y - mu) * jax.lax.rsqrt(var + eps) * g2_ref[...] + be2_ref[...]
    tgt_out_ref[0] = tgt_new.astype(tgt_out_ref.dtype)

    # Cross-attention query projections (MSDeformAttn sampling offsets / logits).
    q2 = (tgt_new + qpos).astype(jnp.bfloat16)
    off_ref[0] = (jnp.dot(q2, woff_ref[...], preferred_element_type=jnp.float32)
                  + boff_ref[...]).astype(off_ref.dtype)
    logit_ref[0] = (jnp.dot(q2, wattn_ref[...], preferred_element_type=jnp.float32)
                    + battn_ref[...]).astype(logit_ref.dtype)


def pallas_self_attn_block(p, tgt, qpos, n_heads, eps=1e-5):
    B, Lq, D = tgt.shape
    n_off = p["ca_woff"].shape[1]
    n_att = p["ca_wattn"].shape[1]
    const2d = lambda shape: pl.BlockSpec(shape, lambda b: (0, 0))
    return pl.pallas_call(
        functools.partial(_self_attn_kernel, n_heads=n_heads, eps=eps),
        out_shape=(jax.ShapeDtypeStruct((B, Lq, D), jnp.float32),
                   jax.ShapeDtypeStruct((B, Lq, n_off), jnp.float32),
                   jax.ShapeDtypeStruct((B, Lq, n_att), jnp.float32)),
        grid=(B,),
        in_specs=[
            pl.BlockSpec((1, Lq, D), lambda b: (b, 0, 0)),   # tgt
            pl.BlockSpec((1, Lq, D), lambda b: (b, 0, 0)),   # query_pos
            const2d((D, 2 * D)), const2d((1, 2 * D)),        # wqk, bqk
            const2d((D, D)), const2d((1, D)),                # wv, bv
            const2d((D, D)), const2d((1, D)),                # wo, bo
            const2d((1, D)), const2d((1, D)),                # ln2 gamma/beta
            const2d((D, n_off)), const2d((1, n_off)),        # sampling-offset proj
            const2d((D, n_att)), const2d((1, n_att)),        # attention-weight proj
        ],
        out_specs=(
            pl.BlockSpec((1, Lq, D), lambda b: (b, 0, 0)),
            pl.BlockSpec((1, Lq, n_off), lambda b: (b, 0, 0)),
            pl.BlockSpec((1, Lq, n_att), lambda b: (b, 0, 0)),
        ),
        compiler_params=_cparams(1),
    )(tgt, qpos, p["sa_wqk"], p["sa_bqk"], p["sa_wv"], p["sa_bv"],
      p["sa_wo"], p["sa_bo"], p["ln2_g"], p["ln2_b"],
      p["ca_woff"], p["ca_boff"], p["ca_wattn"], p["ca_battn"])


# -----------------------------------------------------------------------------
# Kernel 2: row-tiled matmul (value projection), bf16 interchange
# -----------------------------------------------------------------------------
def _matmul_kernel(x_ref, w_ref, b_ref, o_ref):
    x = x_ref[...].astype(jnp.bfloat16)
    y = jnp.dot(x, w_ref[...], preferred_element_type=jnp.float32) + b_ref[...]
    o_ref[...] = y.astype(o_ref.dtype)


def pallas_matmul(x, w, b, out_dtype=jnp.float32):
    M, K = x.shape
    N = w.shape[1]
    tm = _pick_row_tile(M)
    return pl.pallas_call(
        _matmul_kernel,
        out_shape=jax.ShapeDtypeStruct((M, N), out_dtype),
        grid=(pl.cdiv(M, tm),),
        in_specs=[
            pl.BlockSpec((tm, K), lambda i: (i, 0)),
            pl.BlockSpec((K, N), lambda i: (0, 0)),   # weight resident across steps
            pl.BlockSpec((1, N), lambda i: (0, 0)),
        ],
        out_specs=pl.BlockSpec((tm, N), lambda i: (i, 0)),
        compiler_params=_cparams(1),
    )(x, w, b)


# -----------------------------------------------------------------------------
# Kernel 3: fused deformable aggregation + out-proj + norm1 + FFN + norm3
#   s_ref : (tm, L*P, D)  sampled values (bf16, lane-dense, D = nH*Dh)
#   wl_ref: (tm, L*P, nH) attention logits (softmax over L*P per head)
#   e_ref : (nH, D)       0/1 head->lane expansion matrix
# -----------------------------------------------------------------------------
def _deform_ffn_kernel(s_ref, wl_ref, e_ref, wout_ref, bout_ref, res_ref,
                       g1_ref, be1_ref, w1_ref, b1_ref, w2_ref, b2_ref,
                       g3_ref, be3_ref, o_ref, *, eps):
    w = wl_ref[...].astype(jnp.float32)                     # (tm, LP, nH)
    w = w - jnp.max(w, axis=1, keepdims=True)
    ew = jnp.exp(w)
    pr = ew * pl.reciprocal(jnp.sum(ew, axis=1, keepdims=True), approx=True)
    tm, lp, nh = pr.shape
    pfull = jnp.dot(pr.reshape(tm * lp, nh), e_ref[...],
                    preferred_element_type=jnp.float32).reshape(tm, lp, -1)
    agg = jnp.sum(s_ref[...].astype(jnp.float32) * pfull, axis=1)   # (tm, D)

    y = jnp.dot(agg.astype(jnp.bfloat16), wout_ref[...],
                preferred_element_type=jnp.float32) + bout_ref[...]
    y = y + res_ref[...].astype(jnp.float32)                # residual (norm1)
    mu = jnp.mean(y, axis=-1, keepdims=True)
    var = jnp.mean((y - mu) * (y - mu), axis=-1, keepdims=True)
    x1 = (y - mu) * jax.lax.rsqrt(var + eps) * g1_ref[...] + be1_ref[...]

    # FFN: Linear -> ReLU -> Linear -> +residual -> LayerNorm (norm3)
    h = jnp.dot(x1.astype(jnp.bfloat16), w1_ref[...],
                preferred_element_type=jnp.float32) + b1_ref[...]
    h = jnp.maximum(h, 0.0)
    y2 = jnp.dot(h.astype(jnp.bfloat16), w2_ref[...],
                 preferred_element_type=jnp.float32) + b2_ref[...]
    y2 = y2 + x1
    mu2 = jnp.mean(y2, axis=-1, keepdims=True)
    var2 = jnp.mean((y2 - mu2) * (y2 - mu2), axis=-1, keepdims=True)
    o_ref[...] = ((y2 - mu2) * jax.lax.rsqrt(var2 + eps) * g3_ref[...]
                  + be3_ref[...]).astype(o_ref.dtype)


def pallas_deform_ffn(p, s_ld, wl, e_mat, res, eps=1e-5):
    M, LP, D = s_ld.shape
    nH = wl.shape[-1]
    Dff = p["ffn_w1"].shape[1]
    tm = _pick_row_tile(M)
    const2d = lambda shape: pl.BlockSpec(shape, lambda i: (0, 0))
    return pl.pallas_call(
        functools.partial(_deform_ffn_kernel, eps=eps),
        out_shape=jax.ShapeDtypeStruct((M, D), jnp.float32),
        grid=(pl.cdiv(M, tm),),
        in_specs=[
            pl.BlockSpec((tm, LP, D), lambda i: (i, 0, 0)),
            pl.BlockSpec((tm, LP, nH), lambda i: (i, 0, 0)),
            const2d((nH, D)),
            const2d((D, D)), const2d((1, D)),            # out-proj
            pl.BlockSpec((tm, D), lambda i: (i, 0)),     # residual
            const2d((1, D)), const2d((1, D)),            # ln1
            const2d((D, Dff)), const2d((1, Dff)),        # ffn w1
            const2d((Dff, D)), const2d((1, D)),          # ffn w2
            const2d((1, D)), const2d((1, D)),            # ln3
        ],
        out_specs=pl.BlockSpec((tm, D), lambda i: (i, 0)),
        compiler_params=_cparams(1),
    )(s_ld, wl, e_mat, p["ca_wout"], p["ca_bout"], res,
      p["ln1_g"], p["ln1_b"], p["ffn_w1"], p["ffn_b1"],
      p["ffn_w2"], p["ffn_b2"], p["ln3_g"], p["ln3_b"])


# -----------------------------------------------------------------------------
# MSDeformAttn bilinear sampling (data-dependent gather -> plain JAX)
# -----------------------------------------------------------------------------
# TODO(synk): the bilinear grid_sample gather is data-dependent and stays in plain
# JAX/XLA; it now emits the lane-dense (B, Lq, L, P, nH, Dh) layout directly so no
# HBM transpose is needed before the Pallas aggregation kernel.
def ms_deform_sample(value, spatial_shapes, level_starts, sampling_locations):
    """value: (B, S, nH, Dh); sampling_locations: (B, Lq, nH, L, P, 2) in [0,1].

    Returns (B, Lq, L, P, nH, Dh) (value dtype) via bilinear interpolation,
    zero padding, align_corners=False (matches F.grid_sample in the reference).
    """
    B, _, nH, Dh = value.shape
    _, Lq, _, L, P, _ = sampling_locations.shape
    out_dtype = value.dtype
    per_level = []
    for l, (H, W) in enumerate(spatial_shapes):
        start = level_starts[l]
        v_l = value[:, start:start + H * W]              # (B, H*W, nH, Dh)
        loc = sampling_locations[:, :, :, l].astype(jnp.float32)   # (B,Lq,nH,P,2)
        x = loc[..., 0] * W - 0.5
        y = loc[..., 1] * H - 0.5
        x0 = jnp.floor(x)
        y0 = jnp.floor(y)
        x1 = x0 + 1.0
        y1 = y0 + 1.0
        wx1 = x - x0
        wx0 = 1.0 - wx1
        wy1 = y - y0
        wy0 = 1.0 - wy1

        def gather(xi, yi):
            valid = ((xi >= 0) & (xi < W) & (yi >= 0) & (yi < H)).astype(jnp.float32)
            xi_c = jnp.clip(xi, 0, W - 1).astype(jnp.int32)
            yi_c = jnp.clip(yi, 0, H - 1).astype(jnp.int32)
            flat = yi_c * W + xi_c                       # (B, Lq, nH, P)
            idx = flat.transpose(0, 1, 3, 2).reshape(B, Lq * P, nH)
            g = jnp.take_along_axis(v_l, idx[..., None], axis=1)  # (B,Lq*P,nH,Dh)
            return g.reshape(B, Lq, P, nH, Dh), valid

        def corner_w(wy, wx, valid):
            # fold validity (zero padding) into the scalar bilinear weight
            return (wy * wx * valid).transpose(0, 1, 3, 2)[..., None]  # (B,Lq,P,nH,1)

        g00, m00 = gather(x0, y0)
        g01, m01 = gather(x1, y0)
        g10, m10 = gather(x0, y1)
        g11, m11 = gather(x1, y1)
        out_l = (g00 * corner_w(wy0, wx0, m00)
                 + g01 * corner_w(wy0, wx1, m01)
                 + g10 * corner_w(wy1, wx0, m10)
                 + g11 * corner_w(wy1, wx1, m11))
        per_level.append(out_l.astype(out_dtype))        # (B, Lq, P, nH, Dh)
    return jnp.stack(per_level, axis=2)                  # (B, Lq, L, P, nH, Dh)


# -----------------------------------------------------------------------------
# Decoder layer + decoder
# -----------------------------------------------------------------------------
def decoder_layer_forward(p, tgt, query_pos, reference_points_input, src,
                          spatial_shapes, level_starts, src_padding_mask,
                          n_heads, n_levels, n_points, e_mat):
    B, Lq, D = tgt.shape
    Dh = D // n_heads
    S = src.shape[1]
    LP = n_levels * n_points

    qpos = query_pos if query_pos is not None else jnp.zeros_like(tgt)

    # ---- fused self-attn + norm2 + cross-attn query projections (1 launch) ----
    tgt, offs, logits = pallas_self_attn_block(p, tgt, qpos, n_heads)

    # ---- MSDeformAttn value projection (bf16 interchange) ----
    value = pallas_matmul(src.reshape(B * S, D), p["ca_wval"], p["ca_bval"],
                          out_dtype=jnp.bfloat16).reshape(B, S, n_heads, Dh)
    if src_padding_mask is not None:
        value = jnp.where(src_padding_mask[:, :, None, None],
                          jnp.zeros((), value.dtype), value)

    # ---- sampling locations (tiny host-JAX math) ----
    offs = offs.reshape(B, Lq, n_heads, n_levels, n_points, 2)
    if reference_points_input.shape[-1] == 2:
        offset_normalizer = jnp.array([[w, h] for (h, w) in spatial_shapes],
                                      dtype=jnp.float32)          # (L, 2)
        sampling_locations = (
            reference_points_input[:, :, None, :, None, :]
            + offs / offset_normalizer[None, None, None, :, None, :])
    else:  # last dim == 4
        sampling_locations = (
            reference_points_input[:, :, None, :, None, :2]
            + offs / n_points
            * reference_points_input[:, :, None, :, None, 2:] * 0.5)

    sampled = ms_deform_sample(value, spatial_shapes, level_starts,
                               sampling_locations)        # (B,Lq,L,P,nH,Dh) bf16
    s_ld = sampled.reshape(B * Lq, LP, D)                 # lane-dense, no transpose
    wl = logits.reshape(B * Lq, LP, n_heads)              # columns pre-permuted

    # ---- fused agg + out-proj + norm1 + FFN + norm3 (1 launch) ----
    out = pallas_deform_ffn(p, s_ld, wl, e_mat, tgt.reshape(B * Lq, D))
    return out.reshape(B, Lq, D)


def decoder_forward(params, tgt, reference_points, src, src_valid_ratios,
                    query_pos=None, src_padding_mask=None, *,
                    spatial_shapes, level_starts, n_heads, n_levels, n_points,
                    return_intermediate=False):
    D = tgt.shape[-1]
    # head -> lane expansion matrix (constant; folded at trace time under jit)
    e_mat = jnp.repeat(jnp.eye(n_heads, dtype=jnp.float32), D // n_heads, axis=1)

    output = tgt
    intermediate = []
    intermediate_reference_points = []
    for lid, p in enumerate(params["layers"]):
        if reference_points.shape[-1] == 4:
            vr = jnp.concatenate([src_valid_ratios, src_valid_ratios], axis=-1)
            reference_points_input = reference_points[:, :, None] * vr[:, None]
        else:
            assert reference_points.shape[-1] == 2
            reference_points_input = (reference_points[:, :, None]
                                      * src_valid_ratios[:, None])
        output = decoder_layer_forward(
            p, output, query_pos, reference_points_input, src,
            spatial_shapes, level_starts, src_padding_mask,
            n_heads, n_levels, n_points, e_mat)
        # bbox_embed is None (default __init__) -> reference_points unchanged.
        if return_intermediate:
            intermediate.append(output)
            intermediate_reference_points.append(reference_points)
    if return_intermediate:
        return jnp.stack(intermediate), jnp.stack(intermediate_reference_points)
    return output, reference_points


# -----------------------------------------------------------------------------
# Deterministic parameter init (shapes follow the PyTorch module __init__).
# Matmul weights stored bf16 (MXU operands); biases / LN params stored (1, N) f32.
# 1/sqrt(Dh) attention scale is pre-folded into the Q projection; attention-weight
# columns are pre-permuted from PyTorch's (nH, L, P) order to lane-dense (L, P, nH).
# -----------------------------------------------------------------------------
def _linear_init(key, fan_in, fan_out):
    kw, kb = jax.random.split(key)
    w = jax.random.normal(kw, (fan_in, fan_out), jnp.float32) * 0.02
    b = jax.random.normal(kb, (fan_out,), jnp.float32) * 0.02
    return w, b


def init_decoder_params(key, num_layers, d_model, d_ffn, n_heads, n_levels,
                        n_points):
    layers = []
    nlp = n_heads * n_levels * n_points
    dh = d_model // n_heads
    attn_perm = jnp.arange(nlp).reshape(n_heads, n_levels * n_points).T.reshape(-1)
    for lk in jax.random.split(key, num_layers):
        ks = jax.random.split(lk, 8)
        p = {}
        # self attention (nn.MultiheadAttention equivalent), Q/K fused
        wqk, bqk = _linear_init(ks[0], d_model, 2 * d_model)
        scale = 1.0 / math.sqrt(dh)
        wqk = wqk.at[:, :d_model].multiply(scale)     # fold softmax scale into Q
        bqk = bqk.at[:d_model].multiply(scale)
        p["sa_wqk"], p["sa_bqk"] = wqk.astype(jnp.bfloat16), bqk.reshape(1, -1)
        wv, bv = _linear_init(ks[1], d_model, d_model)
        p["sa_wv"], p["sa_bv"] = wv.astype(jnp.bfloat16), bv.reshape(1, -1)
        wo, bo = _linear_init(ks[2], d_model, d_model)
        p["sa_wo"], p["sa_bo"] = wo.astype(jnp.bfloat16), bo.reshape(1, -1)
        # MSDeformAttn projections
        woff, boff = _linear_init(ks[3], d_model, 2 * nlp)
        p["ca_woff"], p["ca_boff"] = woff.astype(jnp.bfloat16), boff.reshape(1, -1)
        wattn, battn = _linear_init(ks[4], d_model, nlp)
        p["ca_wattn"] = wattn[:, attn_perm].astype(jnp.bfloat16)
        p["ca_battn"] = battn[attn_perm].reshape(1, -1)
        wval, bval = _linear_init(ks[5], d_model, d_model)
        p["ca_wval"], p["ca_bval"] = wval.astype(jnp.bfloat16), bval.reshape(1, -1)
        wout, bout = _linear_init(ks[6], d_model, d_model)
        p["ca_wout"], p["ca_bout"] = wout.astype(jnp.bfloat16), bout.reshape(1, -1)
        # FFN
        kw1, kw2 = jax.random.split(ks[7])
        w1, b1 = _linear_init(kw1, d_model, d_ffn)
        w2, b2 = _linear_init(kw2, d_ffn, d_model)
        p["ffn_w1"], p["ffn_b1"] = w1.astype(jnp.bfloat16), b1.reshape(1, -1)
        p["ffn_w2"], p["ffn_b2"] = w2.astype(jnp.bfloat16), b2.reshape(1, -1)
        # LayerNorms
        for name in ("ln1", "ln2", "ln3"):
            p[f"{name}_g"] = jnp.ones((1, d_model), jnp.float32)
            p[f"{name}_b"] = jnp.zeros((1, d_model), jnp.float32)
        layers.append(p)
    return {"layers": layers}


# -----------------------------------------------------------------------------
# Main
# -----------------------------------------------------------------------------
if __name__ == "__main__":
    B = 2            # batch
    Lq = 8           # number of queries
    d_model = 32
    n_heads = 4
    n_levels = 2
    n_points = 2
    d_ffn = 64
    num_layers = 2

    spatial_shapes = ((8, 8), (4, 4))          # (H_l, W_l) per level
    level_starts = (0, 64)
    S = sum(h * w for h, w in spatial_shapes)  # 80

    key = jax.random.PRNGKey(0)
    k_params, k_tgt, k_pos, k_src, k_ref = jax.random.split(key, 5)

    params = init_decoder_params(k_params, num_layers, d_model, d_ffn,
                                 n_heads, n_levels, n_points)

    tgt = jax.random.normal(k_tgt, (B, Lq, d_model), jnp.float32)
    query_pos = jax.random.normal(k_pos, (B, Lq, d_model), jnp.float32)
    src = jax.random.normal(k_src, (B, S, d_model), jnp.float32)
    reference_points = jax.random.uniform(k_ref, (B, Lq, 2), jnp.float32,
                                          minval=0.1, maxval=0.9)
    src_valid_ratios = jnp.ones((B, n_levels, 2), jnp.float32)

    fwd = jax.jit(functools.partial(
        decoder_forward,
        spatial_shapes=spatial_shapes, level_starts=level_starts,
        n_heads=n_heads, n_levels=n_levels, n_points=n_points,
        return_intermediate=False))

    out, ref_out = fwd(params, tgt, reference_points, src, src_valid_ratios,
                       query_pos, None)

    jax.block_until_ready(out)
    jax.block_until_ready(ref_out)
    assert out.shape == (B, Lq, d_model)
    assert ref_out.shape == (B, Lq, 2)
    assert bool(jnp.all(jnp.isfinite(out)))
    print("KERNEL_OK")
</pallas_src>

<mosaic_0001>
module attributes {stable_mosaic.version = 11 : i64} {
  func.func @_self_attn_kernel(%arg0: i32, %arg1: memref<1x8x32xf32, #tpu.memory_space<vmem>>, %arg2: memref<1x8x32xf32, #tpu.memory_space<vmem>>, %arg3: memref<32x64xbf16, #tpu.memory_space<vmem>>, %arg4: memref<1x64xf32, #tpu.memory_space<vmem>>, %arg5: memref<32x32xbf16, #tpu.memory_space<vmem>>, %arg6: memref<1x32xf32, #tpu.memory_space<vmem>>, %arg7: memref<32x32xbf16, #tpu.memory_space<vmem>>, %arg8: memref<1x32xf32, #tpu.memory_space<vmem>>, %arg9: memref<1x32xf32, #tpu.memory_space<vmem>>, %arg10: memref<1x32xf32, #tpu.memory_space<vmem>>, %arg11: memref<32x32xbf16, #tpu.memory_space<vmem>>, %arg12: memref<1x32xf32, #tpu.memory_space<vmem>>, %arg13: memref<32x16xbf16, #tpu.memory_space<vmem>>, %arg14: memref<1x16xf32, #tpu.memory_space<vmem>>, %arg15: memref<1x8x32xf32, #tpu.memory_space<vmem>>, %arg16: memref<1x8x32xf32, #tpu.memory_space<vmem>>, %arg17: memref<1x8x16xf32, #tpu.memory_space<vmem>>) attributes {dimension_semantics = [#tpu.dimension_semantics<parallel>], iteration_bounds = array<i64: 2>, scalar_prefetch = 0 : i64, scratch_operands = 0 : i64, tpu.core_type = #tpu.core_type<tc>, window_params = [{transform_indices = @transform_0, window_bounds = array<i64: 1, 8, 32>}, {transform_indices = @transform_1, window_bounds = array<i64: 1, 8, 32>}, {pipeline_mode = #tpu.pipeline_mode<synchronous>, transform_indices = @transform_2, window_bounds = array<i64: 32, 64>}, {pipeline_mode = #tpu.pipeline_mode<synchronous>, transform_indices = @transform_3, window_bounds = array<i64: 1, 64>}, {pipeline_mode = #tpu.pipeline_mode<synchronous>, transform_indices = @transform_4, window_bounds = array<i64: 32, 32>}, {pipeline_mode = #tpu.pipeline_mode<synchronous>, transform_indices = @transform_5, window_bounds = array<i64: 1, 32>}, {pipeline_mode = #tpu.pipeline_mode<synchronous>, transform_indices = @transform_6, window_bounds = array<i64: 32, 32>}, {pipeline_mode = #tpu.pipeline_mode<synchronous>, transform_indices = @transform_7, window_bounds = array<i64: 1, 32>}, {pipeline_mode = #tpu.pipeline_mode<synchronous>, transform_indices = @transform_8, window_bounds = array<i64: 1, 32>}, {pipeline_mode = #tpu.pipeline_mode<synchronous>, transform_indices = @transform_9, window_bounds = array<i64: 1, 32>}, {pipeline_mode = #tpu.pipeline_mode<synchronous>, transform_indices = @transform_10, window_bounds = array<i64: 32, 32>}, {pipeline_mode = #tpu.pipeline_mode<synchronous>, transform_indices = @transform_11, window_bounds = array<i64: 1, 32>}, {pipeline_mode = #tpu.pipeline_mode<synchronous>, transform_indices = @transform_12, window_bounds = array<i64: 32, 16>}, {pipeline_mode = #tpu.pipeline_mode<synchronous>, transform_indices = @transform_13, window_bounds = array<i64: 1, 16>}, {transform_indices = @transform_14, window_bounds = array<i64: 1, 8, 32>}, {transform_indices = @transform_15, window_bounds = array<i64: 1, 8, 32>}, {transform_indices = @transform_16, window_bounds = array<i64: 1, 8, 16>}]} {
    %c0 = arith.constant 0 : index
    %c0_0 = arith.constant 0 : index
    %c0_1 = arith.constant 0 : index
    %0 = vector.load %arg1[%c0, %c0_0, %c0_1] : memref<1x8x32xf32, #tpu.memory_space<vmem>>, vector<1x8x32xf32>
    %1 = vector.shape_cast %0 : vector<1x8x32xf32> to vector<8x32xf32>
    %c0_2 = arith.constant 0 : index
    %c0_3 = arith.constant 0 : index
    %c0_4 = arith.constant 0 : index
    %2 = vector.load %arg2[%c0_2, %c0_3, %c0_4] : memref<1x8x32xf32, #tpu.memory_space<vmem>>, vector<1x8x32xf32>
    %3 = vector.shape_cast %2 : vector<1x8x32xf32> to vector<8x32xf32>
    %4 = arith.addf %1, %3 : vector<8x32xf32>
    %5 = arith.truncf %4 : vector<8x32xf32> to vector<8x32xbf16>
    %c0_5 = arith.constant 0 : index
    %c0_6 = arith.constant 0 : index
    %6 = vector.load %arg3[%c0_5, %c0_6] : memref<32x64xbf16, #tpu.memory_space<vmem>>, vector<32x64xbf16>
    %cst = arith.constant dense<0.000000e+00> : vector<8x64xf32>
    %7 = tpu.matmul %5, %6, %cst {dimension_numbers = #tpu.dot_dimension_numbers<[1], [0], [0], [1], [0, 0, 1, 1], [], []>} : vector<8x32xbf16>, vector<32x64xbf16>, vector<8x64xf32> -> vector<8x64xf32>
    %c0_7 = arith.constant 0 : index
    %c0_8 = arith.constant 0 : index
    %8 = vector.load %arg4[%c0_7, %c0_8] : memref<1x64xf32, #tpu.memory_space<vmem>>, vector<1x64xf32>
    %9 = vector.broadcast %8 : vector<1x64xf32> to vector<8x64xf32>
    %10 = arith.addf %7, %9 : vector<8x64xf32>
    %11 = arith.truncf %1 : vector<8x32xf32> to vector<8x32xbf16>
    %c0_9 = arith.constant 0 : index
    %c0_10 = arith.constant 0 : index
    %12 = vector.load %arg5[%c0_9, %c0_10] : memref<32x32xbf16, #tpu.memory_space<vmem>>, vector<32x32xbf16>
    %cst_11 = arith.constant dense<0.000000e+00> : vector<8x32xf32>
    %13 = tpu.matmul %11, %12, %cst_11 {dimension_numbers = #tpu.dot_dimension_numbers<[1], [0], [0], [1], [0, 0, 1, 1], [], []>} : vector<8x32xbf16>, vector<32x32xbf16>, vector<8x32xf32> -> vector<8x32xf32>
    %c0_12 = arith.constant 0 : index
    %c0_13 = arith.constant 0 : index
    %14 = vector.load %arg6[%c0_12, %c0_13] : memref<1x32xf32, #tpu.memory_space<vmem>>, vector<1x32xf32>
    %15 = vector.broadcast %14 : vector<1x32xf32> to vector<8x32xf32>
    %16 = arith.addf %13, %15 : vector<8x32xf32>
    %17 = vector.extract_strided_slice %10 {offsets = [0, 0], sizes = [8, 32], strides = [1, 1]} : vector<8x64xf32> to vector<8x32xf32>
    %18 = arith.truncf %17 : vector<8x32xf32> to vector<8x32xbf16>
    %19 = vector.extract_strided_slice %10 {offsets = [0, 32], sizes = [8, 32], strides = [1, 1]} : vector<8x64xf32> to vector<8x32xf32>
    %20 = arith.truncf %19 : vector<8x32xf32> to vector<8x32xbf16>
    %21 = arith.truncf %16 : vector<8x32xf32> to vector<8x32xbf16>
    %22 = vector.extract_strided_slice %18 {offsets = [0, 0], sizes = [8, 8], strides = [1, 1]} : vector<8x32xbf16> to vector<8x8xbf16>
    %23 = vector.extract_strided_slice %20 {offsets = [0, 0], sizes = [8, 8], strides = [1, 1]} : vector<8x32xbf16> to vector<8x8xbf16>
    %24 = tpu.transpose %23, [1, 0] : vector<8x8xbf16> -> vector<8x8xbf16>
    %cst_14 = arith.constant dense<0.000000e+00> : vector<8x8xf32>
    %25 = tpu.matmul %22, %24, %cst_14 {dimension_numbers = #tpu.dot_dimension_numbers<[1], [0], [0], [1], [0, 0, 1, 1], [], []>} : vector<8x8xbf16>, vector<8x8xbf16>, vector<8x8xf32> -> vector<8x8xf32>
    %cst_15 = arith.constant dense<0xFF800000> : vector<8xf32>
    %26 = vector.multi_reduction <maximumf>, %25, %cst_15 [1] : vector<8x8xf32> to vector<8xf32>
    %27 = vector.shape_cast %26 : vector<8xf32> to vector<8x1xf32>
    %28 = vector.broadcast %27 : vector<8x1xf32> to vector<8x8xf32>
    %29 = arith.subf %25, %28 : vector<8x8xf32>
    %30 = math.exp %29 : vector<8x8xf32>
    %cst_16 = arith.constant dense<0.000000e+00> : vector<8xf32>
    %31 = vector.multi_reduction <add>, %30, %cst_16 [1] : vector<8x8xf32> to vector<8xf32>
    %32 = vector.shape_cast %31 : vector<8xf32> to vector<8x1xf32>
    %33 = tpu.reciprocal %32 {approx = true} : vector<8x1xf32> -> vector<8x1xf32>
    %34 = vector.broadcast %33 : vector<8x1xf32> to vector<8x8xf32>
    %35 = arith.mulf %30, %34 : vector<8x8xf32>
    %36 = arith.truncf %35 : vector<8x8xf32> to vector<8x8xbf16>
    %37 = vector.extract_strided_slice %21 {offsets = [0, 0], sizes = [8, 8], strides = [1, 1]} : vector<8x32xbf16> to vector<8x8xbf16>
    %cst_17 = arith.constant dense<0.000000e+00> : vector<8x8xf32>
    %38 = tpu.matmul %36, %37, %cst_17 {dimension_numbers = #tpu.dot_dimension_numbers<[1], [0], [0], [1], [0, 0, 1, 1], [], []>} : vector<8x8xbf16>, vector<8x8xbf16>, vector<8x8xf32> -> vector<8x8xf32>
    %39 = vector.extract_strided_slice %18 {offsets = [0, 8], sizes = [8, 8], strides = [1, 1]} : vector<8x32xbf16> to vector<8x8xbf16>
    %40 = vector.extract_strided_slice %20 {offsets = [0, 8], sizes = [8, 8], strides = [1, 1]} : vector<8x32xbf16> to vector<8x8xbf16>
    %41 = tpu.transpose %40, [1, 0] : vector<8x8xbf16> -> vector<8x8xbf16>
    %cst_18 = arith.constant dense<0.000000e+00> : vector<8x8xf32>
    %42 = tpu.matmul %39, %41, %cst_18 {dimension_numbers = #tpu.dot_dimension_numbers<[1], [0], [0], [1], [0, 0, 1, 1], [], []>} : vector<8x8xbf16>, vector<8x8xbf16>, vector<8x8xf32> -> vector<8x8xf32>
    %cst_19 = arith.constant dense<0xFF800000> : vector<8xf32>
    %43 = vector.multi_reduction <maximumf>, %42, %cst_19 [1] : vector<8x8xf32> to vector<8xf32>
    %44 = vector.shape_cast %43 : vector<8xf32> to vector<8x1xf32>
    %45 = vector.broadcast %44 : vector<8x1xf32> to vector<8x8xf32>
    %46 = arith.subf %42, %45 : vector<8x8xf32>
    %47 = math.exp %46 : vector<8x8xf32>
    %cst_20 = arith.constant dense<0.000000e+00> : vector<8xf32>
    %48 = vector.multi_reduction <add>, %47, %cst_20 [1] : vector<8x8xf32> to vector<8xf32>
    %49 = vector.shape_cast %48 : vector<8xf32> to vector<8x1xf32>
    %50 = tpu.reciprocal %49 {approx = true} : vector<8x1xf32> -> vector<8x1xf32>
    %51 = vector.broadcast %50 : vector<8x1xf32> to vector<8x8xf32>
    %52 = arith.mulf %47, %51 : vector<8x8xf32>
    %53 = arith.truncf %52 : vector<8x8xf32> to vector<8x8xbf16>
    %54 = vector.extract_strided_slice %21 {offsets = [0, 8], sizes = [8, 8], strides = [1, 1]} : vector<8x32xbf16> to vector<8x8xbf16>
    %cst_21 = arith.constant dense<0.000000e+00> : vector<8x8xf32>
    %55 = tpu.matmul %53, %54, %cst_21 {dimension_numbers = #tpu.dot_dimension_numbers<[1], [0], [0], [1], [0, 0, 1, 1], [], []>} : vector<8x8xbf16>, vector<8x8xbf16>, vector<8x8xf32> -> vector<8x8xf32>
    %56 = vector.extract_strided_slice %18 {offsets = [0, 16], sizes = [8, 8], strides = [1, 1]} : vector<8x32xbf16> to vector<8x8xbf16>
    %57 = vector.extract_strided_slice %20 {offsets = [0, 16], sizes = [8, 8], strides = [1, 1]} : vector<8x32xbf16> to vector<8x8xbf16>
    %58 = tpu.transpose %57, [1, 0] : vector<8x8xbf16> -> vector<8x8xbf16>
    %cst_22 = arith.constant dense<0.000000e+00> : vector<8x8xf32>
    %59 = tpu.matmul %56, %58, %cst_22 {dimension_numbers = #tpu.dot_dimension_numbers<[1], [0], [0], [1], [0, 0, 1, 1], [], []>} : vector<8x8xbf16>, vector<8x8xbf16>, vector<8x8xf32> -> vector<8x8xf32>
    %cst_23 = arith.constant dense<0xFF800000> : vector<8xf32>
    %60 = vector.multi_reduction <maximumf>, %59, %cst_23 [1] : vector<8x8xf32> to vector<8xf32>
    %61 = vector.shape_cast %60 : vector<8xf32> to vector<8x1xf32>
    %62 = vector.broadcast %61 : vector<8x1xf32> to vector<8x8xf32>
    %63 = arith.subf %59, %62 : vector<8x8xf32>
    %64 = math.exp %63 : vector<8x8xf32>
    %cst_24 = arith.constant dense<0.000000e+00> : vector<8xf32>
    %65 = vector.multi_reduction <add>, %64, %cst_24 [1] : vector<8x8xf32> to vector<8xf32>
    %66 = vector.shape_cast %65 : vector<8xf32> to vector<8x1xf32>
    %67 = tpu.reciprocal %66 {approx = true} : vector<8x1xf32> -> vector<8x1xf32>
    %68 = vector.broadcast %67 : vector<8x1xf32> to vector<8x8xf32>
    %69 = arith.mulf %64, %68 : vector<8x8xf32>
    %70 = arith.truncf %69 : vector<8x8xf32> to vector<8x8xbf16>
    %71 = vector.extract_strided_slice %21 {offsets = [0, 16], sizes = [8, 8], strides = [1, 1]} : vector<8x32xbf16> to vector<8x8xbf16>
    %cst_25 = arith.constant dense<0.000000e+00> : vector<8x8xf32>
    %72 = tpu.matmul %70, %71, %cst_25 {dimension_numbers = #tpu.dot_dimension_numbers<[1], [0], [0], [1], [0, 0, 1, 1], [], []>} : vector<8x8xbf16>, vector<8x8xbf16>, vector<8x8xf32> -> vector<8x8xf32>
    %73 = vector.extract_strided_slice %18 {offsets = [0, 24], sizes = [8, 8], strides = [1, 1]} : vector<8x32xbf16> to vector<8x8xbf16>
    %74 = vector.extract_strided_slice %20 {offsets = [0, 24], sizes = [8, 8], strides = [1, 1]} : vector<8x32xbf16> to vector<8x8xbf16>
    %75 = tpu.transpose %74, [1, 0] : vector<8x8xbf16> -> vector<8x8xbf16>
    %cst_26 = arith.constant dense<0.000000e+00> : vector<8x8xf32>
    %76 = tpu.matmul %73, %75, %cst_26 {dimension_numbers = #tpu.dot_dimension_numbers<[1], [0], [0], [1], [0, 0, 1, 1], [], []>} : vector<8x8xbf16>, vector<8x8xbf16>, vector<8x8xf32> -> vector<8x8xf32>
    %cst_27 = arith.constant dense<0xFF800000> : vector<8xf32>
    %77 = vector.multi_reduction <maximumf>, %76, %cst_27 [1] : vector<8x8xf32> to vector<8xf32>
    %78 = vector.shape_cast %77 : vector<8xf32> to vector<8x1xf32>
    %79 = vector.broadcast %78 : vector<8x1xf32> to vector<8x8xf32>
    %80 = arith.subf %76, %79 : vector<8x8xf32>
    %81 = math.exp %80 : vector<8x8xf32>
    %cst_28 = arith.constant dense<0.000000e+00> : vector<8xf32>
    %82 = vector.multi_reduction <add>, %81, %cst_28 [1] : vector<8x8xf32> to vector<8xf32>
    %83 = vector.shape_cast %82 : vector<8xf32> to vector<8x1xf32>
    %84 = tpu.reciprocal %83 {approx = true} : vector<8x1xf32> -> vector<8x1xf32>
    %85 = vector.broadcast %84 : vector<8x1xf32> to vector<8x8xf32>
    %86 = arith.mulf %81, %85 : vector<8x8xf32>
    %87 = arith.truncf %86 : vector<8x8xf32> to vector<8x8xbf16>
    %88 = vector.extract_strided_slice %21 {offsets = [0, 24], sizes = [8, 8], strides = [1, 1]} : vector<8x32xbf16> to vector<8x8xbf16>
    %cst_29 = arith.constant dense<0.000000e+00> : vector<8x8xf32>
    %89 = tpu.matmul %87, %88, %cst_29 {dimension_numbers = #tpu.dot_dimension_numbers<[1], [0], [0], [1], [0, 0, 1, 1], [], []>} : vector<8x8xbf16>, vector<8x8xbf16>, vector<8x8xf32> -> vector<8x8xf32>
    %90 = tpu.concatenate %38, %55, %72, %89 in 1 : vector<8x8xf32>, vector<8x8xf32>, vector<8x8xf32>, vector<8x8xf32> -> vector<8x32xf32>
    %91 = arith.truncf %90 : vector<8x32xf32> to vector<8x32xbf16>
    %c0_30 = arith.constant 0 : index
    %c0_31 = arith.constant 0 : index
    %92 = vector.load %arg7[%c0_30, %c0_31] : memref<32x32xbf16, #tpu.memory_space<vmem>>, vector<32x32xbf16>
    %cst_32 = arith.constant dense<0.000000e+00> : vector<8x32xf32>
    %93 = tpu.matmul %91, %92, %cst_32 {dimension_numbers = #tpu.dot_dimension_numbers<[1], [0], [0], [1], [0, 0, 1, 1], [], []>} : vector<8x32xbf16>, vector<32x32xbf16>, vector<8x32xf32> -> vector<8x32xf32>
    %c0_33 = arith.constant 0 : index
    %c0_34 = arith.constant 0 : index
    %94 = vector.load %arg8[%c0_33, %c0_34] : memref<1x32xf32, #tpu.memory_space<vmem>>, vector<1x32xf32>
    %95 = vector.broadcast %94 : vector<1x32xf32> to vector<8x32xf32>
    %96 = arith.addf %93, %95 : vector<8x32xf32>
    %97 = arith.addf %96, %1 : vector<8x32xf32>
    %cst_35 = arith.constant dense<0.000000e+00> : vector<8xf32>
    %98 = vector.multi_reduction <add>, %97, %cst_35 [1] : vector<8x32xf32> to vector<8xf32>
    %99 = vector.shape_cast %98 : vector<8xf32> to vector<8x1xf32>
    %cst_36 = arith.constant 3.200000e+01 : f32
    %100 = vector.broadcast %cst_36 : f32 to vector<8x1xf32>
    %101 = arith.divf %99, %100 : vector<8x1xf32>
    %102 = vector.broadcast %101 : vector<8x1xf32> to vector<8x32xf32>
    %103 = arith.subf %97, %102 : vector<8x32xf32>
    %104 = vector.broadcast %101 : vector<8x1xf32> to vector<8x32xf32>
    %105 = arith.subf %97, %104 : vector<8x32xf32>
    %106 = arith.mulf %103, %105 : vector<8x32xf32>
    %cst_37 = arith.constant dense<0.000000e+00> : vector<8xf32>
    %107 = vector.multi_reduction <add>, %106, %cst_37 [1] : vector<8x32xf32> to vector<8xf32>
    %108 = vector.shape_cast %107 : vector<8xf32> to vector<8x1xf32>
    %cst_38 = arith.constant 3.200000e+01 : f32
    %109 = vector.broadcast %cst_38 : f32 to vector<8x1xf32>
    %110 = arith.divf %108, %109 : vector<8x1xf32>
    %111 = vector.broadcast %101 : vector<8x1xf32> to vector<8x32xf32>
    %112 = arith.subf %97, %111 : vector<8x32xf32>
    %cst_39 = arith.constant 9.99999974E-6 : f32
    %113 = vector.broadcast %cst_39 : f32 to vector<8x1xf32>
    %114 = arith.addf %110, %113 : vector<8x1xf32>
    %115 = math.rsqrt %114 : vector<8x1xf32>
    %116 = vector.broadcast %115 : vector<8x1xf32> to vector<8x32xf32>
    %117 = arith.mulf %112, %116 : vector<8x32xf32>
    %c0_40 = arith.constant 0 : index
    %c0_41 = arith.constant 0 : index
    %118 = vector.load %arg9[%c0_40, %c0_41] : memref<1x32xf32, #tpu.memory_space<vmem>>, vector<1x32xf32>
    %119 = vector.broadcast %118 : vector<1x32xf32> to vector<8x32xf32>
    %120 = arith.mulf %117, %119 : vector<8x32xf32>
    %c0_42 = arith.constant 0 : index
    %c0_43 = arith.constant 0 : index
    %121 = vector.load %arg10[%c0_42, %c0_43] : memref<1x32xf32, #tpu.memory_space<vmem>>, vector<1x32xf32>
    %122 = vector.broadcast %121 : vector<1x32xf32> to vector<8x32xf32>
    %123 = arith.addf %120, %122 : vector<8x32xf32>
    %c0_44 = arith.constant 0 : index
    %c0_45 = arith.constant 0 : index
    %c0_46 = arith.constant 0 : index
    %124 = vector.load %arg15[%c0_44, %c0_45, %c0_46] : memref<1x8x32xf32, #tpu.memory_space<vmem>>, vector<1x8x32xf32>
    %125 = vector.shape_cast %124 : vector<1x8x32xf32> to vector<8x32xf32>
    %126 = vector.shape_cast %123 : vector<8x32xf32> to vector<1x8x32xf32>
    tpu.vector_store %arg15[%c0_44, %c0_45, %c0_46], %126 {strides = array<i32>} : memref<1x8x32xf32, #tpu.memory_space<vmem>>, vector<1x8x32xf32>,
    %127 = arith.addf %123, %3 : vector<8x32xf32>
    %128 = arith.truncf %127 : vector<8x32xf32> to vector<8x32xbf16>
    %c0_47 = arith.constant 0 : index
    %c0_48 = arith.constant 0 : index
    %129 = vector.load %arg11[%c0_47, %c0_48] : memref<32x32xbf16, #tpu.memory_space<vmem>>, vector<32x32xbf16>
    %cst_49 = arith.constant dense<0.000000e+00> : vector<8x32xf32>
    %130 = tpu.matmul %128, %129, %cst_49 {dimension_numbers = #tpu.dot_dimension_numbers<[1], [0], [0], [1], [0, 0, 1, 1], [], []>} : vector<8x32xbf16>, vector<32x32xbf16>, vector<8x32xf32> -> vector<8x32xf32>
    %c0_50 = arith.constant 0 : index
    %c0_51 = arith.constant 0 : index
    %131 = vector.load %arg12[%c0_50, %c0_51] : memref<1x32xf32, #tpu.memory_space<vmem>>, vector<1x32xf32>
    %132 = vector.broadcast %131 : vector<1x32xf32> to vector<8x32xf32>
    %133 = arith.addf %130, %132 : vector<8x32xf32>
    %c0_52 = arith.constant 0 : index
    %c0_53 = arith.constant 0 : index
    %c0_54 = arith.constant 0 : index
    %134 = vector.load %arg16[%c0_52, %c0_53, %c0_54] : memref<1x8x32xf32, #tpu.memory_space<vmem>>, vector<1x8x32xf32>
    %135 = vector.shape_cast %134 : vector<1x8x32xf32> to vector<8x32xf32>
    %136 = vector.shape_cast %133 : vector<8x32xf32> to vector<1x8x32xf32>
    tpu.vector_store %arg16[%c0_52, %c0_53, %c0_54], %136 {strides = array<i32>} : memref<1x8x32xf32, #tpu.memory_space<vmem>>, vector<1x8x32xf32>,
    %c0_55 = arith.constant 0 : index
    %c0_56 = arith.constant 0 : index
    %137 = vector.load %arg13[%c0_55, %c0_56] : memref<32x16xbf16, #tpu.memory_space<vmem>>, vector<32x16xbf16>
    %cst_57 = arith.constant dense<0.000000e+00> : vector<8x16xf32>
    %138 = tpu.matmul %128, %137, %cst_57 {dimension_numbers = #tpu.dot_dimension_numbers<[1], [0], [0], [1], [0, 0, 1, 1], [], []>} : vector<8x32xbf16>, vector<32x16xbf16>, vector<8x16xf32> -> vector<8x16xf32>
    %c0_58 = arith.constant 0 : index
    %c0_59 = arith.constant 0 : index
    %139 = vector.load %arg14[%c0_58, %c0_59] : memref<1x16xf32, #tpu.memory_space<vmem>>, vector<1x16xf32>
    %140 = vector.broadcast %139 : vector<1x16xf32> to vector<8x16xf32>
    %141 = arith.addf %138, %140 : vector<8x16xf32>
    %c0_60 = arith.constant 0 : index
    %c0_61 = arith.constant 0 : index
    %c0_62 = arith.constant 0 : index
    %142 = vector.load %arg17[%c0_60, %c0_61, %c0_62] : memref<1x8x16xf32, #tpu.memory_space<vmem>>, vector<1x8x16xf32>
    %143 = vector.shape_cast %142 : vector<1x8x16xf32> to vector<8x16xf32>
    %144 = vector.shape_cast %141 : vector<8x16xf32> to vector<1x8x16xf32>
    tpu.vector_store %arg17[%c0_60, %c0_61, %c0_62], %144 {strides = array<i32>} : memref<1x8x16xf32, #tpu.memory_space<vmem>>, vector<1x8x16xf32>,
    return
  }
  func.func @transform_0(%arg0: i32) -> (i32, i32, i32) {
    %c0_i32 = arith.constant 0 : i32
    %c0_i32_0 = arith.constant 0 : i32
    %c0_i32_1 = arith.constant 0 : i32
    return %arg0, %c0_i32, %c0_i32_0 : i32, i32, i32
  }
  func.func @transform_1(%arg0: i32) -> (i32, i32, i32) {
    %c0_i32 = arith.constant 0 : i32
    %c0_i32_0 = arith.constant 0 : i32
    %c0_i32_1 = arith.constant 0 : i32
    return %arg0, %c0_i32, %c0_i32_0 : i32, i32, i32
  }
  func.func @transform_2(%arg0: i32) -> (i32, i32) {
    %c0_i32 = arith.constant 0 : i32
    %c0_i32_0 = arith.constant 0 : i32
    %c0_i32_1 = arith.constant 0 : i32
    return %c0_i32, %c0_i32_0 : i32, i32
  }
  func.func @transform_3(%arg0: i32) -> (i32, i32) {
    %c0_i32 = arith.constant 0 : i32
    %c0_i32_0 = arith.constant 0 : i32
    %c0_i32_1 = arith.constant 0 : i32
    return %c0_i32, %c0_i32_0 : i32, i32
  }
  func.func @transform_4(%arg0: i32) -> (i32, i32) {
    %c0_i32 = arith.constant 0 : i32
    %c0_i32_0 = arith.constant 0 : i32
    %c0_i32_1 = arith.constant 0 : i32
    return %c0_i32, %c0_i32_0 : i32, i32
  }
  func.func @transform_5(%arg0: i32) -> (i32, i32) {
    %c0_i32 = arith.constant 0 : i32
    %c0_i32_0 = arith.constant 0 : i32
    %c0_i32_1 = arith.constant 0 : i32
    return %c0_i32, %c0_i32_0 : i32, i32
  }
  func.func @transform_6(%arg0: i32) -> (i32, i32) {
    %c0_i32 = arith.constant 0 : i32
    %c0_i32_0 = arith.constant 0 : i32
    %c0_i32_1 = arith.constant 0 : i32
    return %c0_i32, %c0_i32_0 : i32, i32
  }
  func.func @transform_7(%arg0: i32) -> (i32, i32) {
    %c0_i32 = arith.constant 0 : i32
    %c0_i32_0 = arith.constant 0 : i32
    %c0_i32_1 = arith.constant 0 : i32
    return %c0_i32, %c0_i32_0 : i32, i32
  }
  func.func @transform_8(%arg0: i32) -> (i32, i32) {
    %c0_i32 = arith.constant 0 : i32
    %c0_i32_0 = arith.constant 0 : i32
    %c0_i32_1 = arith.constant 0 : i32
    return %c0_i32, %c0_i32_0 : i32, i32
  }
  func.func @transform_9(%arg0: i32) -> (i32, i32) {
    %c0_i32 = arith.constant 0 : i32
    %c0_i32_0 = arith.constant 0 : i32
    %c0_i32_1 = arith.constant 0 : i32
    return %c0_i32, %c0_i32_0 : i32, i32
  }
  func.func @transform_10(%arg0: i32) -> (i32, i32) {
    %c0_i32 = arith.constant 0 : i32
    %c0_i32_0 = arith.constant 0 : i32
    %c0_i32_1 = arith.constant 0 : i32
    return %c0_i32, %c0_i32_0 : i32, i32
  }
  func.func @transform_11(%arg0: i32) -> (i32, i32) {
    %c0_i32 = arith.constant 0 : i32
    %c0_i32_0 = arith.constant 0 : i32
    %c0_i32_1 = arith.constant 0 : i32
    return %c0_i32, %c0_i32_0 : i32, i32
  }
  func.func @transform_12(%arg0: i32) -> (i32, i32) {
    %c0_i32 = arith.constant 0 : i32
    %c0_i32_0 = arith.constant 0 : i32
    %c0_i32_1 = arith.constant 0 : i32
    return %c0_i32, %c0_i32_0 : i32, i32
  }
  func.func @transform_13(%arg0: i32) -> (i32, i32) {
    %c0_i32 = arith.constant 0 : i32
    %c0_i32_0 = arith.constant 0 : i32
    %c0_i32_1 = arith.constant 0 : i32
    return %c0_i32, %c0_i32_0 : i32, i32
  }
  func.func @transform_14(%arg0: i32) -> (i32, i32, i32) {
    %c0_i32 = arith.constant 0 : i32
    %c0_i32_0 = arith.constant 0 : i32
    %c0_i32_1 = arith.constant 0 : i32
    return %arg0, %c0_i32, %c0_i32_0 : i32, i32, i32
  }
  func.func @transform_15(%arg0: i32) -> (i32, i32, i32) {
    %c0_i32 = arith.constant 0 : i32
    %c0_i32_0 = arith.constant 0 : i32
    %c0_i32_1 = arith.constant 0 : i32
    return %arg0, %c0_i32, %c0_i32_0 : i32, i32, i32
  }
  func.func @transform_16(%arg0: i32) -> (i32, i32, i32) {
    %c0_i32 = arith.constant 0 : i32
    %c0_i32_0 = arith.constant 0 : i32
    %c0_i32_1 = arith.constant 0 : i32
    return %arg0, %c0_i32, %c0_i32_0 : i32, i32, i32
  }
}

module attributes {stable_mosaic.version = 11 : i64} {
  func.func @_matmul_kernel(%arg0: i32, %arg1: memref<80x32xf32, #tpu.memory_space<vmem>>, %arg2: memref<32x32xbf16, #tpu.memory_space<vmem>>, %arg3: memref<1x32xf32, #tpu.memory_space<vmem>>, %arg4: memref<80x32xbf16, #tpu.memory_space<vmem>>) attributes {dimension_semantics = [#tpu.dimension_semantics<parallel>], iteration_bounds = array<i64: 2>, scalar_prefetch = 0 : i64, scratch_operands = 0 : i64, tpu.core_type = #tpu.core_type<tc>, window_params = [{transform_indices = @transform_0, window_bounds = array<i64: 80, 32>}, {pipeline_mode = #tpu.pipeline_mode<synchronous>, transform_indices = @transform_1, window_bounds = array<i64: 32, 32>}, {pipeline_mode = #tpu.pipeline_mode<synchronous>, transform_indices = @transform_2, window_bounds = array<i64: 1, 32>}, {transform_indices = @transform_3, window_bounds = array<i64: 80, 32>}]} {
    %c0 = arith.constant 0 : index
    %c0_0 = arith.constant 0 : index
    %0 = vector.load %arg1[%c0, %c0_0] : memref<80x32xf32, #tpu.memory_space<vmem>>, vector<80x32xf32>
    %1 = arith.truncf %0 : vector<80x32xf32> to vector<80x32xbf16>
    %c0_1 = arith.constant 0 : index
    %c0_2 = arith.constant 0 : index
    %2 = vector.load %arg2[%c0_1, %c0_2] : memref<32x32xbf16, #tpu.memory_space<vmem>>, vector<32x32xbf16>
    %cst = arith.constant dense<0.000000e+00> : vector<80x32xf32>
    %3 = tpu.matmul %1, %2, %cst {dimension_numbers = #tpu.dot_dimension_numbers<[1], [0], [0], [1], [0, 0, 1, 1], [], []>} : vector<80x32xbf16>, vector<32x32xbf16>, vector<80x32xf32> -> vector<80x32xf32>
    %c0_3 = arith.constant 0 : index
    %c0_4 = arith.constant 0 : index
    %4 = vector.load %arg3[%c0_3, %c0_4] : memref<1x32xf32, #tpu.memory_space<vmem>>, vector<1x32xf32>
    %5 = vector.broadcast %4 : vector<1x32xf32> to vector<80x32xf32>
    %6 = arith.addf %3, %5 : vector<80x32xf32>
    %7 = arith.truncf %6 : vector<80x32xf32> to vector<80x32xbf16>
    %c0_5 = arith.constant 0 : index
    %c0_6 = arith.constant 0 : index
    %8 = vector.load %arg4[%c0_5, %c0_6] : memref<80x32xbf16, #tpu.memory_space<vmem>>, vector<80x32xbf16>
    tpu.vector_store %arg4[%c0_5, %c0_6], %7 {strides = array<i32>} : memref<80x32xbf16, #tpu.memory_space<vmem>>, vector<80x32xbf16>,
    return
  }
  func.func @transform_0(%arg0: i32) -> (i32, i32) {
    %c0_i32 = arith.constant 0 : i32
    %c0_i32_0 = arith.constant 0 : i32
    return %arg0, %c0_i32 : i32, i32
  }
  func.func @transform_1(%arg0: i32) -> (i32, i32) {
    %c0_i32 = arith.constant 0 : i32
    %c0_i32_0 = arith.constant 0 : i32
    %c0_i32_1 = arith.constant 0 : i32
    return %c0_i32, %c0_i32_0 : i32, i32
  }
  func.func @transform_2(%arg0: i32) -> (i32, i32) {
    %c0_i32 = arith.constant 0 : i32
    %c0_i32_0 = arith.constant 0 : i32
    %c0_i32_1 = arith.constant 0 : i32
    return %c0_i32, %c0_i32_0 : i32, i32
  }
  func.func @transform_3(%arg0: i32) -> (i32, i32) {
    %c0_i32 = arith.constant 0 : i32
    %c0_i32_0 = arith.constant 0 : i32
    return %arg0, %c0_i32 : i32, i32
  }
}

module attributes {stable_mosaic.version = 11 : i64} {
  func.func @_deform_ffn_kernel(%arg0: i32, %arg1: memref<8x4x32xbf16, #tpu.memory_space<vmem>>, %arg2: memref<8x4x4xf32, #tpu.memory_space<vmem>>, %arg3: memref<4x32xf32, #tpu.memory_space<vmem>>, %arg4: memref<32x32xbf16, #tpu.memory_space<vmem>>, %arg5: memref<1x32xf32, #tpu.memory_space<vmem>>, %arg6: memref<8x32xf32, #tpu.memory_space<vmem>>, %arg7: memref<1x32xf32, #tpu.memory_space<vmem>>, %arg8: memref<1x32xf32, #tpu.memory_space<vmem>>, %arg9: memref<32x64xbf16, #tpu.memory_space<vmem>>, %arg10: memref<1x64xf32, #tpu.memory_space<vmem>>, %arg11: memref<64x32xbf16, #tpu.memory_space<vmem>>, %arg12: memref<1x32xf32, #tpu.memory_space<vmem>>, %arg13: memref<1x32xf32, #tpu.memory_space<vmem>>, %arg14: memref<1x32xf32, #tpu.memory_space<vmem>>, %arg15: memref<8x32xf32, #tpu.memory_space<vmem>>) attributes {dimension_semantics = [#tpu.dimension_semantics<parallel>], iteration_bounds = array<i64: 2>, scalar_prefetch = 0 : i64, scratch_operands = 0 : i64, tpu.core_type = #tpu.core_type<tc>, window_params = [{transform_indices = @transform_0, window_bounds = array<i64: 8, 4, 32>}, {transform_indices = @transform_1, window_bounds = array<i64: 8, 4, 4>}, {pipeline_mode = #tpu.pipeline_mode<synchronous>, transform_indices = @transform_2, window_bounds = array<i64: 4, 32>}, {pipeline_mode = #tpu.pipeline_mode<synchronous>, transform_indices = @transform_3, window_bounds = array<i64: 32, 32>}, {pipeline_mode = #tpu.pipeline_mode<synchronous>, transform_indices = @transform_4, window_bounds = array<i64: 1, 32>}, {transform_indices = @transform_5, window_bounds = array<i64: 8, 32>}, {pipeline_mode = #tpu.pipeline_mode<synchronous>, transform_indices = @transform_6, window_bounds = array<i64: 1, 32>}, {pipeline_mode = #tpu.pipeline_mode<synchronous>, transform_indices = @transform_7, window_bounds = array<i64: 1, 32>}, {pipeline_mode = #tpu.pipeline_mode<synchronous>, transform_indices = @transform_8, window_bounds = array<i64: 32, 64>}, {pipeline_mode = #tpu.pipeline_mode<synchronous>, transform_indices = @transform_9, window_bounds = array<i64: 1, 64>}, {pipeline_mode = #tpu.pipeline_mode<synchronous>, transform_indices = @transform_10, window_bounds = array<i64: 64, 32>}, {pipeline_mode = #tpu.pipeline_mode<synchronous>, transform_indices = @transform_11, window_bounds = array<i64: 1, 32>}, {pipeline_mode = #tpu.pipeline_mode<synchronous>, transform_indices = @transform_12, window_bounds = array<i64: 1, 32>}, {pipeline_mode = #tpu.pipeline_mode<synchronous>, transform_indices = @transform_13, window_bounds = array<i64: 1, 32>}, {transform_indices = @transform_14, window_bounds = array<i64: 8, 32>}]} {
    %c0 = arith.constant 0 : index
    %c0_0 = arith.constant 0 : index
    %c0_1 = arith.constant 0 : index
    %0 = vector.load %arg2[%c0, %c0_0, %c0_1] : memref<8x4x4xf32, #tpu.memory_space<vmem>>, vector<8x4x4xf32>
    %cst = arith.constant dense<0xFF800000> : vector<8x4xf32>
    %1 = vector.multi_reduction <maximumf>, %0, %cst [1] : vector<8x4x4xf32> to vector<8x4xf32>
    %2 = vector.shape_cast %1 : vector<8x4xf32> to vector<8x1x4xf32>
    %3 = vector.broadcast %2 : vector<8x1x4xf32> to vector<8x4x4xf32>
    %4 = arith.subf %0, %3 : vector<8x4x4xf32>
    %5 = math.exp %4 : vector<8x4x4xf32>
    %cst_2 = arith.constant dense<0.000000e+00> : vector<8x4xf32>
    %6 = vector.multi_reduction <add>, %5, %cst_2 [1] : vector<8x4x4xf32> to vector<8x4xf32>
    %7 = vector.shape_cast %6 : vector<8x4xf32> to vector<8x1x4xf32>
    %8 = tpu.reciprocal %7 {approx = true} : vector<8x1x4xf32> -> vector<8x1x4xf32>
    %9 = vector.broadcast %8 : vector<8x1x4xf32> to vector<8x4x4xf32>
    %10 = arith.mulf %5, %9 : vector<8x4x4xf32>
    %11 = vector.shape_cast %10 : vector<8x4x4xf32> to vector<32x4xf32>
    %c0_3 = arith.constant 0 : index
    %c0_4 = arith.constant 0 : index
    %12 = vector.load %arg3[%c0_3, %c0_4] : memref<4x32xf32, #tpu.memory_space<vmem>>, vector<4x32xf32>
    %cst_5 = arith.constant dense<0.000000e+00> : vector<32x32xf32>
    %13 = tpu.matmul %11, %12, %cst_5 {dimension_numbers = #tpu.dot_dimension_numbers<[1], [0], [0], [1], [0, 0, 1, 1], [], []>} : vector<32x4xf32>, vector<4x32xf32>, vector<32x32xf32> -> vector<32x32xf32>
    %14 = vector.shape_cast %13 : vector<32x32xf32> to vector<8x4x32xf32>
    %c0_6 = arith.constant 0 : index
    %c0_7 = arith.constant 0 : index
    %c0_8 = arith.constant 0 : index
    %15 = vector.load %arg1[%c0_6, %c0_7, %c0_8] : memref<8x4x32xbf16, #tpu.memory_space<vmem>>, vector<8x4x32xbf16>
    %16 = arith.extf %15 : vector<8x4x32xbf16> to vector<8x4x32xf32>
    %17 = arith.mulf %16, %14 : vector<8x4x32xf32>
    %cst_9 = arith.constant dense<0.000000e+00> : vector<8x32xf32>
    %18 = vector.multi_reduction <add>, %17, %cst_9 [1] : vector<8x4x32xf32> to vector<8x32xf32>
    %19 = arith.truncf %18 : vector<8x32xf32> to vector<8x32xbf16>
    %c0_10 = arith.constant 0 : index
    %c0_11 = arith.constant 0 : index
    %20 = vector.load %arg4[%c0_10, %c0_11] : memref<32x32xbf16, #tpu.memory_space<vmem>>, vector<32x32xbf16>
    %cst_12 = arith.constant dense<0.000000e+00> : vector<8x32xf32>
    %21 = tpu.matmul %19, %20, %cst_12 {dimension_numbers = #tpu.dot_dimension_numbers<[1], [0], [0], [1], [0, 0, 1, 1], [], []>} : vector<8x32xbf16>, vector<32x32xbf16>, vector<8x32xf32> -> vector<8x32xf32>
    %c0_13 = arith.constant 0 : index
    %c0_14 = arith.constant 0 : index
    %22 = vector.load %arg5[%c0_13, %c0_14] : memref<1x32xf32, #tpu.memory_space<vmem>>, vector<1x32xf32>
    %23 = vector.broadcast %22 : vector<1x32xf32> to vector<8x32xf32>
    %24 = arith.addf %21, %23 : vector<8x32xf32>
    %c0_15 = arith.constant 0 : index
    %c0_16 = arith.constant 0 : index
    %25 = vector.load %arg6[%c0_15, %c0_16] : memref<8x32xf32, #tpu.memory_space<vmem>>, vector<8x32xf32>
    %26 = arith.addf %24, %25 : vector<8x32xf32>
    %cst_17 = arith.constant dense<0.000000e+00> : vector<8xf32>
    %27 = vector.multi_reduction <add>, %26, %cst_17 [1] : vector<8x32xf32> to vector<8xf32>
    %28 = vector.shape_cast %27 : vector<8xf32> to vector<8x1xf32>
    %cst_18 = arith.constant 3.200000e+01 : f32
    %29 = vector.broadcast %cst_18 : f32 to vector<8x1xf32>
    %30 = arith.divf %28, %29 : vector<8x1xf32>
    %31 = vector.broadcast %30 : vector<8x1xf32> to vector<8x32xf32>
    %32 = arith.subf %26, %31 : vector<8x32xf32>
    %33 = vector.broadcast %30 : vector<8x1xf32> to vector<8x32xf32>
    %34 = arith.subf %26, %33 : vector<8x32xf32>
    %35 = arith.mulf %32, %34 : vector<8x32xf32>
    %cst_19 = arith.constant dense<0.000000e+00> : vector<8xf32>
    %36 = vector.multi_reduction <add>, %35, %cst_19 [1] : vector<8x32xf32> to vector<8xf32>
    %37 = vector.shape_cast %36 : vector<8xf32> to vector<8x1xf32>
    %cst_20 = arith.constant 3.200000e+01 : f32
    %38 = vector.broadcast %cst_20 : f32 to vector<8x1xf32>
    %39 = arith.divf %37, %38 : vector<8x1xf32>
    %40 = vector.broadcast %30 : vector<8x1xf32> to vector<8x32xf32>
    %41 = arith.subf %26, %40 : vector<8x32xf32>
    %cst_21 = arith.constant 9.99999974E-6 : f32
    %42 = vector.broadcast %cst_21 : f32 to vector<8x1xf32>
    %43 = arith.addf %39, %42 : vector<8x1xf32>
    %44 = math.rsqrt %43 : vector<8x1xf32>
    %45 = vector.broadcast %44 : vector<8x1xf32> to vector<8x32xf32>
    %46 = arith.mulf %41, %45 : vector<8x32xf32>
    %c0_22 = arith.constant 0 : index
    %c0_23 = arith.constant 0 : index
    %47 = vector.load %arg7[%c0_22, %c0_23] : memref<1x32xf32, #tpu.memory_space<vmem>>, vector<1x32xf32>
    %48 = vector.broadcast %47 : vector<1x32xf32> to vector<8x32xf32>
    %49 = arith.mulf %46, %48 : vector<8x32xf32>
    %c0_24 = arith.constant 0 : index
    %c0_25 = arith.constant 0 : index
    %50 = vector.load %arg8[%c0_24, %c0_25] : memref<1x32xf32, #tpu.memory_space<vmem>>, vector<1x32xf32>
    %51 = vector.broadcast %50 : vector<1x32xf32> to vector<8x32xf32>
    %52 = arith.addf %49, %51 : vector<8x32xf32>
    %53 = arith.truncf %52 : vector<8x32xf32> to vector<8x32xbf16>
    %c0_26 = arith.constant 0 : index
    %c0_27 = arith.constant 0 : index
    %54 = vector.load %arg9[%c0_26, %c0_27] : memref<32x64xbf16, #tpu.memory_space<vmem>>, vector<32x64xbf16>
    %cst_28 = arith.constant dense<0.000000e+00> : vector<8x64xf32>
    %55 = tpu.matmul %53, %54, %cst_28 {dimension_numbers = #tpu.dot_dimension_numbers<[1], [0], [0], [1], [0, 0, 1, 1], [], []>} : vector<8x32xbf16>, vector<32x64xbf16>, vector<8x64xf32> -> vector<8x64xf32>
    %c0_29 = arith.constant 0 : index
    %c0_30 = arith.constant 0 : index
    %56 = vector.load %arg10[%c0_29, %c0_30] : memref<1x64xf32, #tpu.memory_space<vmem>>, vector<1x64xf32>
    %57 = vector.broadcast %56 : vector<1x64xf32> to vector<8x64xf32>
    %58 = arith.addf %55, %57 : vector<8x64xf32>
    %cst_31 = arith.constant 0.000000e+00 : f32
    %59 = vector.broadcast %cst_31 : f32 to vector<8x64xf32>
    %60 = arith.maximumf %58, %59 : vector<8x64xf32>
    %61 = arith.truncf %60 : vector<8x64xf32> to vector<8x64xbf16>
    %c0_32 = arith.constant 0 : index
    %c0_33 = arith.constant 0 : index
    %62 = vector.load %arg11[%c0_32, %c0_33] : memref<64x32xbf16, #tpu.memory_space<vmem>>, vector<64x32xbf16>
    %cst_34 = arith.constant dense<0.000000e+00> : vector<8x32xf32>
    %63 = tpu.matmul %61, %62, %cst_34 {dimension_numbers = #tpu.dot_dimension_numbers<[1], [0], [0], [1], [0, 0, 1, 1], [], []>} : vector<8x64xbf16>, vector<64x32xbf16>, vector<8x32xf32> -> vector<8x32xf32>
    %c0_35 = arith.constant 0 : index
    %c0_36 = arith.constant 0 : index
    %64 = vector.load %arg12[%c0_35, %c0_36] : memref<1x32xf32, #tpu.memory_space<vmem>>, vector<1x32xf32>
    %65 = vector.broadcast %64 : vector<1x32xf32> to vector<8x32xf32>
    %66 = arith.addf %63, %65 : vector<8x32xf32>
    %67 = arith.addf %66, %52 : vector<8x32xf32>
    %cst_37 = arith.constant dense<0.000000e+00> : vector<8xf32>
    %68 = vector.multi_reduction <add>, %67, %cst_37 [1] : vector<8x32xf32> to vector<8xf32>
    %69 = vector.shape_cast %68 : vector<8xf32> to vector<8x1xf32>
    %cst_38 = arith.constant 3.200000e+01 : f32
    %70 = vector.broadcast %cst_38 : f32 to vector<8x1xf32>
    %71 = arith.divf %69, %70 : vector<8x1xf32>
    %72 = vector.broadcast %71 : vector<8x1xf32> to vector<8x32xf32>
    %73 = arith.subf %67, %72 : vector<8x32xf32>
    %74 = vector.broadcast %71 : vector<8x1xf32> to vector<8x32xf32>
    %75 = arith.subf %67, %74 : vector<8x32xf32>
    %76 = arith.mulf %73, %75 : vector<8x32xf32>
    %cst_39 = arith.constant dense<0.000000e+00> : vector<8xf32>
    %77 = vector.multi_reduction <add>, %76, %cst_39 [1] : vector<8x32xf32> to vector<8xf32>
    %78 = vector.shape_cast %77 : vector<8xf32> to vector<8x1xf32>
    %cst_40 = arith.constant 3.200000e+01 : f32
    %79 = vector.broadcast %cst_40 : f32 to vector<8x1xf32>
    %80 = arith.divf %78, %79 : vector<8x1xf32>
    %81 = vector.broadcast %71 : vector<8x1xf32> to vector<8x32xf32>
    %82 = arith.subf %67, %81 : vector<8x32xf32>
    %cst_41 = arith.constant 9.99999974E-6 : f32
    %83 = vector.broadcast %cst_41 : f32 to vector<8x1xf32>
    %84 = arith.addf %80, %83 : vector<8x1xf32>
    %85 = math.rsqrt %84 : vector<8x1xf32>
    %86 = vector.broadcast %85 : vector<8x1xf32> to vector<8x32xf32>
    %87 = arith.mulf %82, %86 : vector<8x32xf32>
    %c0_42 = arith.constant 0 : index
    %c0_43 = arith.constant 0 : index
    %88 = vector.load %arg13[%c0_42, %c0_43] : memref<1x32xf32, #tpu.memory_space<vmem>>, vector<1x32xf32>
    %89 = vector.broadcast %88 : vector<1x32xf32> to vector<8x32xf32>
    %90 = arith.mulf %87, %89 : vector<8x32xf32>
    %c0_44 = arith.constant 0 : index
    %c0_45 = arith.constant 0 : index
    %91 = vector.load %arg14[%c0_44, %c0_45] : memref<1x32xf32, #tpu.memory_space<vmem>>, vector<1x32xf32>
    %92 = vector.broadcast %91 : vector<1x32xf32> to vector<8x32xf32>
    %93 = arith.addf %90, %92 : vector<8x32xf32>
    %c0_46 = arith.constant 0 : index
    %c0_47 = arith.constant 0 : index
    %94 = vector.load %arg15[%c0_46, %c0_47] : memref<8x32xf32, #tpu.memory_space<vmem>>, vector<8x32xf32>
    tpu.vector_store %arg15[%c0_46, %c0_47], %93 {strides = array<i32>} : memref<8x32xf32, #tpu.memory_space<vmem>>, vector<8x32xf32>,
    return
  }
  func.func @transform_0(%arg0: i32) -> (i32, i32, i32) {
    %c0_i32 = arith.constant 0 : i32
    %c0_i32_0 = arith.constant 0 : i32
    %c0_i32_1 = arith.constant 0 : i32
    return %arg0, %c0_i32, %c0_i32_0 : i32, i32, i32
  }
  func.func @transform_1(%arg0: i32) -> (i32, i32, i32) {
    %c0_i32 = arith.constant 0 : i32
    %c0_i32_0 = arith.constant 0 : i32
    %c0_i32_1 = arith.constant 0 : i32
    return %arg0, %c0_i32, %c0_i32_0 : i32, i32, i32
  }
  func.func @transform_2(%arg0: i32) -> (i32, i32) {
    %c0_i32 = arith.constant 0 : i32
    %c0_i32_0 = arith.constant 0 : i32
    %c0_i32_1 = arith.constant 0 : i32
    return %c0_i32, %c0_i32_0 : i32, i32
  }
  func.func @transform_3(%arg0: i32) -> (i32, i32) {
    %c0_i32 = arith.constant 0 : i32
    %c0_i32_0 = arith.constant 0 : i32
    %c0_i32_1 = arith.constant 0 : i32
    return %c0_i32, %c0_i32_0 : i32, i32
  }
  func.func @transform_4(%arg0: i32) -> (i32, i32) {
    %c0_i32 = arith.constant 0 : i32
    %c0_i32_0 = arith.constant 0 : i32
    %c0_i32_1 = arith.constant 0 : i32
    return %c0_i32, %c0_i32_0 : i32, i32
  }
  func.func @transform_5(%arg0: i32) -> (i32, i32) {
    %c0_i32 = arith.constant 0 : i32
    %c0_i32_0 = arith.constant 0 : i32
    return %arg0, %c0_i32 : i32, i32
  }
  func.func @transform_6(%arg0: i32) -> (i32, i32) {
    %c0_i32 = arith.constant 0 : i32
    %c0_i32_0 = arith.constant 0 : i32
    %c0_i32_1 = arith.constant 0 : i32
    return %c0_i32, %c0_i32_0 : i32, i32
  }
  func.func @transform_7(%arg0: i32) -> (i32, i32) {
    %c0_i32 = arith.constant 0 : i32
    %c0_i32_0 = arith.constant 0 : i32
    %c0_i32_1 = arith.constant 0 : i32
    return %c0_i32, %c0_i32_0 : i32, i32
  }
  func.func @transform_8(%arg0: i32) -> (i32, i32) {
    %c0_i32 = arith.constant 0 : i32
    %c0_i32_0 = arith.constant 0 : i32
    %c0_i32_1 = arith.constant 0 : i32
    return %c0_i32, %c0_i32_0 : i32, i32
  }
  func.func @transform_9(%arg0: i32) -> (i32, i32) {
    %c0_i32 = arith.constant 0 : i32
    %c0_i32_0 = arith.constant 0 : i32
    %c0_i32_1 = arith.constant 0 : i32
    return %c0_i32, %c0_i32_0 : i32, i32
  }
  func.func @transform_10(%arg0: i32) -> (i32, i32) {
    %c0_i32 = arith.constant 0 : i32
    %c0_i32_0 = arith.constant 0 : i32
    %c0_i32_1 = arith.constant 0 : i32
    return %c0_i32, %c0_i32_0 : i32, i32
  }
  func.func @transform_11(%arg0: i32) -> (i32, i32) {
    %c0_i32 = arith.constant 0 : i32
    %c0_i32_0 = arith.constant 0 : i32
    %c0_i32_1 = arith.constant 0 : i32
    return %c0_i32, %c0_i32_0 : i32, i32
  }
  func.func @transform_12(%arg0: i32) -> (i32, i32) {
    %c0_i32 = arith.constant 0 : i32
    %c0_i32_0 = arith.constant 0 : i32
    %c0_i32_1 = arith.constant 0 : i32
    return %c0_i32, %c0_i32_0 : i32, i32
  }
  func.func @transform_13(%arg0: i32) -> (i32, i32) {
    %c0_i32 = arith.constant 0 : i32
    %c0_i32_0 = arith.constant 0 : i32
    %c0_i32_1 = arith.constant 0 : i32
    return %c0_i32, %c0_i32_0 : i32, i32
  }
  func.func @transform_14(%arg0: i32) -> (i32, i32) {
    %c0_i32 = arith.constant 0 : i32
    %c0_i32_0 = arith.constant 0 : i32
    return %arg0, %c0_i32 : i32, i32
  }
}

module attributes {stable_mosaic.version = 11 : i64} {
  func.func @_self_attn_kernel(%arg0: i32, %arg1: memref<1x8x32xf32, #tpu.memory_space<vmem>>, %arg2: memref<1x8x32xf32, #tpu.memory_space<vmem>>, %arg3: memref<32x64xbf16, #tpu.memory_space<vmem>>, %arg4: memref<1x64xf32, #tpu.memory_space<vmem>>, %arg5: memref<32x32xbf16, #tpu.memory_space<vmem>>, %arg6: memref<1x32xf32, #tpu.memory_space<vmem>>, %arg7: memref<32x32xbf16, #tpu.memory_space<vmem>>, %arg8: memref<1x32xf32, #tpu.memory_space<vmem>>, %arg9: memref<1x32xf32, #tpu.memory_space<vmem>>, %arg10: memref<1x32xf32, #tpu.memory_space<vmem>>, %arg11: memref<32x32xbf16, #tpu.memory_space<vmem>>, %arg12: memref<1x32xf32, #tpu.memory_space<vmem>>, %arg13: memref<32x16xbf16, #tpu.memory_space<vmem>>, %arg14: memref<1x16xf32, #tpu.memory_space<vmem>>, %arg15: memref<1x8x32xf32, #tpu.memory_space<vmem>>, %arg16: memref<1x8x32xf32, #tpu.memory_space<vmem>>, %arg17: memref<1x8x16xf32, #tpu.memory_space<vmem>>) attributes {dimension_semantics = [#tpu.dimension_semantics<parallel>], iteration_bounds = array<i64: 2>, scalar_prefetch = 0 : i64, scratch_operands = 0 : i64, tpu.core_type = #tpu.core_type<tc>, window_params = [{transform_indices = @transform_0, window_bounds = array<i64: 1, 8, 32>}, {transform_indices = @transform_1, window_bounds = array<i64: 1, 8, 32>}, {pipeline_mode = #tpu.pipeline_mode<synchronous>, transform_indices = @transform_2, window_bounds = array<i64: 32, 64>}, {pipeline_mode = #tpu.pipeline_mode<synchronous>, transform_indices = @transform_3, window_bounds = array<i64: 1, 64>}, {pipeline_mode = #tpu.pipeline_mode<synchronous>, transform_indices = @transform_4, window_bounds = array<i64: 32, 32>}, {pipeline_mode = #tpu.pipeline_mode<synchronous>, transform_indices = @transform_5, window_bounds = array<i64: 1, 32>}, {pipeline_mode = #tpu.pipeline_mode<synchronous>, transform_indices = @transform_6, window_bounds = array<i64: 32, 32>}, {pipeline_mode = #tpu.pipeline_mode<synchronous>, transform_indices = @transform_7, window_bounds = array<i64: 1, 32>}, {pipeline_mode = #tpu.pipeline_mode<synchronous>, transform_indices = @transform_8, window_bounds = array<i64: 1, 32>}, {pipeline_mode = #tpu.pipeline_mode<synchronous>, transform_indices = @transform_9, window_bounds = array<i64: 1, 32>}, {pipeline_mode = #tpu.pipeline_mode<synchronous>, transform_indices = @transform_10, window_bounds = array<i64: 32, 32>}, {pipeline_mode = #tpu.pipeline_mode<synchronous>, transform_indices = @transform_11, window_bounds = array<i64: 1, 32>}, {pipeline_mode = #tpu.pipeline_mode<synchronous>, transform_indices = @transform_12, window_bounds = array<i64: 32, 16>}, {pipeline_mode = #tpu.pipeline_mode<synchronous>, transform_indices = @transform_13, window_bounds = array<i64: 1, 16>}, {transform_indices = @transform_14, window_bounds = array<i64: 1, 8, 32>}, {transform_indices = @transform_15, window_bounds = array<i64: 1, 8, 32>}, {transform_indices = @transform_16, window_bounds = array<i64: 1, 8, 16>}]} {
    %c0 = arith.constant 0 : index
    %c0_0 = arith.constant 0 : index
    %c0_1 = arith.constant 0 : index
    %0 = vector.load %arg1[%c0, %c0_0, %c0_1] : memref<1x8x32xf32, #tpu.memory_space<vmem>>, vector<1x8x32xf32>
    %1 = vector.shape_cast %0 : vector<1x8x32xf32> to vector<8x32xf32>
    %c0_2 = arith.constant 0 : index
    %c0_3 = arith.constant 0 : index
    %c0_4 = arith.constant 0 : index
    %2 = vector.load %arg2[%c0_2, %c0_3, %c0_4] : memref<1x8x32xf32, #tpu.memory_space<vmem>>, vector<1x8x32xf32>
    %3 = vector.shape_cast %2 : vector<1x8x32xf32> to vector<8x32xf32>
    %4 = arith.addf %1, %3 : vector<8x32xf32>
    %5 = arith.truncf %4 : vector<8x32xf32> to vector<8x32xbf16>
    %c0_5 = arith.constant 0 : index
    %c0_6 = arith.constant 0 : index
    %6 = vector.load %arg3[%c0_5, %c0_6] : memref<32x64xbf16, #tpu.memory_space<vmem>>, vector<32x64xbf16>
    %cst = arith.constant dense<0.000000e+00> : vector<8x64xf32>
    %7 = tpu.matmul %5, %6, %cst {dimension_numbers = #tpu.dot_dimension_numbers<[1], [0], [0], [1], [0, 0, 1, 1], [], []>} : vector<8x32xbf16>, vector<32x64xbf16>, vector<8x64xf32> -> vector<8x64xf32>
    %c0_7 = arith.constant 0 : index
    %c0_8 = arith.constant 0 : index
    %8 = vector.load %arg4[%c0_7, %c0_8] : memref<1x64xf32, #tpu.memory_space<vmem>>, vector<1x64xf32>
    %9 = vector.broadcast %8 : vector<1x64xf32> to vector<8x64xf32>
    %10 = arith.addf %7, %9 : vector<8x64xf32>
    %11 = arith.truncf %1 : vector<8x32xf32> to vector<8x32xbf16>
    %c0_9 = arith.constant 0 : index
    %c0_10 = arith.constant 0 : index
    %12 = vector.load %arg5[%c0_9, %c0_10] : memref<32x32xbf16, #tpu.memory_space<vmem>>, vector<32x32xbf16>
    %cst_11 = arith.constant dense<0.000000e+00> : vector<8x32xf32>
    %13 = tpu.matmul %11, %12, %cst_11 {dimension_numbers = #tpu.dot_dimension_numbers<[1], [0], [0], [1], [0, 0, 1, 1], [], []>} : vector<8x32xbf16>, vector<32x32xbf16>, vector<8x32xf32> -> vector<8x32xf32>
    %c0_12 = arith.constant 0 : index
    %c0_13 = arith.constant 0 : index
    %14 = vector.load %arg6[%c0_12, %c0_13] : memref<1x32xf32, #tpu.memory_space<vmem>>, vector<1x32xf32>
    %15 = vector.broadcast %14 : vector<1x32xf32> to vector<8x32xf32>
    %16 = arith.addf %13, %15 : vector<8x32xf32>
    %17 = vector.extract_strided_slice %10 {offsets = [0, 0], sizes = [8, 32], strides = [1, 1]} : vector<8x64xf32> to vector<8x32xf32>
    %18 = arith.truncf %17 : vector<8x32xf32> to vector<8x32xbf16>
    %19 = vector.extract_strided_slice %10 {offsets = [0, 32], sizes = [8, 32], strides = [1, 1]} : vector<8x64xf32> to vector<8x32xf32>
    %20 = arith.truncf %19 : vector<8x32xf32> to vector<8x32xbf16>
    %21 = arith.truncf %16 : vector<8x32xf32> to vector<8x32xbf16>
    %22 = vector.extract_strided_slice %18 {offsets = [0, 0], sizes = [8, 8], strides = [1, 1]} : vector<8x32xbf16> to vector<8x8xbf16>
    %23 = vector.extract_strided_slice %20 {offsets = [0, 0], sizes = [8, 8], strides = [1, 1]} : vector<8x32xbf16> to vector<8x8xbf16>
    %24 = tpu.transpose %23, [1, 0] : vector<8x8xbf16> -> vector<8x8xbf16>
    %cst_14 = arith.constant dense<0.000000e+00> : vector<8x8xf32>
    %25 = tpu.matmul %22, %24, %cst_14 {dimension_numbers = #tpu.dot_dimension_numbers<[1], [0], [0], [1], [0, 0, 1, 1], [], []>} : vector<8x8xbf16>, vector<8x8xbf16>, vector<8x8xf32> -> vector<8x8xf32>
    %cst_15 = arith.constant dense<0xFF800000> : vector<8xf32>
    %26 = vector.multi_reduction <maximumf>, %25, %cst_15 [1] : vector<8x8xf32> to vector<8xf32>
    %27 = vector.shape_cast %26 : vector<8xf32> to vector<8x1xf32>
    %28 = vector.broadcast %27 : vector<8x1xf32> to vector<8x8xf32>
    %29 = arith.subf %25, %28 : vector<8x8xf32>
    %30 = math.exp %29 : vector<8x8xf32>
    %cst_16 = arith.constant dense<0.000000e+00> : vector<8xf32>
    %31 = vector.multi_reduction <add>, %30, %cst_16 [1] : vector<8x8xf32> to vector<8xf32>
    %32 = vector.shape_cast %31 : vector<8xf32> to vector<8x1xf32>
    %33 = tpu.reciprocal %32 {approx = true} : vector<8x1xf32> -> vector<8x1xf32>
    %34 = vector.broadcast %33 : vector<8x1xf32> to vector<8x8xf32>
    %35 = arith.mulf %30, %34 : vector<8x8xf32>
    %36 = arith.truncf %35 : vector<8x8xf32> to vector<8x8xbf16>
    %37 = vector.extract_strided_slice %21 {offsets = [0, 0], sizes = [8, 8], strides = [1, 1]} : vector<8x32xbf16> to vector<8x8xbf16>
    %cst_17 = arith.constant dense<0.000000e+00> : vector<8x8xf32>
    %38 = tpu.matmul %36, %37, %cst_17 {dimension_numbers = #tpu.dot_dimension_numbers<[1], [0], [0], [1], [0, 0, 1, 1], [], []>} : vector<8x8xbf16>, vector<8x8xbf16>, vector<8x8xf32> -> vector<8x8xf32>
    %39 = vector.extract_strided_slice %18 {offsets = [0, 8], sizes = [8, 8], strides = [1, 1]} : vector<8x32xbf16> to vector<8x8xbf16>
    %40 = vector.extract_strided_slice %20 {offsets = [0, 8], sizes = [8, 8], strides = [1, 1]} : vector<8x32xbf16> to vector<8x8xbf16>
    %41 = tpu.transpose %40, [1, 0] : vector<8x8xbf16> -> vector<8x8xbf16>
    %cst_18 = arith.constant dense<0.000000e+00> : vector<8x8xf32>
    %42 = tpu.matmul %39, %41, %cst_18 {dimension_numbers = #tpu.dot_dimension_numbers<[1], [0], [0], [1], [0, 0, 1, 1], [], []>} : vector<8x8xbf16>, vector<8x8xbf16>, vector<8x8xf32> -> vector<8x8xf32>
    %cst_19 = arith.constant dense<0xFF800000> : vector<8xf32>
    %43 = vector.multi_reduction <maximumf>, %42, %cst_19 [1] : vector<8x8xf32> to vector<8xf32>
    %44 = vector.shape_cast %43 : vector<8xf32> to vector<8x1xf32>
    %45 = vector.broadcast %44 : vector<8x1xf32> to vector<8x8xf32>
    %46 = arith.subf %42, %45 : vector<8x8xf32>
    %47 = math.exp %46 : vector<8x8xf32>
    %cst_20 = arith.constant dense<0.000000e+00> : vector<8xf32>
    %48 = vector.multi_reduction <add>, %47, %cst_20 [1] : vector<8x8xf32> to vector<8xf32>
    %49 = vector.shape_cast %48 : vector<8xf32> to vector<8x1xf32>
    %50 = tpu.reciprocal %49 {approx = true} : vector<8x1xf32> -> vector<8x1xf32>
    %51 = vector.broadcast %50 : vector<8x1xf32> to vector<8x8xf32>
    %52 = arith.mulf %47, %51 : vector<8x8xf32>
    %53 = arith.truncf %52 : vector<8x8xf32> to vector<8x8xbf16>
    %54 = vector.extract_strided_slice %21 {offsets = [0, 8], sizes = [8, 8], strides = [1, 1]} : vector<8x32xbf16> to vector<8x8xbf16>
    %cst_21 = arith.constant dense<0.000000e+00> : vector<8x8xf32>
    %55 = tpu.matmul %53, %54, %cst_21 {dimension_numbers = #tpu.dot_dimension_numbers<[1], [0], [0], [1], [0, 0, 1, 1], [], []>} : vector<8x8xbf16>, vector<8x8xbf16>, vector<8x8xf32> -> vector<8x8xf32>
    %56 = vector.extract_strided_slice %18 {offsets = [0, 16], sizes = [8, 8], strides = [1, 1]} : vector<8x32xbf16> to vector<8x8xbf16>
    %57 = vector.extract_strided_slice %20 {offsets = [0, 16], sizes = [8, 8], strides = [1, 1]} : vector<8x32xbf16> to vector<8x8xbf16>
    %58 = tpu.transpose %57, [1, 0] : vector<8x8xbf16> -> vector<8x8xbf16>
    %cst_22 = arith.constant dense<0.000000e+00> : vector<8x8xf32>
    %59 = tpu.matmul %56, %58, %cst_22 {dimension_numbers = #tpu.dot_dimension_numbers<[1], [0], [0], [1], [0, 0, 1, 1], [], []>} : vector<8x8xbf16>, vector<8x8xbf16>, vector<8x8xf32> -> vector<8x8xf32>
    %cst_23 = arith.constant dense<0xFF800000> : vector<8xf32>
    %60 = vector.multi_reduction <maximumf>, %59, %cst_23 [1] : vector<8x8xf32> to vector<8xf32>
    %61 = vector.shape_cast %60 : vector<8xf32> to vector<8x1xf32>
    %62 = vector.broadcast %61 : vector<8x1xf32> to vector<8x8xf32>
    %63 = arith.subf %59, %62 : vector<8x8xf32>
    %64 = math.exp %63 : vector<8x8xf32>
    %cst_24 = arith.constant dense<0.000000e+00> : vector<8xf32>
    %65 = vector.multi_reduction <add>, %64, %cst_24 [1] : vector<8x8xf32> to vector<8xf32>
    %66 = vector.shape_cast %65 : vector<8xf32> to vector<8x1xf32>
    %67 = tpu.reciprocal %66 {approx = true} : vector<8x1xf32> -> vector<8x1xf32>
    %68 = vector.broadcast %67 : vector<8x1xf32> to vector<8x8xf32>
    %69 = arith.mulf %64, %68 : vector<8x8xf32>
    %70 = arith.truncf %69 : vector<8x8xf32> to vector<8x8xbf16>
    %71 = vector.extract_strided_slice %21 {offsets = [0, 16], sizes = [8, 8], strides = [1, 1]} : vector<8x32xbf16> to vector<8x8xbf16>
    %cst_25 = arith.constant dense<0.000000e+00> : vector<8x8xf32>
    %72 = tpu.matmul %70, %71, %cst_25 {dimension_numbers = #tpu.dot_dimension_numbers<[1], [0], [0], [1], [0, 0, 1, 1], [], []>} : vector<8x8xbf16>, vector<8x8xbf16>, vector<8x8xf32> -> vector<8x8xf32>
    %73 = vector.extract_strided_slice %18 {offsets = [0, 24], sizes = [8, 8], strides = [1, 1]} : vector<8x32xbf16> to vector<8x8xbf16>
    %74 = vector.extract_strided_slice %20 {offsets = [0, 24], sizes = [8, 8], strides = [1, 1]} : vector<8x32xbf16> to vector<8x8xbf16>
    %75 = tpu.transpose %74, [1, 0] : vector<8x8xbf16> -> vector<8x8xbf16>
    %cst_26 = arith.constant dense<0.000000e+00> : vector<8x8xf32>
    %76 = tpu.matmul %73, %75, %cst_26 {dimension_numbers = #tpu.dot_dimension_numbers<[1], [0], [0], [1], [0, 0, 1, 1], [], []>} : vector<8x8xbf16>, vector<8x8xbf16>, vector<8x8xf32> -> vector<8x8xf32>
    %cst_27 = arith.constant dense<0xFF800000> : vector<8xf32>
    %77 = vector.multi_reduction <maximumf>, %76, %cst_27 [1] : vector<8x8xf32> to vector<8xf32>
    %78 = vector.shape_cast %77 : vector<8xf32> to vector<8x1xf32>
    %79 = vector.broadcast %78 : vector<8x1xf32> to vector<8x8xf32>
    %80 = arith.subf %76, %79 : vector<8x8xf32>
    %81 = math.exp %80 : vector<8x8xf32>
    %cst_28 = arith.constant dense<0.000000e+00> : vector<8xf32>
    %82 = vector.multi_reduction <add>, %81, %cst_28 [1] : vector<8x8xf32> to vector<8xf32>
    %83 = vector.shape_cast %82 : vector<8xf32> to vector<8x1xf32>
    %84 = tpu.reciprocal %83 {approx = true} : vector<8x1xf32> -> vector<8x1xf32>
    %85 = vector.broadcast %84 : vector<8x1xf32> to vector<8x8xf32>
    %86 = arith.mulf %81, %85 : vector<8x8xf32>
    %87 = arith.truncf %86 : vector<8x8xf32> to vector<8x8xbf16>
    %88 = vector.extract_strided_slice %21 {offsets = [0, 24], sizes = [8, 8], strides = [1, 1]} : vector<8x32xbf16> to vector<8x8xbf16>
    %cst_29 = arith.constant dense<0.000000e+00> : vector<8x8xf32>
    %89 = tpu.matmul %87, %88, %cst_29 {dimension_numbers = #tpu.dot_dimension_numbers<[1], [0], [0], [1], [0, 0, 1, 1], [], []>} : vector<8x8xbf16>, vector<8x8xbf16>, vector<8x8xf32> -> vector<8x8xf32>
    %90 = tpu.concatenate %38, %55, %72, %89 in 1 : vector<8x8xf32>, vector<8x8xf32>, vector<8x8xf32>, vector<8x8xf32> -> vector<8x32xf32>
    %91 = arith.truncf %90 : vector<8x32xf32> to vector<8x32xbf16>
    %c0_30 = arith.constant 0 : index
    %c0_31 = arith.constant 0 : index
    %92 = vector.load %arg7[%c0_30, %c0_31] : memref<32x32xbf16, #tpu.memory_space<vmem>>, vector<32x32xbf16>
    %cst_32 = arith.constant dense<0.000000e+00> : vector<8x32xf32>
    %93 = tpu.matmul %91, %92, %cst_32 {dimension_numbers = #tpu.dot_dimension_numbers<[1], [0], [0], [1], [0, 0, 1, 1], [], []>} : vector<8x32xbf16>, vector<32x32xbf16>, vector<8x32xf32> -> vector<8x32xf32>
    %c0_33 = arith.constant 0 : index
    %c0_34 = arith.constant 0 : index
    %94 = vector.load %arg8[%c0_33, %c0_34] : memref<1x32xf32, #tpu.memory_space<vmem>>, vector<1x32xf32>
    %95 = vector.broadcast %94 : vector<1x32xf32> to vector<8x32xf32>
    %96 = arith.addf %93, %95 : vector<8x32xf32>
    %97 = arith.addf %96, %1 : vector<8x32xf32>
    %cst_35 = arith.constant dense<0.000000e+00> : vector<8xf32>
    %98 = vector.multi_reduction <add>, %97, %cst_35 [1] : vector<8x32xf32> to vector<8xf32>
    %99 = vector.shape_cast %98 : vector<8xf32> to vector<8x1xf32>
    %cst_36 = arith.constant 3.200000e+01 : f32
    %100 = vector.broadcast %cst_36 : f32 to vector<8x1xf32>
    %101 = arith.divf %99, %100 : vector<8x1xf32>
    %102 = vector.broadcast %101 : vector<8x1xf32> to vector<8x32xf32>
    %103 = arith.subf %97, %102 : vector<8x32xf32>
    %104 = vector.broadcast %101 : vector<8x1xf32> to vector<8x32xf32>
    %105 = arith.subf %97, %104 : vector<8x32xf32>
    %106 = arith.mulf %103, %105 : vector<8x32xf32>
    %cst_37 = arith.constant dense<0.000000e+00> : vector<8xf32>
    %107 = vector.multi_reduction <add>, %106, %cst_37 [1] : vector<8x32xf32> to vector<8xf32>
    %108 = vector.shape_cast %107 : vector<8xf32> to vector<8x1xf32>
    %cst_38 = arith.constant 3.200000e+01 : f32
    %109 = vector.broadcast %cst_38 : f32 to vector<8x1xf32>
    %110 = arith.divf %108, %109 : vector<8x1xf32>
    %111 = vector.broadcast %101 : vector<8x1xf32> to vector<8x32xf32>
    %112 = arith.subf %97, %111 : vector<8x32xf32>
    %cst_39 = arith.constant 9.99999974E-6 : f32
    %113 = vector.broadcast %cst_39 : f32 to vector<8x1xf32>
    %114 = arith.addf %110, %113 : vector<8x1xf32>
    %115 = math.rsqrt %114 : vector<8x1xf32>
    %116 = vector.broadcast %115 : vector<8x1xf32> to vector<8x32xf32>
    %117 = arith.mulf %112, %116 : vector<8x32xf32>
    %c0_40 = arith.constant 0 : index
    %c0_41 = arith.constant 0 : index
    %118 = vector.load %arg9[%c0_40, %c0_41] : memref<1x32xf32, #tpu.memory_space<vmem>>, vector<1x32xf32>
    %119 = vector.broadcast %118 : vector<1x32xf32> to vector<8x32xf32>
    %120 = arith.mulf %117, %119 : vector<8x32xf32>
    %c0_42 = arith.constant 0 : index
    %c0_43 = arith.constant 0 : index
    %121 = vector.load %arg10[%c0_42, %c0_43] : memref<1x32xf32, #tpu.memory_space<vmem>>, vector<1x32xf32>
    %122 = vector.broadcast %121 : vector<1x32xf32> to vector<8x32xf32>
    %123 = arith.addf %120, %122 : vector<8x32xf32>
    %c0_44 = arith.constant 0 : index
    %c0_45 = arith.constant 0 : index
    %c0_46 = arith.constant 0 : index
    %124 = vector.load %arg15[%c0_44, %c0_45, %c0_46] : memref<1x8x32xf32, #tpu.memory_space<vmem>>, vector<1x8x32xf32>
    %125 = vector.shape_cast %124 : vector<1x8x32xf32> to vector<8x32xf32>
    %126 = vector.shape_cast %123 : vector<8x32xf32> to vector<1x8x32xf32>
    tpu.vector_store %arg15[%c0_44, %c0_45, %c0_46], %126 {strides = array<i32>} : memref<1x8x32xf32, #tpu.memory_space<vmem>>, vector<1x8x32xf32>,
    %127 = arith.addf %123, %3 : vector<8x32xf32>
    %128 = arith.truncf %127 : vector<8x32xf32> to vector<8x32xbf16>
    %c0_47 = arith.constant 0 : index
    %c0_48 = arith.constant 0 : index
    %129 = vector.load %arg11[%c0_47, %c0_48] : memref<32x32xbf16, #tpu.memory_space<vmem>>, vector<32x32xbf16>
    %cst_49 = arith.constant dense<0.000000e+00> : vector<8x32xf32>
    %130 = tpu.matmul %128, %129, %cst_49 {dimension_numbers = #tpu.dot_dimension_numbers<[1], [0], [0], [1], [0, 0, 1, 1], [], []>} : vector<8x32xbf16>, vector<32x32xbf16>, vector<8x32xf32> -> vector<8x32xf32>
    %c0_50 = arith.constant 0 : index
    %c0_51 = arith.constant 0 : index
    %131 = vector.load %arg12[%c0_50, %c0_51] : memref<1x32xf32, #tpu.memory_space<vmem>>, vector<1x32xf32>
    %132 = vector.broadcast %131 : vector<1x32xf32> to vector<8x32xf32>
    %133 = arith.addf %130, %132 : vector<8x32xf32>
    %c0_52 = arith.constant 0 : index
    %c0_53 = arith.constant 0 : index
    %c0_54 = arith.constant 0 : index
    %134 = vector.load %arg16[%c0_52, %c0_53, %c0_54] : memref<1x8x32xf32, #tpu.memory_space<vmem>>, vector<1x8x32xf32>
    %135 = vector.shape_cast %134 : vector<1x8x32xf32> to vector<8x32xf32>
    %136 = vector.shape_cast %133 : vector<8x32xf32> to vector<1x8x32xf32>
    tpu.vector_store %arg16[%c0_52, %c0_53, %c0_54], %136 {strides = array<i32>} : memref<1x8x32xf32, #tpu.memory_space<vmem>>, vector<1x8x32xf32>,
    %c0_55 = arith.constant 0 : index
    %c0_56 = arith.constant 0 : index
    %137 = vector.load %arg13[%c0_55, %c0_56] : memref<32x16xbf16, #tpu.memory_space<vmem>>, vector<32x16xbf16>
    %cst_57 = arith.constant dense<0.000000e+00> : vector<8x16xf32>
    %138 = tpu.matmul %128, %137, %cst_57 {dimension_numbers = #tpu.dot_dimension_numbers<[1], [0], [0], [1], [0, 0, 1, 1], [], []>} : vector<8x32xbf16>, vector<32x16xbf16>, vector<8x16xf32> -> vector<8x16xf32>
    %c0_58 = arith.constant 0 : index
    %c0_59 = arith.constant 0 : index
    %139 = vector.load %arg14[%c0_58, %c0_59] : memref<1x16xf32, #tpu.memory_space<vmem>>, vector<1x16xf32>
    %140 = vector.broadcast %139 : vector<1x16xf32> to vector<8x16xf32>
    %141 = arith.addf %138, %140 : vector<8x16xf32>
    %c0_60 = arith.constant 0 : index
    %c0_61 = arith.constant 0 : index
    %c0_62 = arith.constant 0 : index
    %142 = vector.load %arg17[%c0_60, %c0_61, %c0_62] : memref<1x8x16xf32, #tpu.memory_space<vmem>>, vector<1x8x16xf32>
    %143 = vector.shape_cast %142 : vector<1x8x16xf32> to vector<8x16xf32>
    %144 = vector.shape_cast %141 : vector<8x16xf32> to vector<1x8x16xf32>
    tpu.vector_store %arg17[%c0_60, %c0_61, %c0_62], %144 {strides = array<i32>} : memref<1x8x16xf32, #tpu.memory_space<vmem>>, vector<1x8x16xf32>,
    return
  }
  func.func @transform_0(%arg0: i32) -> (i32, i32, i32) {
    %c0_i32 = arith.constant 0 : i32
    %c0_i32_0 = arith.constant 0 : i32
    %c0_i32_1 = arith.constant 0 : i32
    return %arg0, %c0_i32, %c0_i32_0 : i32, i32, i32
  }
  func.func @transform_1(%arg0: i32) -> (i32, i32, i32) {
    %c0_i32 = arith.constant 0 : i32
    %c0_i32_0 = arith.constant 0 : i32
    %c0_i32_1 = arith.constant 0 : i32
    return %arg0, %c0_i32, %c0_i32_0 : i32, i32, i32
  }
  func.func @transform_2(%arg0: i32) -> (i32, i32) {
    %c0_i32 = arith.constant 0 : i32
    %c0_i32_0 = arith.constant 0 : i32
    %c0_i32_1 = arith.constant 0 : i32
    return %c0_i32, %c0_i32_0 : i32, i32
  }
  func.func @transform_3(%arg0: i32) -> (i32, i32) {
    %c0_i32 = arith.constant 0 : i32
    %c0_i32_0 = arith.constant 0 : i32
    %c0_i32_1 = arith.constant 0 : i32
    return %c0_i32, %c0_i32_0 : i32, i32
  }
  func.func @transform_4(%arg0: i32) -> (i32, i32) {
    %c0_i32 = arith.constant 0 : i32
    %c0_i32_0 = arith.constant 0 : i32
    %c0_i32_1 = arith.constant 0 : i32
    return %c0_i32, %c0_i32_0 : i32, i32
  }
  func.func @transform_5(%arg0: i32) -> (i32, i32) {
    %c0_i32 = arith.constant 0 : i32
    %c0_i32_0 = arith.constant 0 : i32
    %c0_i32_1 = arith.constant 0 : i32
    return %c0_i32, %c0_i32_0 : i32, i32
  }
  func.func @transform_6(%arg0: i32) -> (i32, i32) {
    %c0_i32 = arith.constant 0 : i32
    %c0_i32_0 = arith.constant 0 : i32
    %c0_i32_1 = arith.constant 0 : i32
    return %c0_i32, %c0_i32_0 : i32, i32
  }
  func.func @transform_7(%arg0: i32) -> (i32, i32) {
    %c0_i32 = arith.constant 0 : i32
    %c0_i32_0 = arith.constant 0 : i32
    %c0_i32_1 = arith.constant 0 : i32
    return %c0_i32, %c0_i32_0 : i32, i32
  }
  func.func @transform_8(%arg0: i32) -> (i32, i32) {
    %c0_i32 = arith.constant 0 : i32
    %c0_i32_0 = arith.constant 0 : i32
    %c0_i32_1 = arith.constant 0 : i32
    return %c0_i32, %c0_i32_0 : i32, i32
  }
  func.func @transform_9(%arg0: i32) -> (i32, i32) {
    %c0_i32 = arith.constant 0 : i32
    %c0_i32_0 = arith.constant 0 : i32
    %c0_i32_1 = arith.constant 0 : i32
    return %c0_i32, %c0_i32_0 : i32, i32
  }
  func.func @transform_10(%arg0: i32) -> (i32, i32) {
    %c0_i32 = arith.constant 0 : i32
    %c0_i32_0 = arith.constant 0 : i32
    %c0_i32_1 = arith.constant 0 : i32
    return %c0_i32, %c0_i32_0 : i32, i32
  }
  func.func @transform_11(%arg0: i32) -> (i32, i32) {
    %c0_i32 = arith.constant 0 : i32
    %c0_i32_0 = arith.constant 0 : i32
    %c0_i32_1 = arith.constant 0 : i32
    return %c0_i32, %c0_i32_0 : i32, i32
  }
  func.func @transform_12(%arg0: i32) -> (i32, i32) {
    %c0_i32 = arith.constant 0 : i32
    %c0_i32_0 = arith.constant 0 : i32
    %c0_i32_1 = arith.constant 0 : i32
    return %c0_i32, %c0_i32_0 : i32, i32
  }
  func.func @transform_13(%arg0: i32) -> (i32, i32) {
    %c0_i32 = arith.constant 0 : i32
    %c0_i32_0 = arith.constant 0 : i32
    %c0_i32_1 = arith.constant 0 : i32
    return %c0_i32, %c0_i32_0 : i32, i32
  }
  func.func @transform_14(%arg0: i32) -> (i32, i32, i32) {
    %c0_i32 = arith.constant 0 : i32
    %c0_i32_0 = arith.constant 0 : i32
    %c0_i32_1 = arith.constant 0 : i32
    return %arg0, %c0_i32, %c0_i32_0 : i32, i32, i32
  }
  func.func @transform_15(%arg0: i32) -> (i32, i32, i32) {
    %c0_i32 = arith.constant 0 : i32
    %c0_i32_0 = arith.constant 0 : i32
    %c0_i32_1 = arith.constant 0 : i32
    return %arg0, %c0_i32, %c0_i32_0 : i32, i32, i32
  }
  func.func @transform_16(%arg0: i32) -> (i32, i32, i32) {
    %c0_i32 = arith.constant 0 : i32
    %c0_i32_0 = arith.constant 0 : i32
    %c0_i32_1 = arith.constant 0 : i32
    return %arg0, %c0_i32, %c0_i32_0 : i32, i32, i32
  }
}

module attributes {stable_mosaic.version = 11 : i64} {
  func.func @_deform_ffn_kernel(%arg0: i32, %arg1: memref<8x4x32xbf16, #tpu.memory_space<vmem>>, %arg2: memref<8x4x4xf32, #tpu.memory_space<vmem>>, %arg3: memref<4x32xf32, #tpu.memory_space<vmem>>, %arg4: memref<32x32xbf16, #tpu.memory_space<vmem>>, %arg5: memref<1x32xf32, #tpu.memory_space<vmem>>, %arg6: memref<8x32xf32, #tpu.memory_space<vmem>>, %arg7: memref<1x32xf32, #tpu.memory_space<vmem>>, %arg8: memref<1x32xf32, #tpu.memory_space<vmem>>, %arg9: memref<32x64xbf16, #tpu.memory_space<vmem>>, %arg10: memref<1x64xf32, #tpu.memory_space<vmem>>, %arg11: memref<64x32xbf16, #tpu.memory_space<vmem>>, %arg12: memref<1x32xf32, #tpu.memory_space<vmem>>, %arg13: memref<1x32xf32, #tpu.memory_space<vmem>>, %arg14: memref<1x32xf32, #tpu.memory_space<vmem>>, %arg15: memref<8x32xf32, #tpu.memory_space<vmem>>) attributes {dimension_semantics = [#tpu.dimension_semantics<parallel>], iteration_bounds = array<i64: 2>, scalar_prefetch = 0 : i64, scratch_operands = 0 : i64, tpu.core_type = #tpu.core_type<tc>, window_params = [{transform_indices = @transform_0, window_bounds = array<i64: 8, 4, 32>}, {transform_indices = @transform_1, window_bounds = array<i64: 8, 4, 4>}, {pipeline_mode = #tpu.pipeline_mode<synchronous>, transform_indices = @transform_2, window_bounds = array<i64: 4, 32>}, {pipeline_mode = #tpu.pipeline_mode<synchronous>, transform_indices = @transform_3, window_bounds = array<i64: 32, 32>}, {pipeline_mode = #tpu.pipeline_mode<synchronous>, transform_indices = @transform_4, window_bounds = array<i64: 1, 32>}, {transform_indices = @transform_5, window_bounds = array<i64: 8, 32>}, {pipeline_mode = #tpu.pipeline_mode<synchronous>, transform_indices = @transform_6, window_bounds = array<i64: 1, 32>}, {pipeline_mode = #tpu.pipeline_mode<synchronous>, transform_indices = @transform_7, window_bounds = array<i64: 1, 32>}, {pipeline_mode = #tpu.pipeline_mode<synchronous>, transform_indices = @transform_8, window_bounds = array<i64: 32, 64>}, {pipeline_mode = #tpu.pipeline_mode<synchronous>, transform_indices = @transform_9, window_bounds = array<i64: 1, 64>}, {pipeline_mode = #tpu.pipeline_mode<synchronous>, transform_indices = @transform_10, window_bounds = array<i64: 64, 32>}, {pipeline_mode = #tpu.pipeline_mode<synchronous>, transform_indices = @transform_11, window_bounds = array<i64: 1, 32>}, {pipeline_mode = #tpu.pipeline_mode<synchronous>, transform_indices = @transform_12, window_bounds = array<i64: 1, 32>}, {pipeline_mode = #tpu.pipeline_mode<synchronous>, transform_indices = @transform_13, window_bounds = array<i64: 1, 32>}, {transform_indices = @transform_14, window_bounds = array<i64: 8, 32>}]} {
    %c0 = arith.constant 0 : index
    %c0_0 = arith.constant 0 : index
    %c0_1 = arith.constant 0 : index
    %0 = vector.load %arg2[%c0, %c0_0, %c0_1] : memref<8x4x4xf32, #tpu.memory_space<vmem>>, vector<8x4x4xf32>
    %cst = arith.constant dense<0xFF800000> : vector<8x4xf32>
    %1 = vector.multi_reduction <maximumf>, %0, %cst [1] : vector<8x4x4xf32> to vector<8x4xf32>
    %2 = vector.shape_cast %1 : vector<8x4xf32> to vector<8x1x4xf32>
    %3 = vector.broadcast %2 : vector<8x1x4xf32> to vector<8x4x4xf32>
    %4 = arith.subf %0, %3 : vector<8x4x4xf32>
    %5 = math.exp %4 : vector<8x4x4xf32>
    %cst_2 = arith.constant dense<0.000000e+00> : vector<8x4xf32>
    %6 = vector.multi_reduction <add>, %5, %cst_2 [1] : vector<8x4x4xf32> to vector<8x4xf32>
    %7 = vector.shape_cast %6 : vector<8x4xf32> to vector<8x1x4xf32>
    %8 = tpu.reciprocal %7 {approx = true} : vector<8x1x4xf32> -> vector<8x1x4xf32>
    %9 = vector.broadcast %8 : vector<8x1x4xf32> to vector<8x4x4xf32>
    %10 = arith.mulf %5, %9 : vector<8x4x4xf32>
    %11 = vector.shape_cast %10 : vector<8x4x4xf32> to vector<32x4xf32>
    %c0_3 = arith.constant 0 : index
    %c0_4 = arith.constant 0 : index
    %12 = vector.load %arg3[%c0_3, %c0_4] : memref<4x32xf32, #tpu.memory_space<vmem>>, vector<4x32xf32>
    %cst_5 = arith.constant dense<0.000000e+00> : vector<32x32xf32>
    %13 = tpu.matmul %11, %12, %cst_5 {dimension_numbers = #tpu.dot_dimension_numbers<[1], [0], [0], [1], [0, 0, 1, 1], [], []>} : vector<32x4xf32>, vector<4x32xf32>, vector<32x32xf32> -> vector<32x32xf32>
    %14 = vector.shape_cast %13 : vector<32x32xf32> to vector<8x4x32xf32>
    %c0_6 = arith.constant 0 : index
    %c0_7 = arith.constant 0 : index
    %c0_8 = arith.constant 0 : index
    %15 = vector.load %arg1[%c0_6, %c0_7, %c0_8] : memref<8x4x32xbf16, #tpu.memory_space<vmem>>, vector<8x4x32xbf16>
    %16 = arith.extf %15 : vector<8x4x32xbf16> to vector<8x4x32xf32>
    %17 = arith.mulf %16, %14 : vector<8x4x32xf32>
    %cst_9 = arith.constant dense<0.000000e+00> : vector<8x32xf32>
    %18 = vector.multi_reduction <add>, %17, %cst_9 [1] : vector<8x4x32xf32> to vector<8x32xf32>
    %19 = arith.truncf %18 : vector<8x32xf32> to vector<8x32xbf16>
    %c0_10 = arith.constant 0 : index
    %c0_11 = arith.constant 0 : index
    %20 = vector.load %arg4[%c0_10, %c0_11] : memref<32x32xbf16, #tpu.memory_space<vmem>>, vector<32x32xbf16>
    %cst_12 = arith.constant dense<0.000000e+00> : vector<8x32xf32>
    %21 = tpu.matmul %19, %20, %cst_12 {dimension_numbers = #tpu.dot_dimension_numbers<[1], [0], [0], [1], [0, 0, 1, 1], [], []>} : vector<8x32xbf16>, vector<32x32xbf16>, vector<8x32xf32> -> vector<8x32xf32>
    %c0_13 = arith.constant 0 : index
    %c0_14 = arith.constant 0 : index
    %22 = vector.load %arg5[%c0_13, %c0_14] : memref<1x32xf32, #tpu.memory_space<vmem>>, vector<1x32xf32>
    %23 = vector.broadcast %22 : vector<1x32xf32> to vector<8x32xf32>
    %24 = arith.addf %21, %23 : vector<8x32xf32>
    %c0_15 = arith.constant 0 : index
    %c0_16 = arith.constant 0 : index
    %25 = vector.load %arg6[%c0_15, %c0_16] : memref<8x32xf32, #tpu.memory_space<vmem>>, vector<8x32xf32>
    %26 = arith.addf %24, %25 : vector<8x32xf32>
    %cst_17 = arith.constant dense<0.000000e+00> : vector<8xf32>
    %27 = vector.multi_reduction <add>, %26, %cst_17 [1] : vector<8x32xf32> to vector<8xf32>
    %28 = vector.shape_cast %27 : vector<8xf32> to vector<8x1xf32>
    %cst_18 = arith.constant 3.200000e+01 : f32
    %29 = vector.broadcast %cst_18 : f32 to vector<8x1xf32>
    %30 = arith.divf %28, %29 : vector<8x1xf32>
    %31 = vector.broadcast %30 : vector<8x1xf32> to vector<8x32xf32>
    %32 = arith.subf %26, %31 : vector<8x32xf32>
    %33 = vector.broadcast %30 : vector<8x1xf32> to vector<8x32xf32>
    %34 = arith.subf %26, %33 : vector<8x32xf32>
    %35 = arith.mulf %32, %34 : vector<8x32xf32>
    %cst_19 = arith.constant dense<0.000000e+00> : vector<8xf32>
    %36 = vector.multi_reduction <add>, %35, %cst_19 [1] : vector<8x32xf32> to vector<8xf32>
    %37 = vector.shape_cast %36 : vector<8xf32> to vector<8x1xf32>
    %cst_20 = arith.constant 3.200000e+01 : f32
    %38 = vector.broadcast %cst_20 : f32 to vector<8x1xf32>
    %39 = arith.divf %37, %38 : vector<8x1xf32>
    %40 = vector.broadcast %30 : vector<8x1xf32> to vector<8x32xf32>
    %41 = arith.subf %26, %40 : vector<8x32xf32>
    %cst_21 = arith.constant 9.99999974E-6 : f32
    %42 = vector.broadcast %cst_21 : f32 to vector<8x1xf32>
    %43 = arith.addf %39, %42 : vector<8x1xf32>
    %44 = math.rsqrt %43 : vector<8x1xf32>
    %45 = vector.broadcast %44 : vector<8x1xf32> to vector<8x32xf32>
    %46 = arith.mulf %41, %45 : vector<8x32xf32>
    %c0_22 = arith.constant 0 : index
    %c0_23 = arith.constant 0 : index
    %47 = vector.load %arg7[%c0_22, %c0_23] : memref<1x32xf32, #tpu.memory_space<vmem>>, vector<1x32xf32>
    %48 = vector.broadcast %47 : vector<1x32xf32> to vector<8x32xf32>
    %49 = arith.mulf %46, %48 : vector<8x32xf32>
    %c0_24 = arith.constant 0 : index
    %c0_25 = arith.constant 0 : index
    %50 = vector.load %arg8[%c0_24, %c0_25] : memref<1x32xf32, #tpu.memory_space<vmem>>, vector<1x32xf32>
    %51 = vector.broadcast %50 : vector<1x32xf32> to vector<8x32xf32>
    %52 = arith.addf %49, %51 : vector<8x32xf32>
    %53 = arith.truncf %52 : vector<8x32xf32> to vector<8x32xbf16>
    %c0_26 = arith.constant 0 : index
    %c0_27 = arith.constant 0 : index
    %54 = vector.load %arg9[%c0_26, %c0_27] : memref<32x64xbf16, #tpu.memory_space<vmem>>, vector<32x64xbf16>
    %cst_28 = arith.constant dense<0.000000e+00> : vector<8x64xf32>
    %55 = tpu.matmul %53, %54, %cst_28 {dimension_numbers = #tpu.dot_dimension_numbers<[1], [0], [0], [1], [0, 0, 1, 1], [], []>} : vector<8x32xbf16>, vector<32x64xbf16>, vector<8x64xf32> -> vector<8x64xf32>
    %c0_29 = arith.constant 0 : index
    %c0_30 = arith.constant 0 : index
    %56 = vector.load %arg10[%c0_29, %c0_30] : memref<1x64xf32, #tpu.memory_space<vmem>>, vector<1x64xf32>
    %57 = vector.broadcast %56 : vector<1x64xf32> to vector<8x64xf32>
    %58 = arith.addf %55, %57 : vector<8x64xf32>
    %cst_31 = arith.constant 0.000000e+00 : f32
    %59 = vector.broadcast %cst_31 : f32 to vector<8x64xf32>
    %60 = arith.maximumf %58, %59 : vector<8x64xf32>
    %61 = arith.truncf %60 : vector<8x64xf32> to vector<8x64xbf16>
    %c0_32 = arith.constant 0 : index
    %c0_33 = arith.constant 0 : index
    %62 = vector.load %arg11[%c0_32, %c0_33] : memref<64x32xbf16, #tpu.memory_space<vmem>>, vector<64x32xbf16>
    %cst_34 = arith.constant dense<0.000000e+00> : vector<8x32xf32>
    %63 = tpu.matmul %61, %62, %cst_34 {dimension_numbers = #tpu.dot_dimension_numbers<[1], [0], [0], [1], [0, 0, 1, 1], [], []>} : vector<8x64xbf16>, vector<64x32xbf16>, vector<8x32xf32> -> vector<8x32xf32>
    %c0_35 = arith.constant 0 : index
    %c0_36 = arith.constant 0 : index
    %64 = vector.load %arg12[%c0_35, %c0_36] : memref<1x32xf32, #tpu.memory_space<vmem>>, vector<1x32xf32>
    %65 = vector.broadcast %64 : vector<1x32xf32> to vector<8x32xf32>
    %66 = arith.addf %63, %65 : vector<8x32xf32>
    %67 = arith.addf %66, %52 : vector<8x32xf32>
    %cst_37 = arith.constant dense<0.000000e+00> : vector<8xf32>
    %68 = vector.multi_reduction <add>, %67, %cst_37 [1] : vector<8x32xf32> to vector<8xf32>
    %69 = vector.shape_cast %68 : vector<8xf32> to vector<8x1xf32>
    %cst_38 = arith.constant 3.200000e+01 : f32
    %70 = vector.broadcast %cst_38 : f32 to vector<8x1xf32>
    %71 = arith.divf %69, %70 : vector<8x1xf32>
    %72 = vector.broadcast %71 : vector<8x1xf32> to vector<8x32xf32>
    %73 = arith.subf %67, %72 : vector<8x32xf32>
    %74 = vector.broadcast %71 : vector<8x1xf32> to vector<8x32xf32>
    %75 = arith.subf %67, %74 : vector<8x32xf32>
    %76 = arith.mulf %73, %75 : vector<8x32xf32>
    %cst_39 = arith.constant dense<0.000000e+00> : vector<8xf32>
    %77 = vector.multi_reduction <add>, %76, %cst_39 [1] : vector<8x32xf32> to vector<8xf32>
    %78 = vector.shape_cast %77 : vector<8xf32> to vector<8x1xf32>
    %cst_40 = arith.constant 3.200000e+01 : f32
    %79 = vector.broadcast %cst_40 : f32 to vector<8x1xf32>
    %80 = arith.divf %78, %79 : vector<8x1xf32>
    %81 = vector.broadcast %71 : vector<8x1xf32> to vector<8x32xf32>
    %82 = arith.subf %67, %81 : vector<8x32xf32>
    %cst_41 = arith.constant 9.99999974E-6 : f32
    %83 = vector.broadcast %cst_41 : f32 to vector<8x1xf32>
    %84 = arith.addf %80, %83 : vector<8x1xf32>
    %85 = math.rsqrt %84 : vector<8x1xf32>
    %86 = vector.broadcast %85 : vector<8x1xf32> to vector<8x32xf32>
    %87 = arith.mulf %82, %86 : vector<8x32xf32>
    %c0_42 = arith.constant 0 : index
    %c0_43 = arith.constant 0 : index
    %88 = vector.load %arg13[%c0_42, %c0_43] : memref<1x32xf32, #tpu.memory_space<vmem>>, vector<1x32xf32>
    %89 = vector.broadcast %88 : vector<1x32xf32> to vector<8x32xf32>
    %90 = arith.mulf %87, %89 : vector<8x32xf32>
    %c0_44 = arith.constant 0 : index
    %c0_45 = arith.constant 0 : index
    %91 = vector.load %arg14[%c0_44, %c0_45] : memref<1x32xf32, #tpu.memory_space<vmem>>, vector<1x32xf32>
    %92 = vector.broadcast %91 : vector<1x32xf32> to vector<8x32xf32>
    %93 = arith.addf %90, %92 : vector<8x32xf32>
    %c0_46 = arith.constant 0 : index
    %c0_47 = arith.constant 0 : index
    %94 = vector.load %arg15[%c0_46, %c0_47] : memref<8x32xf32, #tpu.memory_space<vmem>>, vector<8x32xf32>
    tpu.vector_store %arg15[%c0_46, %c0_47], %93 {strides = array<i32>} : memref<8x32xf32, #tpu.memory_space<vmem>>, vector<8x32xf32>,
    return
  }
  func.func @transform_0(%arg0: i32) -> (i32, i32, i32) {
    %c0_i32 = arith.constant 0 : i32
    %c0_i32_0 = arith.constant 0 : i32
    %c0_i32_1 = arith.constant 0 : i32
    return %arg0, %c0_i32, %c0_i32_0 : i32, i32, i32
  }
  func.func @transform_1(%arg0: i32) -> (i32, i32, i32) {
    %c0_i32 = arith.constant 0 : i32
    %c0_i32_0 = arith.constant 0 : i32
    %c0_i32_1 = arith.constant 0 : i32
    return %arg0, %c0_i32, %c0_i32_0 : i32, i32, i32
  }
  func.func @transform_2(%arg0: i32) -> (i32, i32) {
    %c0_i32 = arith.constant 0 : i32
    %c0_i32_0 = arith.constant 0 : i32
    %c0_i32_1 = arith.constant 0 : i32
    return %c0_i32, %c0_i32_0 : i32, i32
  }
  func.func @transform_3(%arg0: i32) -> (i32, i32) {
    %c0_i32 = arith.constant 0 : i32
    %c0_i32_0 = arith.constant 0 : i32
    %c0_i32_1 = arith.constant 0 : i32
    return %c0_i32, %c0_i32_0 : i32, i32
  }
  func.func @transform_4(%arg0: i32) -> (i32, i32) {
    %c0_i32 = arith.constant 0 : i32
    %c0_i32_0 = arith.constant 0 : i32
    %c0_i32_1 = arith.constant 0 : i32
    return %c0_i32, %c0_i32_0 : i32, i32
  }
  func.func @transform_5(%arg0: i32) -> (i32, i32) {
    %c0_i32 = arith.constant 0 : i32
    %c0_i32_0 = arith.constant 0 : i32
    return %arg0, %c0_i32 : i32, i32
  }
  func.func @transform_6(%arg0: i32) -> (i32, i32) {
    %c0_i32 = arith.constant 0 : i32
    %c0_i32_0 = arith.constant 0 : i32
    %c0_i32_1 = arith.constant 0 : i32
    return %c0_i32, %c0_i32_0 : i32, i32
  }
  func.func @transform_7(%arg0: i32) -> (i32, i32) {
    %c0_i32 = arith.constant 0 : i32
    %c0_i32_0 = arith.constant 0 : i32
    %c0_i32_1 = arith.constant 0 : i32
    return %c0_i32, %c0_i32_0 : i32, i32
  }
  func.func @transform_8(%arg0: i32) -> (i32, i32) {
    %c0_i32 = arith.constant 0 : i32
    %c0_i32_0 = arith.constant 0 : i32
    %c0_i32_1 = arith.constant 0 : i32
    return %c0_i32, %c0_i32_0 : i32, i32
  }
  func.func @transform_9(%arg0: i32) -> (i32, i32) {
    %c0_i32 = arith.constant 0 : i32
    %c0_i32_0 = arith.constant 0 : i32
    %c0_i32_1 = arith.constant 0 : i32
    return %c0_i32, %c0_i32_0 : i32, i32
  }
  func.func @transform_10(%arg0: i32) -> (i32, i32) {
    %c0_i32 = arith.constant 0 : i32
    %c0_i32_0 = arith.constant 0 : i32
    %c0_i32_1 = arith.constant 0 : i32
    return %c0_i32, %c0_i32_0 : i32, i32
  }
  func.func @transform_11(%arg0: i32) -> (i32, i32) {
    %c0_i32 = arith.constant 0 : i32
    %c0_i32_0 = arith.constant 0 : i32
    %c0_i32_1 = arith.constant 0 : i32
    return %c0_i32, %c0_i32_0 : i32, i32
  }
  func.func @transform_12(%arg0: i32) -> (i32, i32) {
    %c0_i32 = arith.constant 0 : i32
    %c0_i32_0 = arith.constant 0 : i32
    %c0_i32_1 = arith.constant 0 : i32
    return %c0_i32, %c0_i32_0 : i32, i32
  }
  func.func @transform_13(%arg0: i32) -> (i32, i32) {
    %c0_i32 = arith.constant 0 : i32
    %c0_i32_0 = arith.constant 0 : i32
    %c0_i32_1 = arith.constant 0 : i32
    return %c0_i32, %c0_i32_0 : i32, i32
  }
  func.func @transform_14(%arg0: i32) -> (i32, i32) {
    %c0_i32 = arith.constant 0 : i32
    %c0_i32_0 = arith.constant 0 : i32
    return %arg0, %c0_i32 : i32, i32
  }
}

</mosaic_0001>

<bundles_post_ra>
// kernel: decoder_forward.7
= control target key start
LH: loop header
LB: loop body
LE: loop exit
PB: predicated region body
PF: predicated region fallthrough
CT: control target
= control target key end

     0   :  { %s523_s12 = smov 0   ;;  %s585_s0 = inlined_call_operand.vmem [shape: f32[160,32], index: 0, kind: input, shape index: {}]   ;;  %s586_s1 = inlined_call_operand.vmem [shape: bf16[32,32], index: 1, kind: input, shape index: {}]   ;;  %s587_s2 = inlined_call_operand.vmem [shape: f32[1,32], index: 2, kind: input, shape index: {}]   ;;  %s588_s3 = inlined_call_operand.vmem [shape: bf16[160,32], index: 3, kind: output, shape index: {}]  }
   0x1 LB: > { %s409_s13 = sadd.s32 4294967295, %s499_s12   ;;  %p413_p0 = scmp.ge.s32.totalorder %s499_s12, 1  ;;  %s499_s12 = sphi %s523_s12, %s13_s12  }
   0x2   : > { %p138_p1 = scmp.lt.s32.totalorder %s499_s12, 3 }
   0x4   : > { %p139_p2 = pnand %p413_p0, %p138_p1 }
   0x5   : > { %s162_s18 = smul.u32 (!%p139_p2), 10, %s409_s13 }
   0x6   : > { %142 = sbr.rel (%p139_p2) target bundleno = 238 (0xee), region = 32 }
   0x7   : > { %p163_p3 = scmp.lt.s32.totalorder (!%p139_p2), %s162_s18, 19 }
   0xb   : > { %v491_v0 = vld [vmem:[%s586_s1 + $0x8] sm:$0xff]   ;;  %v501_v1 = vmov 0.0   ;;  %v492_v2 = vld [vmem:[%s586_s1] sm:$0xff]   ;;  %vm502_vm0 = vmmov 0   ;;  %s590_s18 = smov (!%p163_p3, %s162_s18), 19  ;;  %vm213_vm1 = vcmask 261120  }
   0xc   : > { %453 = vmatprep.subr.bf16.mxu0 %v501_v1  ;;  %477 = vmatprep.subr.bf16.mxu1 %v501_v1  ;;  %s414_s19 = sshll.u32 %s590_s18, 3  ;;  %v416_v18 = vld [vmem:[%s587_s2] ss:$0 sm:$0xff]  ;;  %s415_s25 = sshll.u32 %s590_s18, 2  ;;  %vm342_vm2 = vcmask 257024  }
   0xd   : > { %454 = vmatpush3.bf16.msra.mxu0 %v491_v0  ;;  %479 = vmatpush3.bf16.msra.mxu1 %v491_v0  ;;  %s166_s22 = scalar_lea.vmem %s585_s0, %s414_s19  ;;  %s560_s28 = scalar_lea.vmem %s588_s3, %s415_s25 }
   0xe   : > { %455 = vmatprep.subr.bf16.mxu0 %v501_v1  ;;  %478 = vmatprep.subr.bf16.mxu1 %v501_v1  ;;  %v175_v3 = vld [vmem:[%s166_s22] sm:$0xff]  ;;  %v176_v4 = vld [vmem:[%s166_s22 + $0x8] sm:$0xff]  ;;  %v181_v5 = vld [vmem:[%s166_s22 + $0x30] sm:$0xff] }
   0xf   : > { %457 = vmatprep.mubr.msk.bf16.mxu0 %vm502_vm0, %v501_v1  ;;  %469 = vmatprep.mubr.msk.bf16.mxu1 %vm502_vm0, %v501_v1  ;;  %v185_v6 = vpack.c.bf16 %v176_v4, %v175_v3  ;;  %v182_v7 = vld [vmem:[%s166_s22 + $0x38] sm:$0xff]  ;;  %v177_v9 = vld [vmem:[%s166_s22 + $0x10] sm:$0xff]  ;;  %v183_v11 = vld [vmem:[%s166_s22 + $0x40] sm:$0xff] }
  0x10   : > { %v188_v8 = vpack.c.bf16 %v182_v7, %v181_v5  ;;  %v178_v10 = vld [vmem:[%s166_s22 + $0x18] sm:$0xff]  ;;  %v184_v12 = vld [vmem:[%s166_s22 + $0x48] sm:$0xff]  ;;  %v179_v15 = vld [vmem:[%s166_s22 + $0x20] sm:$0xff] }
  0x11   : > { %456 = vmatpush3.bf16.msra.mxu0 %v492_v2  ;;  %480 = vmatpush3.bf16.msra.mxu1 %v492_v2  ;;  %v186_v13 = vpack.c.bf16 %v178_v10, %v177_v9  ;;  %v189_v14 = vpack.c.bf16 %v184_v12, %v183_v11  ;;  %v180_v16 = vld [vmem:[%s166_s22 + $0x28] sm:$0xff] }
  0x12   : > { %v187_v17 = vpack.c.bf16 %v180_v16, %v179_v15 }
  0x14   : > { %458 = vmatmul.mubr.msk.bf16.vlgmr.msra.gmra.mxu0 %vm213_vm1, %v185_v6  ;;  %470 = vmatmul.mubr.msk.bf16.vlgmr.msra.gmra.mxu1 %vm213_vm1, %v188_v8 }
  0x15   : > { %461 = vmatprep.mubr.msk.bf16.mxu0 %vm502_vm0, %v501_v1  ;;  %473 = vmatprep.mubr.msk.bf16.mxu1 %vm502_vm0, %v501_v1 }
  0x1c   : > { %462 = vmatmul.mubr.msk.bf16.gmra.mxu0 %vm213_vm1, %v186_v13  ;;  %474 = vmatmul.mubr.msk.bf16.gmra.mxu1 %vm213_vm1, %v189_v14 }
  0x1d   : > { %465 = vmatprep.mubr.msk.bf16.mxu0 %vm502_vm0, %v501_v1 }
  0x24   : > { %466 = vmatmul.mubr.msk.bf16.gmra.mxu0 %vm213_vm1, %v187_v17 }
  0xd4   : > { %v263_v19 = vpop.f32.mrf.mxu0  ;;  %v287_v21 = vpop.f32.mrf.mxu1 }
  0xd5   : > { %v264_v20 = vadd.f32 %v416_v18, %v263_v19  ;;  %v288_v23 = vadd.f32 %v416_v18, %v287_v21 }
  0xd6   : > { %v459_v22 = vpop.f32.mrf.mxu0  ;;  %v471_v25 = vpop.f32.mrf.mxu1 }
  0xd7   : > { %v436_v24 = vpack.c.bf16 %v264_v20, %v264_v20  ;;  %v442_v26 = vpack.c.bf16 %v288_v23, %v288_v23 }
  0xd8   : > { %v266_v27 = vpop.f32.mrf.mxu0  ;;  %v290_v29 = vpop.f32.mrf.mxu1 }
  0xd9   : > { %343 = vst.msk [vmem:[%s560_s28] sm:$0xf] %vm342_vm2, %v436_v24  ;;  %v267_v28 = vadd.f32 %v416_v18, %v266_v27  ;;  %349 = vst.msk [vmem:[%s560_s28 + $0x18] sm:$0xf] %vm342_vm2, %v442_v26  ;;  %v291_v31 = vadd.f32 %v416_v18, %v290_v29 }
  0xda   : > { %v460_v30 = vpop.f32.mrf.mxu0  ;;  %v472_v33 = vpop.f32.mrf.mxu1 }
  0xdb   : > { %v437_v32 = vpack.c.bf16 %v267_v28, %v267_v28  ;;  %v443_v34 = vpack.c.bf16 %v291_v31, %v291_v31 }
  0xdc   : > { %v271_v35 = vpop.f32.mrf.mxu0  ;;  %v295_v37 = vpop.f32.mrf.mxu1 }
  0xdd   : > { %344 = vst.msk [vmem:[%s560_s28 + $0x4] sm:$0xf] %vm342_vm2, %v437_v32  ;;  %v272_v36 = vadd.f32 %v416_v18, %v271_v35  ;;  %350 = vst.msk [vmem:[%s560_s28 + $0x1c] sm:$0xf] %vm342_vm2, %v443_v34  ;;  %v296_v39 = vadd.f32 %v416_v18, %v295_v37 }
  0xde   : > { %v463_v38 = vpop.f32.mrf.mxu0  ;;  %v475_v41 = vpop.f32.mrf.mxu1 }
  0xdf   : > { %v438_v40 = vpack.c.bf16 %v272_v36, %v272_v36  ;;  %v444_v42 = vpack.c.bf16 %v296_v39, %v296_v39 }
  0xe0   : > { %v274_v43 = vpop.f32.mrf.mxu0  ;;  %v298_v45 = vpop.f32.mrf.mxu1 }
  0xe1   : > { %345 = vst.msk [vmem:[%s560_s28 + $0x8] sm:$0xf] %vm342_vm2, %v438_v40  ;;  %v275_v44 = vadd.f32 %v416_v18, %v274_v43  ;;  %351 = vst.msk [vmem:[%s560_s28 + $0x20] sm:$0xf] %vm342_vm2, %v444_v42  ;;  %v299_v47 = vadd.f32 %v416_v18, %v298_v45 }
  0xe2   : > { %v464_v46 = vpop.f32.mrf.mxu0  ;;  %v476_v49 = vpop.f32.mrf.mxu1 }
  0xe3   : > { %v439_v48 = vpack.c.bf16 %v275_v44, %v275_v44  ;;  %v445_v50 = vpack.c.bf16 %v299_v47, %v299_v47 }
  0xe4   : > { %v279_v51 = vpop.f32.mrf.mxu0 }
  0xe5   : > { %346 = vst.msk [vmem:[%s560_s28 + $0xc] sm:$0xf] %vm342_vm2, %v439_v48  ;;  %v280_v52 = vadd.f32 %v416_v18, %v279_v51  ;;  %352 = vst.msk [vmem:[%s560_s28 + $0x24] sm:$0xf] %vm342_vm2, %v445_v50 }
  0xe6   : > { %v467_v53 = vpop.f32.mrf.mxu0 }
  0xe7   : > { %v440_v54 = vpack.c.bf16 %v280_v52, %v280_v52 }
  0xe8   : > { %v282_v55 = vpop.f32.mrf.mxu0 }
  0xe9   : > { %347 = vst.msk [vmem:[%s560_s28 + $0x10] sm:$0xf] %vm342_vm2, %v440_v54  ;;  %v283_v56 = vadd.f32 %v416_v18, %v282_v55 }
  0xea   : > { %v468_v57 = vpop.f32.mrf.mxu0 }
  0xeb   : > { %v441_v58 = vpack.c.bf16 %v283_v56, %v283_v56 }
  0xed   : > { %348 = vst.msk [vmem:[%s560_s28 + $0x14] sm:$0xf] %vm342_vm2, %v441_v58 }
  0xee PF: > { %s13_s12 = sadd.s32 1, %s499_s12  }
  0xef   : > { %p10_p4 = scmp.ge.s32.totalorder %s13_s12, 4  }
  0xf1   :  { %12 = sbr.rel (!%p10_p4) target bundleno = 1 (0x1), region = 62 }

// kernel: decoder_forward.6
= control target key start
LH: loop header
LB: loop body
LE: loop exit
PB: predicated region body
PF: predicated region fallthrough
CT: control target
= control target key end

     0   :  { %s2094_s0 = inlined_call_operand.vmem [shape: f32[2,8,32], index: 0, kind: input, shape index: {}]   ;;  %s2095_s1 = inlined_call_operand.vmem [shape: f32[2,8,32], index: 1, kind: input, shape index: {}]   ;;  %s2096_s2 = inlined_call_operand.vmem [shape: bf16[32,64], index: 2, kind: input, shape index: {}]   ;;  %s2097_s3 = inlined_call_operand.vmem [shape: f32[1,64], index: 3, kind: input, shape index: {}]   ;;  %s2098_s4 = inlined_call_operand.vmem [shape: bf16[32,32], index: 4, kind: input, shape index: {}]   ;;  %s2099_s5 = inlined_call_operand.hbm [shape: f32[1,32], index: 5, kind: input, shape index: {}]   ;;  %s2100_s6 = inlined_call_operand.vmem [shape: bf16[32,32], index: 6, kind: input, shape index: {}]   ;;  %s2101_s7 = inlined_call_operand.vmem [shape: f32[1,32], index: 7, kind: input, shape index: {}]   ;;  %s2102_s8 = inlined_call_operand.vmem [shape: f32[1,32], index: 8, kind: input, shape index: {}]   ;;  %s2103_s9 = inlined_call_operand.vmem [shape: f32[1,32], index: 9, kind: input, shape index: {}]   ;;  %s2104_s10 = inlined_call_operand.vmem [shape: bf16[32,32], index: 10, kind: input, shape index: {}]   ;;  %s2105_s11 = inlined_call_operand.vmem [shape: f32[1,32], index: 11, kind: input, shape index: {}]   ;;  %s2106_s12 = inlined_call_operand.vmem [shape: bf16[32,16], index: 12, kind: input, shape index: {}]   ;;  %s2107_s13 = inlined_call_operand.vmem [shape: f32[1,16], index: 13, kind: input, shape index: {}]   ;;  %s2108_s14 = inlined_call_operand.vmem [shape: f32[2,8,32], index: 14, kind: output, shape index: {0}]   ;;  %s2109_s15 = inlined_call_operand.vmem [shape: f32[2,8,32], index: 15, kind: output, shape index: {1}]   ;;  %s2110_s16 = inlined_call_operand.vmem [shape: f32[2,8,16], index: 16, kind: output, shape index: {2}]  }
   0x1   :  { %2111 = sst [smem:[#allocation5_spill]] %s2094_s0 }
   0x2   :  { %22 = vsyncpa [#allocation3], 0  ;;  %s1895_s21 = smov 0  }
   0x3 LB: > { %s1901_s22 = sadd.s32 4294967295, %s1795_s21   ;;  %p1539_p0 = scmp.ge.s32.totalorder %s1795_s21, 1  ;;  %s1795_s21 = sphi %s1895_s21, %s28_s21  }
   0x4   : > { %p415_p1 = scmp.lt.s32.totalorder %s1795_s21, 3  ;;  %p1708_p3 = scmp.eq.s32.totalorder %s1901_s22, 0 }
   0x5   : > { %s1797_s24 = smov [#allocation2]  }
   0x6   : > { %p1905_p2 = pnand %p1539_p0, %p415_p1  ;;  %s437_s25 = sshll.u32 %s1797_s24, 4  ;;  %s438_s25 = int_to_ptr.vmem [resolvable:$true] %s437_s25 }
   0x7   : > { %s1770_s26 = scalar_lea.vmem %s438_s25, 16  ;;  %s1777_s27 = scalar_lea.vmem %s438_s25, 32 }
   0x8   : > { %p1704_p4 = pneg %p1905_p2  ;;  %p1771_p7 = scmp.ne.s32.totalorder %s438_s25, %s1770_s26 }
   0x9   : > { %p1778_p10 = scmp.lt.s32.totalorder %s438_s25, %s438_s25  ;;  %p1779_p11 = scmp.lt.s32.totalorder %s1777_s27, %s1770_s26 }
   0xa   : > { %p1705_p5 = pnand %p1708_p3, %p1704_p4 }
   0xb   : > { %p1780_p12 = por %p1779_p11, %p1778_p10 }
   0xc   : > { %p1761_p6 = pneg %p1705_p5 }
   0xe   : > { %p1773_p8 = pnand %p1771_p7, %p1761_p6 }
  0x10   : > { %p1774_p9 = pneg %p1773_p8 }
  0x12   : > { %p1781_p13 = pnand %p1780_p12, %p1774_p9 }
  0x14   : > { %1784 = shalt.err (!%p1781_p13)
}
  0x15   : > { %1707 = dma.hbm_to_vmem [thread:$0]  (!%p1705_p5), %s2099_s5, 16, %s438_s25, [#allocation3]  }
  0x16   : > { %488 = sbr.rel (%p1905_p2) target bundleno = 1947 (0x79b), region = 76 }
  0x1b   : > { %1790 = dma.done.wait (%p1708_p3), [#allocation3], 16  }
  0x1c   : > { %1792 = vsyncadd (%p1708_p3), [#allocation3], 4294967280  ;;  %p548_p0 = scmp.lt.s32.totalorder %s1901_s22, 1  ;;  %v1798_v0 = vmov 0.0   ;;  %vm1799_vm0 = vmmov 0   ;;  %s2113_s18 = sld [smem:[#allocation5_spill]] }
  0x1d   : > { %1612 = vmatprep.subr.bf16.mxu0 %v1798_v0  ;;  %1616 = vmatprep.mubr.msk.bf16.mxu0 %vm1799_vm0, %v1798_v0  ;;  %v1731_v1 = vld [vmem:[%s2096_s2 + $0x8] sm:$0xff]   ;;  %v1732_v2 = vld [vmem:[%s2096_s2] sm:$0xff]   ;;  %vm596_vm1 = vcmask 261120   ;;  %s1800_s0 = smov 120   ;;  %s1801_s17 = smov 96   ;;  %vm712_vm2 = vcmask 64512  }
  0x1e   : > { %s2115_s22 = smov (!%p548_p0, %s1901_s22), 1  ;;  %1620 = vmatprep.subr.bf16.mxu1 %v1798_v0  ;;  %1624 = vmatprep.mubr.msk.bf16.mxu1 %vm1799_vm0, %v1798_v0  ;;  %v1549_v7 = vld [vmem:[%s2097_s3] ss:$0 sm:$0xff]  ;;  %s1804_s20 = smov 72   ;;  %v1733_v14 = vld [vmem:[%s2098_s4 + $0x8] sm:$0xff]   ;;  %vm774_vm3 = vcmask 1043456  }
  0x1f   : > { %s1931_s30 = sshll.u32 %s2115_s22, 3  ;;  %1613 = vmatpush3.bf16.msra.mxu0 %v1731_v1  ;;  %s1805_s23 = smov 112   ;;  %1621 = vmatpush3.bf16.msra.mxu1 %v1733_v14  ;;  %v1734_v15 = vld [vmem:[%s2098_s4] sm:$0xff]   ;;  %vm1162_vm4 = vcmask 130048   ;;  %vm1164_vm5 = vcmask 195584  }
  0x20   : > { %s555_s24 = scalar_lea.vmem %s2095_s1, %s1931_s30  ;;  %1614 = vmatprep.subr.bf16.mxu0 %v1798_v0  ;;  %1622 = vmatprep.subr.bf16.mxu1 %v1798_v0  ;;  %v1553_v51 = vld [vmem:[#allocation2] ss:$0 sm:$0xff]  ;;  %s559_s26 = scalar_lea.vmem %s2108_s14, %s1931_s30 }
  0x21   : > { %v1949_v4 = vld [vmem:[%s555_s24] sm:$0xff]  ;;  %s1806_s24 = smov 104  }
  0x22   : > { %s551_s19 = scalar_lea.vmem %s2113_s18, %s1931_s30  ;;  %s1802_s18 = smov 80  }
  0x23   : > { %v1947_v3 = vld [vmem:[%s551_s19] sm:$0xff]  ;;  %1615 = vmatpush3.bf16.msra.mxu0 %v1732_v2  ;;  %s1803_s19 = smov 88   ;;  %1623 = vmatpush3.bf16.msra.mxu1 %v1734_v15 }
  0x24   : > { %v571_v5 = vadd.f32 %v1949_v4, %v1947_v3  ;;  %1628 = vmatprep.subr.bf16.mxu0 %v1798_v0  ;;  %v640_v16 = vpack.c.bf16 %v1947_v3, %v1947_v3  ;;  %1634 = vmatprep.subr.bf16.mxu1 %v1798_v0 }
  0x26   : > { %v572_v6 = vpack.c.bf16 %v571_v5, %v571_v5  ;;  %1625 = vmatmul.mubr.msk.bf16.vlgmr.msra.gmra.mxu1 %vm596_vm1, %v640_v16 }
  0x27   : > { %1636 = vmatprep.mubr.msk.bf16.mxu1 %vm1799_vm0, %v1798_v0 }
  0x28   : > { %1617 = vmatmul.mubr.msk.bf16.vlgmr.msra.gmra.mxu0 %vm596_vm1, %v572_v6 }
  0x29   : > { %1630 = vmatprep.mubr.msk.bf16.mxu0 %vm1799_vm0, %v1798_v0 }
  0xe6   : > { %v701_v48 = vpop.f32.mrf.mxu1 }
  0xe7   : > { %v702_v53 = vadd.f32 %v1553_v51, %v701_v48 }
  0xe8   : > { %v634_v8 = vpop.f32.mrf.mxu0  ;;  %v1626_v49 = vpop.f32.mrf.mxu1 }
  0xe9   : > { %v635_v9 = vadd.f32 %v1549_v7, %v634_v8  ;;  %v708_v54 = vpack.c.bf16 %v702_v53, %v702_v53 }
  0xea   : > { %v1618_v10 = vpop.f32.mrf.mxu0  ;;  %v704_v50 = vpop.f32.mrf.mxu1 }
  0xeb   : > { %v707_v11 = vpack.c.bf16 %v635_v9, %v635_v9  ;;  %v776_v55 = vsel %vm774_vm3, %v708_v54, 0  ;;  %v1736_v50 = vld [vmem:[%s2100_s6] sm:$0xff]  }
  0xec   : > { %v637_v12 = vpop.f32.mrf.mxu0  ;;  %v1627_v52 = vpop.f32.mrf.mxu1  ;;  %1635 = vmatpush3.bf16.msra.mxu1 %v776_v55 }
  0xed   : > { %818 = vrot.lane.b32.xlu1 %v707_v11, %s1800_s0  ;;  %710 = vrot.lane.b32.xlu0 %v707_v11, %s1801_s17  ;;  %s1808_s17 = smov 16  }
  0xee   : > { %v1619_v13 = vpop.f32.mrf.mxu0  ;;  %1646 = vmatprep.subr.bf16.mxu1 %v1798_v0 }
  0xf1   : > { %931 = vrot.lane.b32.xlu1 %v707_v11, %s1802_s18  ;;  %820 = vrot.lane.b32.xlu0 %v707_v11, %s1803_s19  ;;  %s563_s18 = scalar_lea.vmem %s2109_s15, %s1931_s30 }
  0xf5   : > { %1041 = vrot.lane.b32.xlu1 %v707_v11, %s1804_s20  ;;  %929 = vrot.lane.b32.xlu0 %v707_v11, %s1805_s23  ;;  %s1809_s20 = smov 24  }
  0xf9   : > { %1039 = vrot.lane.b32.xlu0 %v707_v11, %s1806_s24 }
 0x15f   : > { %v711_v17 = vpop.permute.xlu0 %710  ;;  %v819_v20 = vpop.permute.xlu1 %818 }
 0x160   : > { %v717_v18 = vsel %vm712_vm2, %v711_v17, 0 }
 0x161   : > { %1629 = vmatpush3.bf16.xpose.msra.mxu0 %v717_v18 }
 0x162   : > { %1640 = vmatprep.subr.bf16.mxu0 %v1798_v0 }
 0x163   : > { %v821_v19 = vpop.permute.xlu0 %820  ;;  %v932_v22 = vpop.permute.xlu1 %931 }
 0x164   : > { %v826_v21 = vsel %vm712_vm2, %v821_v19, 0  ;;  %v937_v23 = vsel %vm712_vm2, %v932_v22, 0 }
 0x167   : > { %v1042_v24 = vpop.permute.xlu1 %1041  ;;  %v930_v25 = vpop.permute.xlu0 %929 }
 0x168   : > { %1631 = vmatmul.mubr.msk.bf16.vlgmr.msra.gmra.mxu0 %vm712_vm2, %v707_v11  ;;  %v1047_v26 = vsel %vm712_vm2, %v1042_v24, 0 }
 0x169   : > { %1641 = vmatpush3.bf16.xpose.msra.mxu0 %v826_v21  ;;  %1642 = vmatprep.mubr.msk.bf16.mxu0 %vm1799_vm0, %v1798_v0 }
 0x16a   : > { %1652 = vmatprep.subr.bf16.mxu0 %v1798_v0 }
 0x16b   : > { %v1040_v27 = vpop.permute.xlu0 %1039 }
 0x170   : > { %1643 = vmatmul.mubr.msk.bf16.vlgmr.msra.gmra.mxu0 %vm712_vm2, %v819_v20 }
 0x171   : > { %1653 = vmatpush3.bf16.xpose.msra.mxu0 %v937_v23  ;;  %1654 = vmatprep.mubr.msk.bf16.mxu0 %vm1799_vm0, %v1798_v0 }
 0x172   : > { %1664 = vmatprep.subr.bf16.mxu0 %v1798_v0 }
 0x178   : > { %1655 = vmatmul.mubr.msk.bf16.vlgmr.msra.gmra.mxu0 %vm712_vm2, %v930_v25 }
 0x179   : > { %1665 = vmatpush3.bf16.xpose.msra.mxu0 %v1047_v26  ;;  %1666 = vmatprep.mubr.msk.bf16.mxu0 %vm1799_vm0, %v1798_v0 }
 0x17a   : > { %1676 = vmatprep.subr.bf16.mxu0 %v1798_v0 }
 0x180   : > { %1667 = vmatmul.mubr.msk.bf16.vlgmr.msra.gmra.mxu0 %vm712_vm2, %v1040_v27 }
 0x181   : > { %1680 = vmatprep.mubr.msk.bf16.mxu0 %vm1799_vm0, %v1798_v0 }
 0x228   : > { %v753_v28 = vpop.f32.mrf.mxu0 }
 0x229   : > { %v759_v29 = vsel %vm712_vm2, %v753_v28, -inf }
 0x22a   : > { %760 = vmax.xlane.f32.xlu1 %v759_v29  ;;  %v1632_v30 = vpop.f32.mrf.mxu0 }
 0x22c   : > { %v756_v31 = vpop.f32.mrf.mxu0 }
 0x22e   : > { %v1633_v32 = vpop.f32.mrf.mxu0 }
 0x230   : > { %v862_v33 = vpop.f32.mrf.mxu0 }
 0x231   : > { %v868_v34 = vsel %vm712_vm2, %v862_v33, -inf }
 0x232   : > { %869 = vmax.xlane.f32.xlu0 %v868_v34  ;;  %v1644_v35 = vpop.f32.mrf.mxu0 }
 0x234   : > { %v865_v36 = vpop.f32.mrf.mxu0 }
 0x236   : > { %v1645_v37 = vpop.f32.mrf.mxu0 }
 0x238   : > { %v973_v38 = vpop.f32.mrf.mxu0 }
 0x239   : > { %v979_v39 = vsel %vm712_vm2, %v973_v38, -inf }
 0x23a   : > { %980 = vmax.xlane.f32.xlu0 %v979_v39  ;;  %v1656_v40 = vpop.f32.mrf.mxu0 }
 0x23b   : > { %v1735_v40 = vld [vmem:[%s2100_s6 + $0x8] sm:$0xff]  }
 0x23c   : > { %v976_v41 = vpop.f32.mrf.mxu0  ;;  %1677 = vmatpush3.bf16.msra.mxu0 %v1735_v40 }
 0x23d   : > { %1678 = vmatprep.subr.bf16.mxu0 %v1798_v0 }
 0x23e   : > { %v1657_v42 = vpop.f32.mrf.mxu0 }
 0x240   : > { %v1083_v43 = vpop.f32.mrf.mxu0  ;;  %1679 = vmatpush3.bf16.msra.mxu0 %v1736_v50 }
 0x241   : > { %v1089_v44 = vsel %vm712_vm2, %v1083_v43, -inf  ;;  %1692 = vmatprep.subr.bf16.mxu0 %v1798_v0 }
 0x242   : > { %1090 = vmax.xlane.f32.xlu1 %v1089_v44  ;;  %v1668_v45 = vpop.f32.mrf.mxu0 }
 0x244   : > { %v1086_v46 = vpop.f32.mrf.mxu0 }
 0x246   : > { %v1669_v47 = vpop.f32.mrf.mxu0 }
 0x2b3   : > { %v761_v56 = vpop.xlane.xlu1 %760 }
 0x2b4   : > { %v762_v57 = vsub.f32 %v753_v28, %v761_v56 }
 0x2b6   : > { %v763_v58 = vmul.f32 1.442695, %v762_v57 }
 0x2b8   : > { %1741 = vpow2.f32 %v763_v58 }
 0x2bb   : > { %v870_v59 = vpop.xlane.xlu0 %869 }
 0x2bc   : > { %v871_v60 = vsub.f32 %v862_v33, %v870_v59 }
 0x2be   : > { %v872_v61 = vmul.f32 1.442695, %v871_v60 }
 0x2c0   : > { %1743 = vpow2.f32 %v872_v61 }
 0x2c3   : > { %v981_v62 = vpop.xlane.xlu0 %980 }
 0x2c4   : > { %v982_v63 = vsub.f32 %v973_v38, %v981_v62  ;;  %v1565_v62 = vld [vmem:[%s2101_s7] ss:$0 sm:$0xff] }
 0x2c5   : > { %v1742_v1 = vpop.eup %1741 }
 0x2c6   : > { %v983_v2 = vmul.f32 1.442695, %v982_v63  ;;  %v765_v5 = vsel %vm712_vm2, %v1742_v1, 0.0 }
 0x2c7   : > { %766 = vadd.xlane.f32.xlu0 %v765_v5 }
 0x2c8   : > { %1745 = vpow2.f32 %v983_v2 }
 0x2cb   : > { %v1091_v10 = vpop.xlane.xlu1 %1090 }
 0x2cc   : > { %v1092_v11 = vsub.f32 %v1083_v43, %v1091_v10 }
 0x2cd   : > { %v1744_v6 = vpop.eup %1743 }
 0x2ce   : > { %v874_v7 = vsel %vm712_vm2, %v1744_v6, 0.0  ;;  %v1093_v12 = vmul.f32 1.442695, %v1092_v11 }
 0x2cf   : > { %875 = vadd.xlane.f32.xlu1 %v874_v7 }
 0x2d0   : > { %1747 = vpow2.f32 %v1093_v12 }
 0x2d5   : > { %v1746_v8 = vpop.eup %1745 }
 0x2d6   : > { %v985_v9 = vsel %vm712_vm2, %v1746_v8, 0.0 }
 0x2d7   : > { %986 = vadd.xlane.f32.xlu0 %v985_v9 }
 0x2dd   : > { %v1748_v13 = vpop.eup %1747 }
 0x2de   : > { %v1095_v14 = vsel %vm712_vm2, %v1748_v13, 0.0 }
 0x2e0   : > { %991 = vrot.lane.b32.xlu1 %v708_v54, %s1805_s23  ;;  %s567_s23 = scalar_lea.vmem %s2110_s16, %s1931_s30 }
 0x2ed   : > { %881 = vrot.lane.b32.xlu0 %v708_v54, %s1800_s0  ;;  %s1807_s0 = smov 8  }
 0x304   : > { %1096 = vadd.xlane.f32.xlu1 %v1095_v14  ;;  %v1737_v14 = vld [vmem:[%s2104_s10 + $0x8] sm:$0xff]  }
 0x315   : > { %1101 = vrot.lane.b32.xlu1 %v708_v54, %s1806_s24 }
 0x350   : > { %v767_v15 = vpop.xlane.xlu0 %766 }
 0x351   : > { %1749 = vrcp.f32 %v767_v15  ;;  %v1739_v15 = vld [vmem:[%s2104_s10] sm:$0xff]  }
 0x358   : > { %v876_v16 = vpop.xlane.xlu1 %875 }
 0x359   : > { %1751 = vrcp.f32 %v876_v16  ;;  %v1740_v16 = vld [vmem:[%s2106_s12] sm:$0xff]  }
 0x35c   : > { %v992_v25 = vpop.permute.xlu1 %991 }
 0x35d   : > { %v997_v27 = vsel %vm774_vm3, %v992_v25, 0 }
 0x35e   : > { %v1750_v17 = vpop.eup %1749 }
 0x35f   : > { %v769_v18 = vmul.f32 %v1750_v17, %v1742_v1 }
 0x360   : > { %v987_v19 = vpop.xlane.xlu0 %986 }
 0x361   : > { %1753 = vrcp.f32 %v987_v19  ;;  %v770_v20 = vpack.c.bf16 %v769_v18, %v769_v18 }
 0x363   : > { %1637 = vmatmul.mubr.msk.bf16.vlgmr.msra.gmra.mxu1 %vm712_vm2, %v770_v20 }
 0x364   : > { %v882_v21 = vpop.permute.xlu0 %881  ;;  %1648 = vmatprep.mubr.msk.bf16.mxu1 %vm1799_vm0, %v1798_v0 }
 0x365   : > { %v887_v22 = vsel %vm774_vm3, %v882_v21, 0  ;;  %v1569_v21 = vld [vmem:[%s2102_s8] ss:$0 sm:$0xff] }
 0x366   : > { %v1752_v23 = vpop.eup %1751  ;;  %1647 = vmatpush3.bf16.msra.mxu1 %v887_v22 }
 0x367   : > { %1658 = vmatprep.subr.bf16.mxu1 %v1798_v0  ;;  %v878_v24 = vmul.f32 %v1752_v23, %v1744_v6  ;;  %v1570_v23 = vld [vmem:[%s2103_s9] ss:$0 sm:$0xff] }
 0x369   : > { %v879_v26 = vpack.c.bf16 %v878_v24, %v878_v24 }
 0x36b   : > { %1649 = vmatmul.mubr.msk.bf16.vlgmr.msra.gmra.mxu1 %vm712_vm2, %v879_v26 }
 0x36c   : > { %1659 = vmatpush3.bf16.msra.mxu1 %v997_v27  ;;  %1660 = vmatprep.mubr.msk.bf16.mxu1 %vm1799_vm0, %v1798_v0  ;;  %v1571_v27 = vld [vmem:[%s2105_s11] ss:$0 sm:$0xff] }
 0x36d   : > { %1670 = vmatprep.subr.bf16.mxu1 %v1798_v0 }
 0x36e   : > { %v1754_v28 = vpop.eup %1753 }
 0x36f   : > { %v989_v29 = vmul.f32 %v1754_v28, %v1746_v8  ;;  %v1575_v28 = vld [vmem:[%s2107_s13] ss:$0 sm:$0xff] }
 0x371   : > { %v990_v30 = vpack.c.bf16 %v989_v29, %v989_v29 }
 0x373   : > { %1661 = vmatmul.mubr.msk.bf16.vlgmr.msra.gmra.mxu1 %vm712_vm2, %v990_v30 }
 0x374   : > { %1672 = vmatprep.mubr.msk.bf16.mxu1 %vm1799_vm0, %v1798_v0 }
 0x38d   : > { %v1097_v31 = vpop.xlane.xlu1 %1096 }
 0x38e   : > { %1755 = vrcp.f32 %v1097_v31 }
 0x391   : > { %v1102_v32 = vpop.permute.xlu1 %1101 }
 0x392   : > { %v1107_v33 = vsel %vm774_vm3, %v1102_v32, 0 }
 0x393   : > { %1671 = vmatpush3.bf16.msra.mxu1 %v1107_v33 }
 0x394   : > { %1684 = vmatprep.subr.bf16.mxu1 %v1798_v0 }
 0x39b   : > { %v1756_v34 = vpop.eup %1755 }
 0x39c   : > { %v1099_v35 = vmul.f32 %v1756_v34, %v1748_v13 }
 0x39e   : > { %v1100_v36 = vpack.c.bf16 %v1099_v35, %v1099_v35 }
 0x3a0   : > { %1673 = vmatmul.mubr.msk.bf16.vlgmr.msra.gmra.mxu1 %vm712_vm2, %v1100_v36 }
 0x3a1   : > { %1688 = vmatprep.mubr.msk.bf16.mxu1 %vm1799_vm0, %v1798_v0  ;;  %1685 = vmatpush3.bf16.msra.mxu1 %v1737_v14 }
 0x3a2   : > { %1686 = vmatprep.subr.bf16.mxu1 %v1798_v0 }
 0x3a5   : > { %1687 = vmatpush3.bf16.msra.mxu1 %v1739_v15 }
 0x423   : > { %v812_v37 = vpop.f32.mrf.mxu1 }
 0x425   : > { %v1638_v38 = vpop.f32.mrf.mxu1 }
 0x427   : > { %v815_v39 = vpop.f32.mrf.mxu1 }
 0x429   : > { %v1639_v41 = vpop.f32.mrf.mxu1 }
 0x42b   : > { %v923_v42 = vpop.f32.mrf.mxu1 }
 0x42c   : > { %1150 = vrot.lane.b32.xlu0 %v923_v42, %s1807_s0 }
 0x42d   : > { %v1650_v43 = vpop.f32.mrf.mxu1 }
 0x42f   : > { %v926_v44 = vpop.f32.mrf.mxu1 }
 0x431   : > { %v1651_v45 = vpop.f32.mrf.mxu1 }
 0x433   : > { %v1033_v46 = vpop.f32.mrf.mxu1 }
 0x434   : > { %1154 = vrot.lane.b32.xlu1 %v1033_v46, %s1808_s17 }
 0x435   : > { %v1662_v47 = vpop.f32.mrf.mxu1 }
 0x437   : > { %v1036_v48 = vpop.f32.mrf.mxu1 }
 0x439   : > { %v1663_v49 = vpop.f32.mrf.mxu1 }
 0x460   : > { %v1143_v51 = vpop.f32.mrf.mxu1 }
 0x461   : > { %1158 = vrot.lane.b32.xlu0 %v1143_v51, %s1809_s20 }
 0x462   : > { %v1674_v52 = vpop.f32.mrf.mxu1 }
 0x464   : > { %v1146_v53 = vpop.f32.mrf.mxu1 }
 0x466   : > { %v1675_v54 = vpop.f32.mrf.mxu1 }
 0x49e   : > { %v1151_v55 = vpop.permute.xlu0 %1150 }
 0x49f   : > { %v1161_v57 = vsel %vm712_vm2, %v812_v37, %v1151_v55 }
 0x4a6   : > { %v1155_v56 = vpop.permute.xlu1 %1154 }
 0x4a7   : > { %v1163_v58 = vsel %vm1162_vm4, %v1161_v57, %v1155_v56 }
 0x4d3   : > { %v1159_v59 = vpop.permute.xlu0 %1158 }
 0x4d4   : > { %v1165_v60 = vsel %vm1164_vm5, %v1163_v58, %v1159_v59 }
 0x4d5   : > { %v1166_v61 = vpack.c.bf16 %v1165_v60, %v1165_v60 }
 0x4d7   : > { %1681 = vmatmul.mubr.msk.bf16.vlgmr.msra.gmra.mxu0 %vm596_vm1, %v1166_v61 }
 0x4d8   : > { %1696 = vmatprep.mubr.msk.bf16.mxu0 %vm1799_vm0, %v1798_v0 }
 0x597   : > { %v1227_v63 = vpop.f32.mrf.mxu0 }
 0x598   : > { %v1228_v1 = vadd.f32 %v1565_v62, %v1227_v63 }
 0x599   : > { %v1682_v2 = vpop.f32.mrf.mxu0 }
 0x59a   : > { %v1233_v5 = vadd.f32 %v1228_v1, %v1947_v3  ;;  %v1738_v3 = vld [vmem:[%s2106_s12 + $0x8] sm:$0xff]  }
 0x59b   : > { %v1230_v6 = vpop.f32.mrf.mxu0  ;;  %1693 = vmatpush3.bf16.msra.mxu0 %v1738_v3 }
 0x59c   : > { %v1234_v7 = vsel %vm596_vm1, %v1233_v5, 0.0  ;;  %1694 = vmatprep.subr.bf16.mxu0 %v1798_v0 }
 0x59d   : > { %1235 = vadd.xlane.f32.xlu1 %v1234_v7  ;;  %v1683_v8 = vpop.f32.mrf.mxu0 }
 0x59f   : > { %1695 = vmatpush3.bf16.msra.mxu0 %v1740_v16 }
 0x626   : > { %v1236_v9 = vpop.xlane.xlu1 %1235 }
 0x627   : > { %v1238_v10 = vmul.f32 0.03125, %v1236_v9 }
 0x629   : > { %v1239_v11 = vsub.f32 %v1233_v5, %v1238_v10 }
 0x62b   : > { %v1240_v12 = vmul.f32 %v1239_v11, %v1239_v11 }
 0x62d   : > { %v1241_v13 = vsel %vm596_vm1, %v1240_v12, 0.0 }
 0x62e   : > { %1242 = vadd.xlane.f32.xlu0 %v1241_v13 }
 0x6b7   : > { %v1243_v17 = vpop.xlane.xlu0 %1242 }
 0x6b8   : > { %v1244_v18 = vmul.f32 0.03125, %v1243_v17 }
 0x6ba   : > { %v1245_v19 = vadd.f32 1e-05, %v1244_v18 }
 0x6bc   : > { %1757 = vrsqrt.f32 %v1245_v19 }
 0x6c9   : > { %v1758_v20 = vpop.eup %1757 }
 0x6ca   : > { %v1247_v22 = vmul.f32 %v1758_v20, %v1239_v11 }
 0x6cc   : > { %v1255_v24 = vmul.f32 %v1569_v21, %v1247_v22 }
 0x6ce   : > { %v1263_v0 = vadd.f32 %v1570_v23, %v1255_v24 }
 0x6d0   : > { %1264 = vst.msk [vmem:[%s559_s26] sm:$0xff] %vm596_vm1, %v1263_v0  ;;  %v1265_v25 = vadd.f32 %v1263_v0, %v1949_v4 }
 0x6d2   : > { %v1266_v26 = vpack.c.bf16 %v1265_v25, %v1265_v25 }
 0x6d4   : > { %1689 = vmatmul.mubr.msk.bf16.vlgmr.msra.gmra.mxu1 %vm596_vm1, %v1266_v26  ;;  %1697 = vmatmul.mubr.msk.bf16.vlgmr.msra.gmra.mxu0 %vm596_vm1, %v1266_v26 }
 0x794   : > { %v1327_v29 = vpop.f32.mrf.mxu1  ;;  %v1391_v4 = vpop.f32.mrf.mxu0 }
 0x795   : > { %v1328_v30 = vadd.f32 %v1571_v27, %v1327_v29  ;;  %v1392_v31 = vadd.f32 %v1575_v28, %v1391_v4 }
 0x796   : > { %v1690_v32 = vpop.f32.mrf.mxu1  ;;  %v1698_v33 = vpop.f32.mrf.mxu0 }
 0x797   : > { %1333 = vst.msk [vmem:[%s563_s18] sm:$0xff] %vm596_vm1, %v1328_v30 }
 0x798   : > { %1397 = vst.msk [vmem:[%s567_s23] sm:$0xff] %vm1162_vm4, %v1392_v31  ;;  %v1330_v34 = vpop.f32.mrf.mxu1  ;;  %v1394_v35 = vpop.f32.mrf.mxu0 }
 0x79a   : > { %v1691_v36 = vpop.f32.mrf.mxu1  ;;  %v1699_v37 = vpop.f32.mrf.mxu0 }
 0x79b PF: > { %s28_s21 = sadd.s32 1, %s1795_s21  }
 0x79c   : > { %p25_p1 = scmp.ge.s32.totalorder %s28_s21, 4  }
 0x79e   :  { %27 = sbr.rel (!%p25_p1) target bundleno = 3 (0x3), region = 138 }
 0x7a3   :  { %1445 = vsyncpa [#allocation3], 1 }
 0x7a4   :  { %1447 = vsyncpa [#allocation3 + $0x1], 1 }

// kernel: decoder_forward.8
= control target key start
LH: loop header
LB: loop body
LE: loop exit
PB: predicated region body
PF: predicated region fallthrough
CT: control target
= control target key end

     0   :  { %s1498_s29 = smov 0   ;;  %s1698_s0 = inlined_call_operand.vmem [shape: bf16[16,4,32], index: 0, kind: input, shape index: {}]   ;;  %s1699_s1 = inlined_call_operand.vmem [shape: f32[16,4,4], index: 1, kind: input, shape index: {}]   ;;  %s1700_s2 = inlined_call_operand.vmem [shape: f32[4,32], index: 2, kind: input, shape index: {}]   ;;  %s1701_s3 = inlined_call_operand.vmem [shape: bf16[32,32], index: 3, kind: input, shape index: {}]   ;;  %s1702_s4 = inlined_call_operand.vmem [shape: f32[1,32], index: 4, kind: input, shape index: {}]   ;;  %s1703_s5 = inlined_call_operand.vmem [shape: f32[16,32], index: 5, kind: input, shape index: {}]   ;;  %s1704_s6 = inlined_call_operand.vmem [shape: f32[1,32], index: 6, kind: input, shape index: {}]   ;;  %s1705_s7 = inlined_call_operand.vmem [shape: f32[1,32], index: 7, kind: input, shape index: {}]   ;;  %s1706_s8 = inlined_call_operand.vmem [shape: bf16[32,64], index: 8, kind: input, shape index: {}]   ;;  %s1707_s9 = inlined_call_operand.vmem [shape: f32[1,64], index: 9, kind: input, shape index: {}]   ;;  %s1708_s10 = inlined_call_operand.vmem [shape: bf16[64,32], index: 10, kind: input, shape index: {}]   ;;  %s1709_s11 = inlined_call_operand.vmem [shape: f32[1,32], index: 11, kind: input, shape index: {}]   ;;  %s1710_s12 = inlined_call_operand.vmem [shape: f32[1,32], index: 12, kind: input, shape index: {}]   ;;  %s1711_s13 = inlined_call_operand.vmem [shape: f32[1,32], index: 13, kind: input, shape index: {}]   ;;  %s1712_s14 = inlined_call_operand.vmem [shape: f32[16,32], index: 14, kind: output, shape index: {}]  }
   0x1 LB: > { %s1504_s30 = sadd.s32 4294967295, %s1419_s29   ;;  %p1275_p0 = scmp.ge.s32.totalorder %s1419_s29, 1  ;;  %s1419_s29 = sphi %s1498_s29, %s24_s29  }
   0x2   : > { %p433_p1 = scmp.lt.s32.totalorder %s1419_s29, 3 }
   0x4   : > { %p434_p2 = pnand %p1275_p0, %p433_p1 }
   0x5   : > { %s1276_s17 = sshll.u32 (!%p434_p2), %s1504_s30, 3  ;;  %p499_p4 = scmp.lt.s32.totalorder (!%p434_p2), %s1504_s30, 1 }
   0x6   : > { %437 = sbr.rel (%p434_p2) target bundleno = 1520 (0x5f0), region = 76  ;;  %p488_p3 = scmp.lt.s32.totalorder (!%p434_p2), %s1276_s17, 15 }
   0xb   : > { %v669_v0 = vld [vmem:[%s1700_s2] sm:$0xf]  ;;  %vm691_vm0 = vcmask 1043456   ;;  %s1714_s17 = smov (!%p488_p3, %s1276_s17), 15  ;;  %vm516_vm1 = vcmask 27648   ;;  %vm682_vm2 = vcmask 31744  }
   0xc   : > { %1323 = vmatprep.subr.msk.mxu0 %vm691_vm0, %v669_v0  ;;  %s1279_s18 = sshll.u32 %s1714_s17, 2  ;;  %vm1422_vm3 = vmmov 0   ;;  %s1277_s26 = sshll.u32 %s1714_s17, 1  ;;  %vm816_vm4 = vcmask 257024   ;;  %vm908_vm5 = vcmask 1041409   ;;  %vm910_vm6 = vcmask 1042434  }
   0xd   : > { %1324 = vmatpush3.msk.msra.mxu0 %vm691_vm0, %v669_v0  ;;  %s497_s21 = scalar_lea.vmem %s1699_s1, %s1279_s18  ;;  %s491_s15 = scalar_lea.vmem %s1698_s0, %s1277_s26  ;;  %vm912_vm7 = vcmask 1043459   ;;  %vm914_vm8 = vcmask 1044484   ;;  %vm916_vm9 = vcmask 1045509   ;;  %vm918_vm10 = vcmask 1046534  }
   0xe   : > { %v1518_v1 = vld [vmem:[%s497_s21] sm:$0xf]  ;;  %v1520_v2 = vld [vmem:[%s497_s21 + $0x4] sm:$0xf]  ;;  %v1522_v3 = vld [vmem:[%s497_s21 + $0x8] sm:$0xf] }
   0xf   : > { %v517_v4 = vsel %vm516_vm1, %v1518_v1, -inf  ;;  %v524_v5 = vsel %vm516_vm1, %v1520_v2, -inf  ;;  %v1528_v6 = vld [vmem:[%s497_s21 + $0xc] sm:$0xf]  ;;  %v531_v7 = vsel %vm516_vm1, %v1522_v3, -inf  ;;  %vm920_vm11 = vcmask 1047559  }
  0x10   : > { %v518_v8 = vrot.slane %v517_v4, 4  ;;  %v525_v9 = vrot.slane %v524_v5, 4  ;;  %v532_v10 = vrot.slane %v531_v7, 4  ;;  %v538_v11 = vsel %vm516_vm1, %v1528_v6, -inf  ;;  %v1534_v12 = vld [vmem:[%s497_s21 + $0x10] sm:$0xf] }
  0x11   : > { %v539_v13 = vrot.slane %v538_v11, 4  ;;  %v1536_v14 = vld [vmem:[%s497_s21 + $0x14] sm:$0xf]  ;;  %v545_v15 = vsel %vm516_vm1, %v1534_v12, -inf  ;;  %v1540_v16 = vld [vmem:[%s497_s21 + $0x18] sm:$0xf] }
  0x12   : > { %v519_v17 = vmax.f32 %v517_v4, %v518_v8  ;;  %v526_v18 = vmax.f32 %v524_v5, %v525_v9  ;;  %v533_v19 = vmax.f32 %v531_v7, %v532_v10  ;;  %v546_v20 = vrot.slane %v545_v15, 4  ;;  %v1542_v21 = vld [vmem:[%s497_s21 + $0x1c] sm:$0xf]  ;;  %s1716_s30 = smov (!%p499_p4, %s1504_s30), 1 }
  0x13   : > { %v540_v22 = vmax.f32 %v538_v11, %v539_v13  ;;  %v552_v23 = vsel %vm516_vm1, %v1536_v14, -inf  ;;  %v559_v24 = vsel %vm516_vm1, %v1540_v16, -inf  ;;  %v566_v25 = vsel %vm516_vm1, %v1542_v21, -inf  ;;  %s1280_s16 = sshll.u32 %s1716_s30, 3 }
  0x14   : > { %v520_v26 = vrot.slane %v519_v17, 2  ;;  %v527_v27 = vrot.slane %v526_v18, 2  ;;  %v534_v28 = vrot.slane %v533_v19, 2  ;;  %v547_v29 = vmax.f32 %v545_v15, %v546_v20  ;;  %s502_s19 = scalar_lea.vmem %s1703_s5, %s1280_s16  ;;  %s506_s22 = scalar_lea.vmem %s1712_s14, %s1280_s16 }
  0x15   : > { %v541_v30 = vrot.slane %v540_v22, 2  ;;  %v553_v31 = vrot.slane %v552_v23, 4  ;;  %v560_v32 = vrot.slane %v559_v24, 4  ;;  %v567_v33 = vrot.slane %v566_v25, 4 }
  0x16   : > { %v521_v34 = vmax.f32 %v519_v17, %v520_v26  ;;  %v528_v35 = vmax.f32 %v526_v18, %v527_v27  ;;  %v535_v36 = vmax.f32 %v533_v19, %v534_v28  ;;  %v548_v37 = vrot.slane %v547_v29, 2 }
  0x17   : > { %v542_v38 = vmax.f32 %v540_v22, %v541_v30  ;;  %v554_v39 = vmax.f32 %v552_v23, %v553_v31  ;;  %v561_v40 = vmax.f32 %v559_v24, %v560_v32  ;;  %v568_v41 = vmax.f32 %v566_v25, %v567_v33 }
  0x18   : > { %v522_v42 = vrot.slane %v521_v34, 1  ;;  %v529_v43 = vrot.slane %v528_v35, 1  ;;  %v536_v44 = vrot.slane %v535_v36, 1  ;;  %v549_v45 = vmax.f32 %v547_v29, %v548_v37 }
  0x19   : > { %v543_v46 = vrot.slane %v542_v38, 1  ;;  %v555_v47 = vrot.slane %v554_v39, 2  ;;  %v562_v48 = vrot.slane %v561_v40, 2  ;;  %v569_v49 = vrot.slane %v568_v41, 2 }
  0x1a   : > { %v523_v50 = vmax.f32 %v521_v34, %v522_v42  ;;  %v530_v51 = vmax.f32 %v528_v35, %v529_v43  ;;  %v537_v52 = vmax.f32 %v535_v36, %v536_v44  ;;  %v550_v53 = vrot.slane %v549_v45, 1 }
  0x1b   : > { %v544_v54 = vmax.f32 %v542_v38, %v543_v46  ;;  %v556_v55 = vmax.f32 %v554_v39, %v555_v47  ;;  %v563_v56 = vmax.f32 %v561_v40, %v562_v48  ;;  %v570_v57 = vmax.f32 %v568_v41, %v569_v49 }
  0x1c   : > { %v573_v58 = vsub.f32 %v1518_v1, %v523_v50  ;;  %v574_v59 = vsub.f32 %v1520_v2, %v530_v51  ;;  %v575_v60 = vsub.f32 %v1522_v3, %v537_v52  ;;  %v551_v61 = vmax.f32 %v549_v45, %v550_v53 }
  0x1d   : > { %v576_v62 = vsub.f32 %v1528_v6, %v544_v54  ;;  %v557_v63 = vrot.slane %v556_v55, 1  ;;  %v564_v0 = vrot.slane %v563_v56, 1  ;;  %v571_v4 = vrot.slane %v570_v57, 1 }
  0x1e   : > { %v581_v5 = vmul.f32 1.442695, %v573_v58  ;;  %v583_v7 = vmul.f32 1.442695, %v574_v59  ;;  %v585_v8 = vmul.f32 1.442695, %v575_v60  ;;  %v577_v9 = vsub.f32 %v1534_v12, %v551_v61 }
  0x1f   : > { %v587_v10 = vmul.f32 1.442695, %v576_v62  ;;  %v558_v11 = vmax.f32 %v556_v55, %v557_v63  ;;  %v565_v13 = vmax.f32 %v563_v56, %v564_v0  ;;  %v572_v15 = vmax.f32 %v570_v57, %v571_v4 }
  0x20   : > { %1377 = vpow2.f32 %v581_v5  ;;  %v589_v1 = vmul.f32 1.442695, %v577_v9  ;;  %vm935_vm12 = vcmask 261120   ;;  %vm1119_vm13 = vcmask 523264  }
  0x21   : > { %1379 = vpow2.f32 %v583_v7  ;;  %v578_v2 = vsub.f32 %v1536_v14, %v558_v11  ;;  %v579_v3 = vsub.f32 %v1540_v16, %v565_v13  ;;  %v580_v6 = vsub.f32 %v1542_v21, %v572_v15 }
  0x22   : > { %1381 = vpow2.f32 %v585_v8 }
  0x23   : > { %1383 = vpow2.f32 %v587_v10  ;;  %v591_v17 = vmul.f32 1.442695, %v578_v2  ;;  %v593_v18 = vmul.f32 1.442695, %v579_v3  ;;  %v595_v19 = vmul.f32 1.442695, %v580_v6 }
  0x24   : > { %1385 = vpow2.f32 %v589_v1 }
  0x25   : > { %1387 = vpow2.f32 %v591_v17 }
  0x26   : > { %1389 = vpow2.f32 %v593_v18 }
  0x27   : > { %1391 = vpow2.f32 %v595_v19 }
  0x2d   : > { %v1558_v12 = vpop.eup %1377 }
  0x2e   : > { %v1560_v20 = vpop.eup %1379  ;;  %v597_v14 = vsel %vm516_vm1, %v1558_v12, 0.0 }
  0x2f   : > { %v1564_v22 = vpop.eup %1381  ;;  %v598_v16 = vrot.slane %v597_v14, 4  ;;  %v604_v21 = vsel %vm516_vm1, %v1560_v20, 0.0 }
  0x30   : > { %v1568_v23 = vpop.eup %1383  ;;  %v605_v24 = vrot.slane %v604_v21, 4  ;;  %v611_v25 = vsel %vm516_vm1, %v1564_v22, 0.0 }
  0x31   : > { %v1572_v26 = vpop.eup %1385  ;;  %v599_v27 = vadd.f32 %v598_v16, %v597_v14  ;;  %v612_v28 = vrot.slane %v611_v25, 4  ;;  %v618_v29 = vsel %vm516_vm1, %v1568_v23, 0.0 }
  0x32   : > { %v1576_v30 = vpop.eup %1387  ;;  %v606_v31 = vadd.f32 %v605_v24, %v604_v21  ;;  %v619_v32 = vrot.slane %v618_v29, 4  ;;  %v625_v33 = vsel %vm516_vm1, %v1572_v26, 0.0 }
  0x33   : > { %v1580_v34 = vpop.eup %1389  ;;  %v600_v35 = vrot.slane %v599_v27, 2  ;;  %v613_v36 = vadd.f32 %v612_v28, %v611_v25  ;;  %v626_v37 = vrot.slane %v625_v33, 4  ;;  %v632_v38 = vsel %vm516_vm1, %v1576_v30, 0.0 }
  0x34   : > { %v1584_v39 = vpop.eup %1391  ;;  %v607_v40 = vrot.slane %v606_v31, 2  ;;  %v620_v41 = vadd.f32 %v619_v32, %v618_v29  ;;  %v633_v42 = vrot.slane %v632_v38, 4  ;;  %v639_v43 = vsel %vm516_vm1, %v1580_v34, 0.0 }
  0x35   : > { %v601_v44 = vadd.f32 %v600_v35, %v599_v27  ;;  %v614_v45 = vrot.slane %v613_v36, 2  ;;  %v627_v46 = vadd.f32 %v626_v37, %v625_v33  ;;  %v640_v47 = vrot.slane %v639_v43, 4 }
  0x36   : > { %v608_v48 = vadd.f32 %v607_v40, %v606_v31  ;;  %v621_v49 = vrot.slane %v620_v41, 2  ;;  %v634_v50 = vadd.f32 %v633_v42, %v632_v38  ;;  %v646_v51 = vsel %vm516_vm1, %v1584_v39, 0.0  ;;  %v792_v42 = vld [vmem:[%s491_s15] sm:$0x3] }
  0x37   : > { %v602_v52 = vrot.slane %v601_v44, 1  ;;  %v615_v53 = vadd.f32 %v614_v45, %v613_v36  ;;  %v628_v54 = vrot.slane %v627_v46, 2  ;;  %v641_v55 = vadd.f32 %v640_v47, %v639_v43  ;;  %v798_v47 = vld [vmem:[%s491_s15 + $0xc] sm:$0x3] }
  0x38   : > { %v609_v56 = vrot.slane %v608_v48, 1  ;;  %v622_v57 = vadd.f32 %v621_v49, %v620_v41  ;;  %v635_v58 = vrot.slane %v634_v50, 2  ;;  %v647_v59 = vrot.slane %v646_v51, 4 }
  0x39   : > { %v603_v60 = vadd.f32 %v602_v52, %v601_v44  ;;  %v616_v61 = vrot.slane %v615_v53, 1  ;;  %v629_v62 = vadd.f32 %v628_v54, %v627_v46  ;;  %v642_v63 = vrot.slane %v641_v55, 2  ;;  %v793_v44 = vld [vmem:[%s491_s15 + $0x2] sm:$0x3]  ;;  %v799_v52 = vld [vmem:[%s491_s15 + $0xe] sm:$0x3] }
  0x3a   : > { %v610_v0 = vadd.f32 %v609_v56, %v608_v48  ;;  %v623_v4 = vrot.slane %v622_v57, 1  ;;  %v636_v5 = vadd.f32 %v635_v58, %v634_v50  ;;  %v648_v7 = vadd.f32 %v647_v59, %v646_v51 }
  0x3b   : > { %1393 = vrcp.f32 %v603_v60  ;;  %v617_v8 = vadd.f32 %v616_v61, %v615_v53  ;;  %v630_v9 = vrot.slane %v629_v62, 1  ;;  %v643_v10 = vadd.f32 %v642_v63, %v641_v55  ;;  %v796_v55 = vld [vmem:[%s491_s15 + $0x8] sm:$0x3] }
  0x3c   : > { %1395 = vrcp.f32 %v610_v0  ;;  %v624_v11 = vadd.f32 %v623_v4, %v622_v57  ;;  %v637_v13 = vrot.slane %v636_v5, 1  ;;  %v649_v15 = vrot.slane %v648_v7, 2 }
  0x3d   : > { %1397 = vrcp.f32 %v617_v8  ;;  %v631_v1 = vadd.f32 %v630_v9, %v629_v62  ;;  %v644_v2 = vrot.slane %v643_v10, 1  ;;  %v1421_v41 = vmov 0.0   ;;  %v797_v62 = vld [vmem:[%s491_s15 + $0xa] sm:$0x3] }
  0x3e   : > { %1399 = vrcp.f32 %v624_v11  ;;  %v638_v3 = vadd.f32 %v637_v13, %v636_v5  ;;  %v650_v6 = vadd.f32 %v649_v15, %v648_v7  ;;  %1331 = vmatprep.subr.bf16.mxu0 %v1421_v41  ;;  %1347 = vmatprep.subr.bf16.mxu1 %v1421_v41  ;;  %v800_v46 = vunpack.c.l.bf16 %v792_v42 }
  0x3f   : > { %1401 = vrcp.f32 %v631_v1  ;;  %v645_v17 = vadd.f32 %v644_v2, %v643_v10  ;;  %1355 = vmatprep.mubr.msk.bf16.mxu1 %vm1422_vm3, %v1421_v41  ;;  %v801_v51 = vunpack.c.l.bf16 %v793_v44  ;;  %v806_v54 = vunpack.c.l.bf16 %v798_v47 }
  0x40   : > { %1403 = vrcp.f32 %v638_v3  ;;  %v651_v18 = vrot.slane %v650_v6, 1  ;;  %v807_v61 = vunpack.c.l.bf16 %v799_v52  ;;  %v804_v5 = vunpack.c.l.bf16 %v796_v55 }
  0x41   : > { %1405 = vrcp.f32 %v645_v17  ;;  %v805_v1 = vunpack.c.l.bf16 %v797_v62 }
  0x42   : > { %v652_v19 = vadd.f32 %v651_v18, %v650_v6 }
  0x44   : > { %1407 = vrcp.f32 %v652_v19 }
  0x48   : > { %v1394_v14 = vpop.eup %1393 }
  0x49   : > { %v1396_v16 = vpop.eup %1395  ;;  %v661_v21 = vmul.f32 %v1394_v14, %v1558_v12 }
  0x4a   : > { %v1398_v24 = vpop.eup %1397  ;;  %v662_v25 = vmul.f32 %v1396_v16, %v1560_v20 }
  0x4b   : > { %v1400_v27 = vpop.eup %1399  ;;  %v663_v28 = vmul.f32 %v1398_v24, %v1564_v22 }
  0x4c   : > { %v1402_v29 = vpop.eup %1401  ;;  %v678_v31 = vcombine.low %v661_v21, %v662_v25  ;;  %v664_v32 = vmul.f32 %v1400_v27, %v1568_v23 }
  0x4d   : > { %v1404_v33 = vpop.eup %1403  ;;  %v665_v35 = vmul.f32 %v1402_v29, %v1572_v26  ;;  %v1369_v26 = vld [vmem:[%s1701_s3 + $0x8] sm:$0xff]  }
  0x4e   : > { %v1406_v36 = vpop.eup %1405  ;;  %1325 = vmatprep.mubr.msk.f32.mxu0 %vm682_vm2, %v678_v31  ;;  %v679_v37 = vcombine.low %v663_v28, %v664_v32  ;;  %v666_v12 = vmul.f32 %v1404_v33, %v1576_v30  ;;  %v1370_v30 = vld [vmem:[%s1701_s3] sm:$0xff]  }
  0x4f   : > { %v667_v38 = vmul.f32 %v1406_v36, %v1580_v34  ;;  %v794_v34 = vld [vmem:[%s491_s15 + $0x4] sm:$0x3] }
  0x50   : > { %1326 = vmatmul.mubr.msk.f32.vlgmr.msra.gmra.mxu0 %vm682_vm2, %v679_v37  ;;  %v680_v20 = vcombine.low %v665_v35, %v666_v12  ;;  %v802_v43 = vunpack.c.l.bf16 %v794_v34 }
  0x51   : > { %v1408_v40 = vpop.eup %1407  ;;  %1332 = vmatpush3.bf16.msra.mxu0 %v1369_v26 }
  0x52   : > { %1328 = vmatprep.mubr.msk.f32.mxu0 %vm682_vm2, %v680_v20  ;;  %v668_v22 = vmul.f32 %v1408_v40, %v1584_v39  ;;  %1333 = vmatprep.subr.bf16.mxu0 %v1421_v41  ;;  %v795_v39 = vld [vmem:[%s491_s15 + $0x6] sm:$0x3] }
  0x53   : > { %v803_v45 = vunpack.c.l.bf16 %v795_v39 }
  0x54   : > { %v681_v23 = vcombine.low %v667_v38, %v668_v22 }
  0x55   : > { %1334 = vmatpush3.bf16.msra.mxu0 %v1370_v30 }
  0x56   : > { %1329 = vmatmul.mubr.msk.f32.gmra.mxu0 %vm682_vm2, %v681_v23  ;;  %1339 = vmatprep.subr.bf16.mxu0 %v1421_v41 }
  0x57   : > { %1335 = vmatprep.mubr.msk.bf16.mxu0 %vm1422_vm3, %v1421_v41 }
 0x110   : > { %v1327_v48 = vpop.f32.mrf.mxu0 }
 0x111   : > { %v785_v49 = vcombine.high %v1327_v48, %v1327_v48  ;;  %v810_v50 = vmul.f32 %v1327_v48, %v802_v43 }
 0x112   : > { %v761_v53 = vpop.f32.mrf.mxu0 }
 0x113   : > { %v811_v56 = vmul.f32 %v803_v45, %v785_v49  ;;  %v831_v57 = vsel %vm816_vm4, %v810_v50, 0.0  ;;  %v784_v58 = vcombine.high %v761_v53, %v761_v53  ;;  %v808_v59 = vmul.f32 %v800_v46, %v761_v53 }
 0x114   : > { %v832_v60 = vrot.slane %v831_v57, 4 }
 0x115   : > { %v838_v63 = vsel %vm816_vm4, %v811_v56, 0.0  ;;  %v809_v0 = vmul.f32 %v801_v51, %v784_v58  ;;  %v817_v4 = vsel %vm816_vm4, %v808_v59, 0.0 }
 0x116   : > { %v833_v7 = vadd.f32 %v832_v60, %v831_v57  ;;  %v839_v8 = vrot.slane %v838_v63, 4  ;;  %v818_v9 = vrot.slane %v817_v4, 4  ;;  %v1330_v10 = vpop.f32.mrf.mxu0 }
 0x117   : > { %v824_v11 = vsel %vm816_vm4, %v809_v0, 0.0  ;;  %v787_v13 = vcombine.high %v1330_v10, %v1330_v10  ;;  %v814_v15 = vmul.f32 %v1330_v10, %v806_v54 }
 0x118   : > { %v834_v2 = vrot.slane %v833_v7, 2  ;;  %v840_v3 = vadd.f32 %v839_v8, %v838_v63  ;;  %v819_v6 = vadd.f32 %v818_v9, %v817_v4  ;;  %v825_v17 = vrot.slane %v824_v11, 4  ;;  %v771_v18 = vpop.f32.mrf.mxu0 }
 0x119   : > { %v815_v19 = vmul.f32 %v807_v61, %v787_v13  ;;  %v859_v14 = vsel %vm816_vm4, %v814_v15, 0.0  ;;  %v786_v16 = vcombine.high %v771_v18, %v771_v18  ;;  %v812_v21 = vmul.f32 %v804_v5, %v771_v18 }
 0x11a   : > { %v835_v24 = vadd.f32 %v834_v2, %v833_v7  ;;  %v841_v25 = vrot.slane %v840_v3, 2  ;;  %v820_v27 = vrot.slane %v819_v6, 2  ;;  %v826_v28 = vadd.f32 %v825_v17, %v824_v11 }
 0x11b   : > { %v860_v29 = vrot.slane %v859_v14, 4  ;;  %v866_v31 = vsel %vm816_vm4, %v815_v19, 0.0  ;;  %v813_v32 = vmul.f32 %v805_v1, %v786_v16  ;;  %v845_v33 = vsel %vm816_vm4, %v812_v21, 0.0 }
 0x11c   : > { %v836_v35 = vrot.slane %v835_v24, 1  ;;  %v842_v36 = vadd.f32 %v841_v25, %v840_v3  ;;  %v821_v37 = vadd.f32 %v820_v27, %v819_v6  ;;  %v827_v12 = vrot.slane %v826_v28, 2 }
 0x11d   : > { %v861_v20 = vadd.f32 %v860_v29, %v859_v14  ;;  %v867_v38 = vrot.slane %v866_v31, 4  ;;  %v846_v40 = vrot.slane %v845_v33, 4  ;;  %v852_v22 = vsel %vm816_vm4, %v813_v32, 0.0 }
 0x11e   : > { %v837_v23 = vadd.f32 %v836_v35, %v835_v24  ;;  %v843_v26 = vrot.slane %v842_v36, 1  ;;  %v822_v30 = vrot.slane %v821_v37, 1  ;;  %v828_v34 = vadd.f32 %v827_v12, %v826_v28 }
 0x11f   : > { %v862_v39 = vrot.slane %v861_v20, 2  ;;  %v868_v42 = vadd.f32 %v867_v38, %v866_v31  ;;  %v847_v43 = vadd.f32 %v846_v40, %v845_v33  ;;  %v853_v44 = vrot.slane %v852_v22, 4  ;;  %v1287_v31 = vld [vmem:[%s1702_s4] ss:$0 sm:$0xff] }
 0x120   : > { %v844_v45 = vadd.f32 %v843_v26, %v842_v36  ;;  %v823_v46 = vadd.f32 %v822_v30, %v821_v37  ;;  %v829_v47 = vrot.slane %v828_v34, 1  ;;  %v875_v52 = vpack.c.bf16 %v837_v23, %v837_v23  ;;  %v979_v33 = vld [vmem:[%s502_s19] sm:$0xff] }
 0x121   : > { %v863_v48 = vadd.f32 %v862_v39, %v861_v20  ;;  %v869_v49 = vrot.slane %v868_v42, 2  ;;  %v848_v50 = vrot.slane %v847_v43, 2  ;;  %v854_v51 = vadd.f32 %v853_v44, %v852_v22  ;;  %v1372_v39 = vld [vmem:[%s1706_s8] sm:$0xff]  }
 0x122   : > { %v830_v53 = vadd.f32 %v829_v47, %v828_v34  ;;  %v873_v54 = vpack.c.bf16 %v823_v46, %v823_v46  ;;  %v876_v60 = vpack.c.bf16 %v844_v45, %v844_v45  ;;  %v902_v7 = vunpack.c.l.b16 %v875_v52  ;;  %v1371_v34 = vld [vmem:[%s1706_s8 + $0x8] sm:$0xff]  }
 0x123   : > { %v864_v55 = vrot.slane %v863_v48, 1  ;;  %v870_v56 = vadd.f32 %v869_v49, %v868_v42  ;;  %v849_v57 = vadd.f32 %v848_v50, %v847_v43  ;;  %v855_v58 = vrot.slane %v854_v51, 2  ;;  %v1373_v42 = vld [vmem:[%s1708_s10 + $0x18] sm:$0xff]   ;;  %v1374_v43 = vld [vmem:[%s1708_s10 + $0x10] sm:$0xff]   ;;  %v1292_v50 = vld [vmem:[%s1705_s7] ss:$0 sm:$0xff] }
 0x124   : > { %v874_v59 = vpack.c.bf16 %v830_v53, %v830_v53  ;;  %v900_v0 = vunpack.c.l.b16 %v873_v54  ;;  %v903_v13 = vunpack.c.l.b16 %v876_v60  ;;  %1348 = vmatpush3.bf16.msra.mxu1 %v1373_v42  ;;  %v1375_v54 = vld [vmem:[%s1708_s10 + $0x8] sm:$0xff]  }
 0x125   : > { %v871_v61 = vrot.slane %v870_v56, 1  ;;  %v850_v62 = vrot.slane %v849_v57, 1  ;;  %v856_v63 = vadd.f32 %v855_v58, %v854_v51  ;;  %v865_v5 = vadd.f32 %v864_v55, %v863_v48  ;;  %1349 = vmatprep.subr.bf16.mxu1 %v1421_v41  ;;  %v1291_v48 = vld [vmem:[%s1704_s6] ss:$0 sm:$0xff] }
 0x126   : > { %v901_v4 = vunpack.c.l.b16 %v874_v59  ;;  %v1376_v55 = vld [vmem:[%s1708_s10] sm:$0xff]  }
 0x127   : > { %v872_v8 = vadd.f32 %v871_v61, %v870_v56  ;;  %v851_v9 = vadd.f32 %v850_v62, %v849_v57  ;;  %v857_v10 = vrot.slane %v856_v63, 1  ;;  %v879_v2 = vpack.c.bf16 %v865_v5, %v865_v5  ;;  %v1293_v56 = vld [vmem:[%s1707_s9] ss:$0 sm:$0xff] }
 0x128   : > { %v909_v11 = vsel %vm908_vm5, %v901_v4, %v900_v0  ;;  %1350 = vmatpush3.bf16.msra.mxu1 %v1374_v43 }
 0x129   : > { %v911_v15 = vsel %vm910_vm6, %v902_v7, %v909_v11  ;;  %v858_v1 = vadd.f32 %v857_v10, %v856_v63  ;;  %v877_v3 = vpack.c.bf16 %v851_v9, %v851_v9  ;;  %v880_v6 = vpack.c.bf16 %v872_v8, %v872_v8  ;;  %1351 = vmatprep.subr.bf16.mxu1 %v1421_v41 }
 0x12a   : > { %v913_v18 = vsel %vm912_vm7, %v903_v13, %v911_v15  ;;  %v906_v16 = vunpack.c.l.b16 %v879_v2 }
 0x12b   : > { %v878_v17 = vpack.c.bf16 %v858_v1, %v858_v1  ;;  %v904_v19 = vunpack.c.l.b16 %v877_v3  ;;  %v907_v24 = vunpack.c.l.b16 %v880_v6 }
 0x12c   : > { %1352 = vmatpush3.bf16.msra.mxu1 %v1375_v54 }
 0x12d   : > { %v905_v14 = vunpack.c.l.b16 %v878_v17  ;;  %v915_v21 = vsel %vm914_vm8, %v904_v19, %v913_v18  ;;  %1353 = vmatprep.subr.bf16.mxu1 %v1421_v41  ;;  %v1303_v19 = vld [vmem:[%s1710_s12] ss:$0 sm:$0xff] }
 0x12f   : > { %v917_v25 = vsel %vm916_vm9, %v905_v14, %v915_v21 }
 0x130   : > { %v919_v27 = vsel %vm918_vm10, %v906_v16, %v917_v25  ;;  %1354 = vmatpush3.bf16.msra.mxu1 %v1376_v55  ;;  %v1304_v16 = vld [vmem:[%s1711_s13] ss:$0 sm:$0xff] }
 0x131   : > { %v921_v28 = vsel %vm920_vm11, %v907_v24, %v919_v27 }
 0x132   : > { %v922_v29 = vpack.c.b16 %v921_v28, %v921_v28 }
 0x134   : > { %1336 = vmatmul.mubr.msk.bf16.vlgmr.msra.gmra.mxu0 %vm935_vm12, %v922_v29 }
 0x135   : > { %1343 = vmatprep.mubr.msk.bf16.mxu0 %vm1422_vm3, %v1421_v41  ;;  %1340 = vmatpush3.bf16.msra.mxu0 %v1371_v34 }
 0x136   : > { %1341 = vmatprep.subr.bf16.mxu0 %v1421_v41  ;;  %v1297_v41 = vld [vmem:[%s1709_s11] ss:$0 sm:$0xff] }
 0x139   : > { %1342 = vmatpush3.bf16.msra.mxu0 %v1372_v39 }
 0x1f4   : > { %v973_v32 = vpop.f32.mrf.mxu0 }
 0x1f5   : > { %v974_v35 = vadd.f32 %v1287_v31, %v973_v32 }
 0x1f6   : > { %v1337_v36 = vpop.f32.mrf.mxu0 }
 0x1f7   : > { %v980_v37 = vadd.f32 %v979_v33, %v974_v35 }
 0x1f8   : > { %v976_v12 = vpop.f32.mrf.mxu0 }
 0x1f9   : > { %v981_v20 = vsel %vm935_vm12, %v980_v37, 0.0 }
 0x1fa   : > { %982 = vadd.xlane.f32.xlu0 %v981_v20  ;;  %v1338_v38 = vpop.f32.mrf.mxu0 }
 0x283   : > { %v983_v40 = vpop.xlane.xlu0 %982 }
 0x284   : > { %v985_v22 = vmul.f32 0.03125, %v983_v40 }
 0x286   : > { %v986_v23 = vsub.f32 %v980_v37, %v985_v22 }
 0x288   : > { %v987_v26 = vmul.f32 %v986_v23, %v986_v23 }
 0x28a   : > { %v988_v30 = vsel %vm935_vm12, %v987_v26, 0.0 }
 0x28b   : > { %989 = vadd.xlane.f32.xlu0 %v988_v30 }
 0x314   : > { %v990_v44 = vpop.xlane.xlu0 %989 }
 0x315   : > { %v991_v45 = vmul.f32 0.03125, %v990_v44 }
 0x317   : > { %v992_v46 = vadd.f32 1e-05, %v991_v45 }
 0x319   : > { %1409 = vrsqrt.f32 %v992_v46 }
 0x326   : > { %v1410_v47 = vpop.eup %1409 }
 0x327   : > { %v994_v49 = vmul.f32 %v1410_v47, %v986_v23 }
 0x329   : > { %v1002_v51 = vmul.f32 %v1291_v48, %v994_v49 }
 0x32b   : > { %v1010_v52 = vadd.f32 %v1292_v50, %v1002_v51 }
 0x32d   : > { %v1011_v53 = vpack.c.bf16 %v1010_v52, %v1010_v52 }
 0x32f   : > { %1344 = vmatmul.mubr.msk.bf16.vlgmr.msra.gmra.mxu0 %vm935_vm12, %v1011_v53 }
 0x3ef   : > { %v1072_v57 = vpop.f32.mrf.mxu0 }
 0x3f0   : > { %v1073_v58 = vadd.f32 %v1293_v56, %v1072_v57 }
 0x3f1   : > { %v1345_v59 = vpop.f32.mrf.mxu0 }
 0x3f2   : > { %v1078_v60 = vmax.f32 %v1073_v58, 0.0 }
 0x3f3   : > { %v1075_v61 = vpop.f32.mrf.mxu0 }
 0x3f4   : > { %v1079_v62 = vpack.c.bf16 %v1078_v60, %v1078_v60 }
 0x3f5   : > { %v1346_v63 = vpop.f32.mrf.mxu0 }
 0x3f6   : > { %1356 = vmatmul.mubr.msk.bf16.vlgmr.msra.gmra.mxu1 %vm1119_vm13, %v1079_v62 }
 0x4b6   : > { %v1157_v0 = vpop.f32.mrf.mxu1 }
 0x4b7   : > { %v1158_v4 = vadd.f32 %v1297_v41, %v1157_v0 }
 0x4b8   : > { %v1357_v5 = vpop.f32.mrf.mxu1 }
 0x4b9   : > { %v1163_v7 = vadd.f32 %v1158_v4, %v1010_v52 }
 0x4ba   : > { %v1160_v8 = vpop.f32.mrf.mxu1 }
 0x4bb   : > { %v1164_v9 = vsel %vm935_vm12, %v1163_v7, 0.0 }
 0x4bc   : > { %1165 = vadd.xlane.f32.xlu1 %v1164_v9  ;;  %v1358_v10 = vpop.f32.mrf.mxu1 }
 0x545   : > { %v1166_v11 = vpop.xlane.xlu1 %1165 }
 0x546   : > { %v1167_v13 = vmul.f32 0.03125, %v1166_v11 }
 0x548   : > { %v1168_v15 = vsub.f32 %v1163_v7, %v1167_v13 }
 0x54a   : > { %v1169_v1 = vmul.f32 %v1168_v15, %v1168_v15 }
 0x54c   : > { %v1170_v2 = vsel %vm935_vm12, %v1169_v1, 0.0 }
 0x54d   : > { %1171 = vadd.xlane.f32.xlu1 %v1170_v2 }
 0x5d6   : > { %v1172_v3 = vpop.xlane.xlu1 %1171 }
 0x5d7   : > { %v1173_v6 = vmul.f32 0.03125, %v1172_v3 }
 0x5d9   : > { %v1174_v17 = vadd.f32 1e-05, %v1173_v6 }
 0x5db   : > { %1411 = vrsqrt.f32 %v1174_v17 }
 0x5e8   : > { %v1412_v18 = vpop.eup %1411 }
 0x5e9   : > { %v1176_v14 = vmul.f32 %v1412_v18, %v1168_v15 }
 0x5eb   : > { %v1184_v21 = vmul.f32 %v1303_v19, %v1176_v14 }
 0x5ed   : > { %v1192_v24 = vadd.f32 %v1304_v16, %v1184_v21 }
 0x5ef   : > { %1193 = vst.msk [vmem:[%s506_s22] sm:$0xff] %vm935_vm12, %v1192_v24 }
 0x5f0 PF: > { %s24_s29 = sadd.s32 1, %s1419_s29  }
 0x5f1   : > { %p21_p5 = scmp.ge.s32.totalorder %s24_s29, 4  }
 0x5f3   :  { %23 = sbr.rel (!%p21_p5) target bundleno = 1 (0x1), region = 112 }

// kernel: decoder_forward.9
= control target key start
LH: loop header
LB: loop body
LE: loop exit
PB: predicated region body
PF: predicated region fallthrough
CT: control target
= control target key end

     0   :  { %s1826_s21 = smov 0   ;;  %s2006_s0 = inlined_call_operand.vmem [shape: f32[2,8,32], index: 0, kind: input, shape index: {}]   ;;  %s2007_s1 = inlined_call_operand.vmem [shape: f32[2,8,32], index: 1, kind: input, shape index: {}]   ;;  %s2008_s2 = inlined_call_operand.vmem [shape: bf16[32,64], index: 2, kind: input, shape index: {}]   ;;  %s2009_s3 = inlined_call_operand.vmem [shape: f32[1,64], index: 3, kind: input, shape index: {}]   ;;  %s2010_s4 = inlined_call_operand.vmem [shape: bf16[32,32], index: 4, kind: input, shape index: {}]   ;;  %s2011_s5 = inlined_call_operand.vmem [shape: f32[1,32], index: 5, kind: input, shape index: {}]   ;;  %s2012_s6 = inlined_call_operand.vmem [shape: bf16[32,32], index: 6, kind: input, shape index: {}]   ;;  %s2013_s7 = inlined_call_operand.vmem [shape: f32[1,32], index: 7, kind: input, shape index: {}]   ;;  %s2014_s8 = inlined_call_operand.vmem [shape: f32[1,32], index: 8, kind: input, shape index: {}]   ;;  %s2015_s9 = inlined_call_operand.vmem [shape: f32[1,32], index: 9, kind: input, shape index: {}]   ;;  %s2016_s10 = inlined_call_operand.vmem [shape: bf16[32,32], index: 10, kind: input, shape index: {}]   ;;  %s2017_s11 = inlined_call_operand.vmem [shape: f32[1,32], index: 11, kind: input, shape index: {}]   ;;  %s2018_s12 = inlined_call_operand.vmem [shape: bf16[32,16], index: 12, kind: input, shape index: {}]   ;;  %s2019_s13 = inlined_call_operand.vmem [shape: f32[1,16], index: 13, kind: input, shape index: {}]   ;;  %s2020_s14 = inlined_call_operand.vmem [shape: f32[2,8,32], index: 14, kind: output, shape index: {0}]   ;;  %s2021_s15 = inlined_call_operand.vmem [shape: f32[2,8,32], index: 15, kind: output, shape index: {1}]   ;;  %s2022_s16 = inlined_call_operand.vmem [shape: f32[2,8,16], index: 16, kind: output, shape index: {2}]  }
   0x1   :  { %2023 = sst [smem:[#allocation2_spill]] %s2006_s0 }
   0x2 LB: > { %s1512_s22 = sadd.s32 4294967295, %s1727_s21   ;;  %p1516_p0 = scmp.ge.s32.totalorder %s1727_s21, 1  ;;  %s1727_s21 = sphi %s1826_s21, %s27_s21  }
   0x3   : > { %p475_p1 = scmp.lt.s32.totalorder %s1727_s21, 3 }
   0x5   : > { %p476_p2 = pnand %p1516_p0, %p475_p1 }
   0x6   : > { %p535_p3 = scmp.lt.s32.totalorder (!%p476_p2), %s1512_s22, 1  ;;  %s2024_s30 = sld [smem:[#allocation2_spill]] (!%p476_p2) }
   0x7   : > { %479 = sbr.rel (%p476_p2) target bundleno = 1928 (0x788), region = 76  ;;  %s1731_s23 = smov (!%p476_p2), 120  }
   0x8   : > { %s1732_s24 = smov (!%p476_p2), 96   ;;  %s1733_s25 = smov (!%p476_p2), 80  }
   0x9   : > { %s1734_s26 = smov (!%p476_p2), 88   ;;  %s1735_s28 = smov (!%p476_p2), 72  }
   0xa   : > { %s1736_s29 = smov (!%p476_p2), 112  }
   0xc   : > { %v1693_v0 = vld [vmem:[%s2008_s2 + $0x8] sm:$0xff]   ;;  %v1729_v1 = vmov 0.0   ;;  %v1694_v2 = vld [vmem:[%s2008_s2] sm:$0xff]   ;;  %vm1730_vm0 = vmmov 0   ;;  %s2026_s22 = smov (!%p535_p3, %s1512_s22), 1  ;;  %vm583_vm1 = vcmask 261120  }
   0xd   : > { %1585 = vmatprep.subr.bf16.mxu0 %v1729_v1  ;;  %1593 = vmatprep.subr.bf16.mxu1 %v1729_v1  ;;  %s1847_s27 = sshll.u32 %s2026_s22, 3  ;;  %v1522_v7 = vld [vmem:[%s2009_s3] ss:$0 sm:$0xff]  ;;  %v1695_v14 = vld [vmem:[%s2010_s4 + $0x8] sm:$0xff]   ;;  %vm699_vm2 = vcmask 64512   ;;  %vm761_vm3 = vcmask 1043456  }
   0xe   : > { %1586 = vmatpush3.bf16.msra.mxu0 %v1693_v0  ;;  %1589 = vmatprep.mubr.msk.bf16.mxu0 %vm1730_vm0, %v1729_v1  ;;  %s538_s0 = scalar_lea.vmem %s2024_s30, %s1847_s27  ;;  %s542_s19 = scalar_lea.vmem %s2007_s1, %s1847_s27  ;;  %v1696_v15 = vld [vmem:[%s2010_s4] sm:$0xff]   ;;  %vm1149_vm4 = vcmask 130048   ;;  %vm1151_vm5 = vcmask 195584  }
   0xf   : > { %1587 = vmatprep.subr.bf16.mxu0 %v1729_v1  ;;  %1597 = vmatprep.mubr.msk.bf16.mxu1 %vm1730_vm0, %v1729_v1  ;;  %v1858_v3 = vld [vmem:[%s538_s0] sm:$0xff]  ;;  %s1737_s30 = smov 104   ;;  %s554_s0 = scalar_lea.vmem %s2022_s16, %s1847_s27 }
  0x10   : > { %v1860_v4 = vld [vmem:[%s542_s19] sm:$0xff]  ;;  %1594 = vmatpush3.bf16.msra.mxu1 %v1695_v14  ;;  %v627_v16 = vpack.c.bf16 %v1858_v3, %v1858_v3  ;;  %s546_s19 = scalar_lea.vmem %s2020_s14, %s1847_s27 }
  0x11   : > { %v558_v5 = vadd.f32 %v1860_v4, %v1858_v3  ;;  %1595 = vmatprep.subr.bf16.mxu1 %v1729_v1  ;;  %v1526_v51 = vld [vmem:[%s2011_s5] ss:$0 sm:$0xff] }
  0x12   : > { %1588 = vmatpush3.bf16.msra.mxu0 %v1694_v2 }
  0x13   : > { %1601 = vmatprep.subr.bf16.mxu0 %v1729_v1  ;;  %v559_v6 = vpack.c.bf16 %v558_v5, %v558_v5 }
  0x14   : > { %1596 = vmatpush3.bf16.msra.mxu1 %v1696_v15 }
  0x15   : > { %1590 = vmatmul.mubr.msk.bf16.vlgmr.msra.gmra.mxu0 %vm583_vm1, %v559_v6  ;;  %1607 = vmatprep.subr.bf16.mxu1 %v1729_v1 }
  0x16   : > { %1603 = vmatprep.mubr.msk.bf16.mxu0 %vm1730_vm0, %v1729_v1 }
  0x17   : > { %1598 = vmatmul.mubr.msk.bf16.vlgmr.msra.gmra.mxu1 %vm583_vm1, %v627_v16 }
  0x18   : > { %1609 = vmatprep.mubr.msk.bf16.mxu1 %vm1730_vm0, %v1729_v1 }
  0xd5   : > { %v621_v8 = vpop.f32.mrf.mxu0 }
  0xd6   : > { %v622_v9 = vadd.f32 %v1522_v7, %v621_v8 }
  0xd7   : > { %v1591_v10 = vpop.f32.mrf.mxu0  ;;  %v688_v48 = vpop.f32.mrf.mxu1 }
  0xd8   : > { %v694_v11 = vpack.c.bf16 %v622_v9, %v622_v9  ;;  %v689_v53 = vadd.f32 %v1526_v51, %v688_v48 }
  0xd9   : > { %v624_v12 = vpop.f32.mrf.mxu0  ;;  %v1599_v49 = vpop.f32.mrf.mxu1 }
  0xda   : > { %805 = vrot.lane.b32.xlu1 %v694_v11, %s1731_s23  ;;  %697 = vrot.lane.b32.xlu0 %v694_v11, %s1732_s24  ;;  %v695_v54 = vpack.c.bf16 %v689_v53, %v689_v53 }
  0xdb   : > { %v1592_v13 = vpop.f32.mrf.mxu0  ;;  %v691_v50 = vpop.f32.mrf.mxu1 }
  0xdc   : > { %v763_v55 = vsel %vm761_vm3, %v695_v54, 0  ;;  %v1698_v50 = vld [vmem:[%s2012_s6] sm:$0xff]  }
  0xdd   : > { %v1600_v52 = vpop.f32.mrf.mxu1  ;;  %1608 = vmatpush3.bf16.msra.mxu1 %v763_v55 }
  0xde   : > { %918 = vrot.lane.b32.xlu1 %v694_v11, %s1733_s25  ;;  %807 = vrot.lane.b32.xlu0 %v694_v11, %s1734_s26  ;;  %s1738_s25 = smov 8   ;;  %s1739_s26 = smov 16  }
  0xdf   : > { %1619 = vmatprep.subr.bf16.mxu1 %v1729_v1 }
  0xe2   : > { %1028 = vrot.lane.b32.xlu1 %v694_v11, %s1735_s28  ;;  %916 = vrot.lane.b32.xlu0 %v694_v11, %s1736_s29  ;;  %s550_s28 = scalar_lea.vmem %s2021_s15, %s1847_s27 }
  0xe6   : > { %1026 = vrot.lane.b32.xlu0 %v694_v11, %s1737_s30 }
 0x14c   : > { %v698_v17 = vpop.permute.xlu0 %697  ;;  %v806_v20 = vpop.permute.xlu1 %805 }
 0x14d   : > { %v704_v18 = vsel %vm699_vm2, %v698_v17, 0 }
 0x14e   : > { %1602 = vmatpush3.bf16.xpose.msra.mxu0 %v704_v18 }
 0x14f   : > { %1613 = vmatprep.subr.bf16.mxu0 %v1729_v1 }
 0x150   : > { %v808_v19 = vpop.permute.xlu0 %807  ;;  %v919_v22 = vpop.permute.xlu1 %918 }
 0x151   : > { %v813_v21 = vsel %vm699_vm2, %v808_v19, 0  ;;  %v924_v23 = vsel %vm699_vm2, %v919_v22, 0 }
 0x154   : > { %v1029_v24 = vpop.permute.xlu1 %1028  ;;  %v917_v25 = vpop.permute.xlu0 %916 }
 0x155   : > { %1604 = vmatmul.mubr.msk.bf16.vlgmr.msra.gmra.mxu0 %vm699_vm2, %v694_v11  ;;  %v1034_v26 = vsel %vm699_vm2, %v1029_v24, 0 }
 0x156   : > { %1614 = vmatpush3.bf16.xpose.msra.mxu0 %v813_v21  ;;  %1615 = vmatprep.mubr.msk.bf16.mxu0 %vm1730_vm0, %v1729_v1 }
 0x157   : > { %1625 = vmatprep.subr.bf16.mxu0 %v1729_v1 }
 0x158   : > { %v1027_v27 = vpop.permute.xlu0 %1026 }
 0x15d   : > { %1616 = vmatmul.mubr.msk.bf16.vlgmr.msra.gmra.mxu0 %vm699_vm2, %v806_v20 }
 0x15e   : > { %1626 = vmatpush3.bf16.xpose.msra.mxu0 %v924_v23  ;;  %1627 = vmatprep.mubr.msk.bf16.mxu0 %vm1730_vm0, %v1729_v1 }
 0x15f   : > { %1637 = vmatprep.subr.bf16.mxu0 %v1729_v1 }
 0x165   : > { %1628 = vmatmul.mubr.msk.bf16.vlgmr.msra.gmra.mxu0 %vm699_vm2, %v917_v25 }
 0x166   : > { %1638 = vmatpush3.bf16.xpose.msra.mxu0 %v1034_v26  ;;  %1639 = vmatprep.mubr.msk.bf16.mxu0 %vm1730_vm0, %v1729_v1 }
 0x167   : > { %1649 = vmatprep.subr.bf16.mxu0 %v1729_v1 }
 0x16d   : > { %1640 = vmatmul.mubr.msk.bf16.vlgmr.msra.gmra.mxu0 %vm699_vm2, %v1027_v27 }
 0x16e   : > { %1653 = vmatprep.mubr.msk.bf16.mxu0 %vm1730_vm0, %v1729_v1 }
 0x215   : > { %v740_v28 = vpop.f32.mrf.mxu0 }
 0x216   : > { %v746_v29 = vsel %vm699_vm2, %v740_v28, -inf }
 0x217   : > { %747 = vmax.xlane.f32.xlu1 %v746_v29  ;;  %v1605_v30 = vpop.f32.mrf.mxu0 }
 0x219   : > { %v743_v31 = vpop.f32.mrf.mxu0 }
 0x21b   : > { %v1606_v32 = vpop.f32.mrf.mxu0 }
 0x21d   : > { %v849_v33 = vpop.f32.mrf.mxu0 }
 0x21e   : > { %v855_v34 = vsel %vm699_vm2, %v849_v33, -inf }
 0x21f   : > { %856 = vmax.xlane.f32.xlu0 %v855_v34  ;;  %v1617_v35 = vpop.f32.mrf.mxu0 }
 0x221   : > { %v852_v36 = vpop.f32.mrf.mxu0 }
 0x223   : > { %v1618_v37 = vpop.f32.mrf.mxu0 }
 0x225   : > { %v960_v38 = vpop.f32.mrf.mxu0 }
 0x226   : > { %v966_v39 = vsel %vm699_vm2, %v960_v38, -inf }
 0x227   : > { %967 = vmax.xlane.f32.xlu0 %v966_v39  ;;  %v1629_v40 = vpop.f32.mrf.mxu0 }
 0x228   : > { %v1697_v40 = vld [vmem:[%s2012_s6 + $0x8] sm:$0xff]  }
 0x229   : > { %v963_v41 = vpop.f32.mrf.mxu0  ;;  %1650 = vmatpush3.bf16.msra.mxu0 %v1697_v40 }
 0x22a   : > { %1651 = vmatprep.subr.bf16.mxu0 %v1729_v1 }
 0x22b   : > { %v1630_v42 = vpop.f32.mrf.mxu0 }
 0x22d   : > { %v1070_v43 = vpop.f32.mrf.mxu0  ;;  %1652 = vmatpush3.bf16.msra.mxu0 %v1698_v50 }
 0x22e   : > { %v1076_v44 = vsel %vm699_vm2, %v1070_v43, -inf  ;;  %1665 = vmatprep.subr.bf16.mxu0 %v1729_v1 }
 0x22f   : > { %1077 = vmax.xlane.f32.xlu1 %v1076_v44  ;;  %v1641_v45 = vpop.f32.mrf.mxu0 }
 0x231   : > { %v1073_v46 = vpop.f32.mrf.mxu0 }
 0x233   : > { %v1642_v47 = vpop.f32.mrf.mxu0 }
 0x2a0   : > { %v748_v56 = vpop.xlane.xlu1 %747 }
 0x2a1   : > { %v749_v57 = vsub.f32 %v740_v28, %v748_v56 }
 0x2a3   : > { %v750_v58 = vmul.f32 1.442695, %v749_v57 }
 0x2a5   : > { %1703 = vpow2.f32 %v750_v58 }
 0x2a8   : > { %v857_v59 = vpop.xlane.xlu0 %856 }
 0x2a9   : > { %v858_v60 = vsub.f32 %v849_v33, %v857_v59 }
 0x2ab   : > { %v859_v61 = vmul.f32 1.442695, %v858_v60 }
 0x2ad   : > { %1705 = vpow2.f32 %v859_v61 }
 0x2b0   : > { %v968_v62 = vpop.xlane.xlu0 %967 }
 0x2b1   : > { %v969_v63 = vsub.f32 %v960_v38, %v968_v62  ;;  %v1538_v62 = vld [vmem:[%s2013_s7] ss:$0 sm:$0xff] }
 0x2b2   : > { %v1704_v0 = vpop.eup %1703 }
 0x2b3   : > { %v970_v2 = vmul.f32 1.442695, %v969_v63  ;;  %v752_v5 = vsel %vm699_vm2, %v1704_v0, 0.0 }
 0x2b4   : > { %753 = vadd.xlane.f32.xlu0 %v752_v5 }
 0x2b5   : > { %1707 = vpow2.f32 %v970_v2 }
 0x2b8   : > { %v1078_v10 = vpop.xlane.xlu1 %1077 }
 0x2b9   : > { %v1079_v11 = vsub.f32 %v1070_v43, %v1078_v10 }
 0x2ba   : > { %v1706_v6 = vpop.eup %1705 }
 0x2bb   : > { %v861_v7 = vsel %vm699_vm2, %v1706_v6, 0.0  ;;  %v1080_v12 = vmul.f32 1.442695, %v1079_v11 }
 0x2bc   : > { %862 = vadd.xlane.f32.xlu1 %v861_v7 }
 0x2bd   : > { %1709 = vpow2.f32 %v1080_v12 }
 0x2c2   : > { %v1708_v8 = vpop.eup %1707 }
 0x2c3   : > { %v972_v9 = vsel %vm699_vm2, %v1708_v8, 0.0 }
 0x2c4   : > { %973 = vadd.xlane.f32.xlu0 %v972_v9 }
 0x2ca   : > { %v1710_v13 = vpop.eup %1709 }
 0x2cb   : > { %v1082_v14 = vsel %vm699_vm2, %v1710_v13, 0.0 }
 0x2cd   : > { %978 = vrot.lane.b32.xlu1 %v695_v54, %s1736_s29 }
 0x2da   : > { %868 = vrot.lane.b32.xlu0 %v695_v54, %s1731_s23 }
 0x2f1   : > { %1083 = vadd.xlane.f32.xlu1 %v1082_v14  ;;  %v1699_v14 = vld [vmem:[%s2016_s10 + $0x8] sm:$0xff]  }
 0x302   : > { %1088 = vrot.lane.b32.xlu1 %v695_v54, %s1737_s30  ;;  %s1740_s30 = smov 24  }
 0x33d   : > { %v754_v15 = vpop.xlane.xlu0 %753 }
 0x33e   : > { %1711 = vrcp.f32 %v754_v15  ;;  %v1701_v15 = vld [vmem:[%s2016_s10] sm:$0xff]  }
 0x345   : > { %v863_v16 = vpop.xlane.xlu1 %862 }
 0x346   : > { %1713 = vrcp.f32 %v863_v16  ;;  %v1702_v16 = vld [vmem:[%s2018_s12] sm:$0xff]  }
 0x349   : > { %v979_v25 = vpop.permute.xlu1 %978 }
 0x34a   : > { %v984_v27 = vsel %vm761_vm3, %v979_v25, 0 }
 0x34b   : > { %v1712_v17 = vpop.eup %1711 }
 0x34c   : > { %v756_v18 = vmul.f32 %v1712_v17, %v1704_v0 }
 0x34d   : > { %v974_v19 = vpop.xlane.xlu0 %973 }
 0x34e   : > { %1715 = vrcp.f32 %v974_v19  ;;  %v757_v20 = vpack.c.bf16 %v756_v18, %v756_v18 }
 0x350   : > { %1610 = vmatmul.mubr.msk.bf16.vlgmr.msra.gmra.mxu1 %vm699_vm2, %v757_v20 }
 0x351   : > { %v869_v21 = vpop.permute.xlu0 %868  ;;  %1621 = vmatprep.mubr.msk.bf16.mxu1 %vm1730_vm0, %v1729_v1 }
 0x352   : > { %v874_v22 = vsel %vm761_vm3, %v869_v21, 0  ;;  %v1542_v21 = vld [vmem:[%s2014_s8] ss:$0 sm:$0xff] }
 0x353   : > { %v1714_v23 = vpop.eup %1713  ;;  %1620 = vmatpush3.bf16.msra.mxu1 %v874_v22 }
 0x354   : > { %1631 = vmatprep.subr.bf16.mxu1 %v1729_v1  ;;  %v865_v24 = vmul.f32 %v1714_v23, %v1706_v6  ;;  %v1543_v23 = vld [vmem:[%s2015_s9] ss:$0 sm:$0xff] }
 0x356   : > { %v866_v26 = vpack.c.bf16 %v865_v24, %v865_v24 }
 0x358   : > { %1622 = vmatmul.mubr.msk.bf16.vlgmr.msra.gmra.mxu1 %vm699_vm2, %v866_v26 }
 0x359   : > { %1632 = vmatpush3.bf16.msra.mxu1 %v984_v27  ;;  %1633 = vmatprep.mubr.msk.bf16.mxu1 %vm1730_vm0, %v1729_v1  ;;  %v1544_v27 = vld [vmem:[%s2017_s11] ss:$0 sm:$0xff] }
 0x35a   : > { %1643 = vmatprep.subr.bf16.mxu1 %v1729_v1 }
 0x35b   : > { %v1716_v28 = vpop.eup %1715 }
 0x35c   : > { %v976_v29 = vmul.f32 %v1716_v28, %v1708_v8  ;;  %v1548_v28 = vld [vmem:[%s2019_s13] ss:$0 sm:$0xff] }
 0x35e   : > { %v977_v30 = vpack.c.bf16 %v976_v29, %v976_v29 }
 0x360   : > { %1634 = vmatmul.mubr.msk.bf16.vlgmr.msra.gmra.mxu1 %vm699_vm2, %v977_v30 }
 0x361   : > { %1645 = vmatprep.mubr.msk.bf16.mxu1 %vm1730_vm0, %v1729_v1 }
 0x37a   : > { %v1084_v31 = vpop.xlane.xlu1 %1083 }
 0x37b   : > { %1717 = vrcp.f32 %v1084_v31 }
 0x37e   : > { %v1089_v32 = vpop.permute.xlu1 %1088 }
 0x37f   : > { %v1094_v33 = vsel %vm761_vm3, %v1089_v32, 0 }
 0x380   : > { %1644 = vmatpush3.bf16.msra.mxu1 %v1094_v33 }
 0x381   : > { %1657 = vmatprep.subr.bf16.mxu1 %v1729_v1 }
 0x388   : > { %v1718_v34 = vpop.eup %1717 }
 0x389   : > { %v1086_v35 = vmul.f32 %v1718_v34, %v1710_v13 }
 0x38b   : > { %v1087_v36 = vpack.c.bf16 %v1086_v35, %v1086_v35 }
 0x38d   : > { %1646 = vmatmul.mubr.msk.bf16.vlgmr.msra.gmra.mxu1 %vm699_vm2, %v1087_v36 }
 0x38e   : > { %1661 = vmatprep.mubr.msk.bf16.mxu1 %vm1730_vm0, %v1729_v1  ;;  %1658 = vmatpush3.bf16.msra.mxu1 %v1699_v14 }
 0x38f   : > { %1659 = vmatprep.subr.bf16.mxu1 %v1729_v1 }
 0x392   : > { %1660 = vmatpush3.bf16.msra.mxu1 %v1701_v15 }
 0x410   : > { %v799_v37 = vpop.f32.mrf.mxu1 }
 0x412   : > { %v1611_v38 = vpop.f32.mrf.mxu1 }
 0x414   : > { %v802_v39 = vpop.f32.mrf.mxu1 }
 0x416   : > { %v1612_v41 = vpop.f32.mrf.mxu1 }
 0x418   : > { %v910_v42 = vpop.f32.mrf.mxu1 }
 0x419   : > { %1137 = vrot.lane.b32.xlu0 %v910_v42, %s1738_s25 }
 0x41a   : > { %v1623_v43 = vpop.f32.mrf.mxu1 }
 0x41c   : > { %v913_v44 = vpop.f32.mrf.mxu1 }
 0x41e   : > { %v1624_v45 = vpop.f32.mrf.mxu1 }
 0x420   : > { %v1020_v46 = vpop.f32.mrf.mxu1 }
 0x421   : > { %1141 = vrot.lane.b32.xlu1 %v1020_v46, %s1739_s26 }
 0x422   : > { %v1635_v47 = vpop.f32.mrf.mxu1 }
 0x424   : > { %v1023_v48 = vpop.f32.mrf.mxu1 }
 0x426   : > { %v1636_v49 = vpop.f32.mrf.mxu1 }
 0x44d   : > { %v1130_v51 = vpop.f32.mrf.mxu1 }
 0x44e   : > { %1145 = vrot.lane.b32.xlu0 %v1130_v51, %s1740_s30 }
 0x44f   : > { %v1647_v52 = vpop.f32.mrf.mxu1 }
 0x451   : > { %v1133_v53 = vpop.f32.mrf.mxu1 }
 0x453   : > { %v1648_v54 = vpop.f32.mrf.mxu1 }
 0x48b   : > { %v1138_v55 = vpop.permute.xlu0 %1137 }
 0x48c   : > { %v1148_v57 = vsel %vm699_vm2, %v799_v37, %v1138_v55 }
 0x493   : > { %v1142_v56 = vpop.permute.xlu1 %1141 }
 0x494   : > { %v1150_v58 = vsel %vm1149_vm4, %v1148_v57, %v1142_v56 }
 0x4c0   : > { %v1146_v59 = vpop.permute.xlu0 %1145 }
 0x4c1   : > { %v1152_v60 = vsel %vm1151_vm5, %v1150_v58, %v1146_v59 }
 0x4c2   : > { %v1153_v61 = vpack.c.bf16 %v1152_v60, %v1152_v60 }
 0x4c4   : > { %1654 = vmatmul.mubr.msk.bf16.vlgmr.msra.gmra.mxu0 %vm583_vm1, %v1153_v61 }
 0x4c5   : > { %1669 = vmatprep.mubr.msk.bf16.mxu0 %vm1730_vm0, %v1729_v1 }
 0x584   : > { %v1214_v63 = vpop.f32.mrf.mxu0 }
 0x585   : > { %v1215_v0 = vadd.f32 %v1538_v62, %v1214_v63 }
 0x586   : > { %v1655_v2 = vpop.f32.mrf.mxu0 }
 0x587   : > { %v1220_v5 = vadd.f32 %v1215_v0, %v1858_v3  ;;  %v1700_v3 = vld [vmem:[%s2018_s12 + $0x8] sm:$0xff]  }
 0x588   : > { %v1217_v6 = vpop.f32.mrf.mxu0  ;;  %1666 = vmatpush3.bf16.msra.mxu0 %v1700_v3 }
 0x589   : > { %v1221_v7 = vsel %vm583_vm1, %v1220_v5, 0.0  ;;  %1667 = vmatprep.subr.bf16.mxu0 %v1729_v1 }
 0x58a   : > { %1222 = vadd.xlane.f32.xlu1 %v1221_v7  ;;  %v1656_v8 = vpop.f32.mrf.mxu0 }
 0x58c   : > { %1668 = vmatpush3.bf16.msra.mxu0 %v1702_v16 }
 0x613   : > { %v1223_v9 = vpop.xlane.xlu1 %1222 }
 0x614   : > { %v1225_v10 = vmul.f32 0.03125, %v1223_v9 }
 0x616   : > { %v1226_v11 = vsub.f32 %v1220_v5, %v1225_v10 }
 0x618   : > { %v1227_v12 = vmul.f32 %v1226_v11, %v1226_v11 }
 0x61a   : > { %v1228_v13 = vsel %vm583_vm1, %v1227_v12, 0.0 }
 0x61b   : > { %1229 = vadd.xlane.f32.xlu0 %v1228_v13 }
 0x6a4   : > { %v1230_v17 = vpop.xlane.xlu0 %1229 }
 0x6a5   : > { %v1231_v18 = vmul.f32 0.03125, %v1230_v17 }
 0x6a7   : > { %v1232_v19 = vadd.f32 1e-05, %v1231_v18 }
 0x6a9   : > { %1719 = vrsqrt.f32 %v1232_v19 }
 0x6b6   : > { %v1720_v20 = vpop.eup %1719 }
 0x6b7   : > { %v1234_v22 = vmul.f32 %v1720_v20, %v1226_v11 }
 0x6b9   : > { %v1242_v24 = vmul.f32 %v1542_v21, %v1234_v22 }
 0x6bb   : > { %v1250_v1 = vadd.f32 %v1543_v23, %v1242_v24 }
 0x6bd   : > { %1251 = vst.msk [vmem:[%s546_s19] sm:$0xff] %vm583_vm1, %v1250_v1  ;;  %v1252_v25 = vadd.f32 %v1250_v1, %v1860_v4 }
 0x6bf   : > { %v1253_v26 = vpack.c.bf16 %v1252_v25, %v1252_v25 }
 0x6c1   : > { %1662 = vmatmul.mubr.msk.bf16.vlgmr.msra.gmra.mxu1 %vm583_vm1, %v1253_v26  ;;  %1670 = vmatmul.mubr.msk.bf16.vlgmr.msra.gmra.mxu0 %vm583_vm1, %v1253_v26 }
 0x781   : > { %v1314_v29 = vpop.f32.mrf.mxu1  ;;  %v1378_v4 = vpop.f32.mrf.mxu0 }
 0x782   : > { %v1315_v30 = vadd.f32 %v1544_v27, %v1314_v29  ;;  %v1379_v31 = vadd.f32 %v1548_v28, %v1378_v4 }
 0x783   : > { %v1663_v32 = vpop.f32.mrf.mxu1  ;;  %v1671_v33 = vpop.f32.mrf.mxu0 }
 0x784   : > { %1320 = vst.msk [vmem:[%s550_s28] sm:$0xff] %vm583_vm1, %v1315_v30 }
 0x785   : > { %1384 = vst.msk [vmem:[%s554_s0] sm:$0xff] %vm1149_vm4, %v1379_v31  ;;  %v1317_v34 = vpop.f32.mrf.mxu1  ;;  %v1381_v35 = vpop.f32.mrf.mxu0 }
 0x787   : > { %v1664_v36 = vpop.f32.mrf.mxu1  ;;  %v1672_v37 = vpop.f32.mrf.mxu0 }
 0x788 PF: > { %s27_s21 = sadd.s32 1, %s1727_s21  }
 0x789   : > { %p24_p4 = scmp.ge.s32.totalorder %s27_s21, 4  }
 0x78b   :  { %26 = sbr.rel (!%p24_p4) target bundleno = 2 (0x2), region = 133 }

// kernel: decoder_forward.11
= control target key start
LH: loop header
LB: loop body
LE: loop exit
PB: predicated region body
PF: predicated region fallthrough
CT: control target
= control target key end

     0   :  { %s1864_s0 = inlined_call_operand.vmem [shape: bf16[16,4,32], index: 0, kind: input, shape index: {}]   ;;  %s1865_s1 = inlined_call_operand.vmem [shape: f32[16,4,4], index: 1, kind: input, shape index: {}]   ;;  %s1866_s2 = inlined_call_operand.vmem [shape: f32[4,32], index: 2, kind: input, shape index: {}]   ;;  %s1867_s3 = inlined_call_operand.vmem [shape: bf16[32,32], index: 3, kind: input, shape index: {}]   ;;  %s1868_s4 = inlined_call_operand.vmem [shape: f32[1,32], index: 4, kind: input, shape index: {}]   ;;  %s1869_s5 = inlined_call_operand.vmem [shape: f32[16,32], index: 5, kind: input, shape index: {}]   ;;  %s1870_s6 = inlined_call_operand.vmem [shape: f32[1,32], index: 6, kind: input, shape index: {}]   ;;  %s1871_s7 = inlined_call_operand.vmem [shape: f32[1,32], index: 7, kind: input, shape index: {}]   ;;  %s1872_s8 = inlined_call_operand.vmem [shape: bf16[32,64], index: 8, kind: input, shape index: {}]   ;;  %s1873_s9 = inlined_call_operand.vmem [shape: f32[1,64], index: 9, kind: input, shape index: {}]   ;;  %s1874_s10 = inlined_call_operand.vmem [shape: bf16[64,32], index: 10, kind: input, shape index: {}]   ;;  %s1875_s11 = inlined_call_operand.vmem [shape: f32[1,32], index: 11, kind: input, shape index: {}]   ;;  %s1876_s12 = inlined_call_operand.vmem [shape: f32[1,32], index: 12, kind: input, shape index: {}]   ;;  %s1877_s13 = inlined_call_operand.vmem [shape: f32[1,32], index: 13, kind: input, shape index: {}]   ;;  %s1878_s14 = inlined_call_operand.hbm [shape: f32[16,32], index: 14, kind: output, shape index: {}]  }
   0x1   :  { %1879 = sst [smem:[#allocation5_spill]] %s1864_s0 }
   0x2   :  { %1880 = sst [smem:[#allocation6_spill]] %s1865_s1 }
   0x3   :  { %1881 = sst [smem:[#allocation7_spill]] %s1866_s2 }
   0x4   :  { %1882 = sst [smem:[#allocation8_spill]] %s1867_s3 }
   0x5   :  { %1883 = sst [smem:[#allocation9_spill]] %s1868_s4 }
   0x6   :  { %1884 = sst [smem:[#allocation10_spill]] %s1869_s5 }
   0x7   :  { %19 = vsyncpa [#allocation3], 0 }
   0x8   :  { %21 = vsyncpa [#allocation3 + $0x1], 0  ;;  %s1605_s29 = smov 0   ;;  %s1607_s30 = smov 0  }
   0x9   :  { %s1609_s15 = smov 0   ;;  %s1611_s16 = smov 0  }
   0xa LB: > { %s1626_s17 = sadd.s32 4294967295, %s1525_s16   ;;  %s1291_s18 = sadd.s32 4294967294, %s1525_s16   ;;  %s1525_s16 = sphi %s1611_s16, %s1896_s16   ;;  %s1521_s15 = sphi %s1609_s15, %s1895_s15   ;;  %s1517_s30 = sphi %s1607_s30, %s1894_s30   ;;  %s1513_s29 = sphi %s1605_s29, %s1893_s29  }
   0xb   : > { %s1630_s19 = sadd.s32 1, %s1525_s16   ;;  %s343_s20 = sadd.s32 1, %s1521_s15 }
   0xc   : > { %s340_s21 = ssub.s32 %s1525_s16, %s1630_s19  ;;  %p353_p0 = scmp.ne.s32.totalorder %s1521_s15, %s1517_s30 }
   0xd   : > { %p341_p1 = scmp.eq.s32.totalorder %s340_s21, 0  ;;  %p354_p2 = scmp.eq.s32.totalorder %s1626_s17, 1 }
   0xe   : > { %p359_p3 = scmp.ne.s32.totalorder %s1517_s30, %s1513_s29  ;;  %p360_p4 = scmp.eq.s32.totalorder %s1291_s18, 1 }
   0xf   : > { %s1641_s22 = scalar_select %p341_p1, %s1521_s15, %s343_s20  }
  0x10   : > { %p1643_p5 = por %p354_p2, %p353_p0  ;;  %p1647_p6 = por %p360_p4, %p359_p3 }
  0x11   : > { %p1294_p7 = scmp.ge.s32.totalorder %s1525_s16, 1  ;;  %p436_p8 = scmp.lt.s32.totalorder %s1525_s16, 3 }
  0x13   : > { %p437_p9 = pnand %p1294_p7, %p436_p8 }
  0x14   : > { %s1887_s2 = sld [smem:[#allocation7_spill]] (!%p437_p9)  ;;  %s1296_s27 = sshll.u32 (!%p437_p9), %s1626_s17, 3 }
  0x15   : > { %440 = sbr.rel (%p437_p9) target bundleno = 1547 (0x60b), region = 76  ;;  %p492_p10 = scmp.lt.s32.totalorder (!%p437_p9), %s1296_s27, 15 }
  0x16   : > { %s1888_s1 = sld [smem:[#allocation6_spill]] (!%p437_p9)  ;;  %p503_p11 = scmp.lt.s32.totalorder (!%p437_p9), %s1626_s17, 1 }
  0x17   : > { %s1889_s3 = sld [smem:[#allocation8_spill]] (!%p437_p9)  ;;  %s1325_s18 = sshll.u32 (!%p437_p9), %s1626_s17, 7 }
  0x18   : > { %s1890_s0 = sld [smem:[#allocation5_spill]] (!%p437_p9) }
  0x19   : > { %s1891_s5 = sld [smem:[#allocation10_spill]] (!%p437_p9) }
  0x1a   : > { %v669_v0 = vld [vmem:[%s1887_s2] sm:$0xf]  ;;  %vm691_vm0 = vcmask 1043456   ;;  %s1898_s27 = smov (!%p492_p10, %s1296_s27), 15  ;;  %vm516_vm1 = vcmask 27648   ;;  %vm682_vm2 = vcmask 31744  }
  0x1b   : > { %1344 = vmatprep.subr.msk.mxu0 %vm691_vm0, %v669_v0  ;;  %s1299_s28 = sshll.u32 %s1898_s27, 2  ;;  %vm1528_vm3 = vmmov 0   ;;  %s1297_s20 = sshll.u32 %s1898_s27, 1  ;;  %vm816_vm4 = vcmask 257024   ;;  %vm908_vm5 = vcmask 1041409   ;;  %vm910_vm6 = vcmask 1042434  }
  0x1c   : > { %1345 = vmatpush3.msk.msra.mxu0 %vm691_vm0, %v669_v0  ;;  %s501_s21 = scalar_lea.vmem %s1888_s1, %s1299_s28  ;;  %vm912_vm7 = vcmask 1043459   ;;  %vm914_vm8 = vcmask 1044484   ;;  %vm916_vm9 = vcmask 1045509   ;;  %vm918_vm10 = vcmask 1046534   ;;  %s1892_s4 = sld [smem:[#allocation9_spill]] }
  0x1d   : > { %v1663_v1 = vld [vmem:[%s501_s21] sm:$0xf]  ;;  %v1665_v2 = vld [vmem:[%s501_s21 + $0x4] sm:$0xf]  ;;  %v1667_v3 = vld [vmem:[%s501_s21 + $0x8] sm:$0xf] }
  0x1e   : > { %v517_v4 = vsel %vm516_vm1, %v1663_v1, -inf  ;;  %v524_v5 = vsel %vm516_vm1, %v1665_v2, -inf  ;;  %v1673_v6 = vld [vmem:[%s501_s21 + $0xc] sm:$0xf]  ;;  %v531_v7 = vsel %vm516_vm1, %v1667_v3, -inf  ;;  %s495_s26 = scalar_lea.vmem %s1890_s0, %s1297_s20  ;;  %vm920_vm11 = vcmask 1047559  }
  0x1f   : > { %v518_v8 = vrot.slane %v517_v4, 4  ;;  %v525_v9 = vrot.slane %v524_v5, 4  ;;  %v532_v10 = vrot.slane %v531_v7, 4  ;;  %v538_v11 = vsel %vm516_vm1, %v1673_v6, -inf  ;;  %v1679_v12 = vld [vmem:[%s501_s21 + $0x10] sm:$0xf] }
  0x20   : > { %v539_v13 = vrot.slane %v538_v11, 4  ;;  %v1681_v14 = vld [vmem:[%s501_s21 + $0x14] sm:$0xf]  ;;  %v545_v15 = vsel %vm516_vm1, %v1679_v12, -inf  ;;  %v1685_v16 = vld [vmem:[%s501_s21 + $0x18] sm:$0xf] }
  0x21   : > { %v519_v17 = vmax.f32 %v517_v4, %v518_v8  ;;  %v526_v18 = vmax.f32 %v524_v5, %v525_v9  ;;  %v533_v19 = vmax.f32 %v531_v7, %v532_v10  ;;  %v546_v20 = vrot.slane %v545_v15, 4  ;;  %v1687_v21 = vld [vmem:[%s501_s21 + $0x1c] sm:$0xf]  ;;  %s504_s27 = scalar_select %p503_p11, %s1626_s17, 1 }
  0x22   : > { %v540_v22 = vmax.f32 %v538_v11, %v539_v13  ;;  %v552_v23 = vsel %vm516_vm1, %v1681_v14, -inf  ;;  %v559_v24 = vsel %vm516_vm1, %v1685_v16, -inf  ;;  %v566_v25 = vsel %vm516_vm1, %v1687_v21, -inf  ;;  %s488_s0 = sand.u32 1, %s1517_s30  }
  0x23   : > { %v520_v26 = vrot.slane %v519_v17, 2  ;;  %v527_v27 = vrot.slane %v526_v18, 2  ;;  %v534_v28 = vrot.slane %v533_v19, 2  ;;  %v547_v29 = vmax.f32 %v545_v15, %v546_v20  ;;  %s1300_s28 = sshll.u32 %s504_s27, 3 }
  0x24   : > { %v541_v30 = vrot.slane %v540_v22, 2  ;;  %v553_v31 = vrot.slane %v552_v23, 4  ;;  %v560_v32 = vrot.slane %v559_v24, 4  ;;  %v567_v33 = vrot.slane %v566_v25, 4  ;;  %s506_s21 = scalar_lea.vmem %s1891_s5, %s1300_s28  ;;  %s1195_s5 = scalar_lea.sflag [#allocation3], %s488_s0 }
  0x25   : > { %v521_v34 = vmax.f32 %v519_v17, %v520_v26  ;;  %v528_v35 = vmax.f32 %v526_v18, %v527_v27  ;;  %v535_v36 = vmax.f32 %v533_v19, %v534_v28  ;;  %v548_v37 = vrot.slane %v547_v29, 2 }
  0x26   : > { %v542_v38 = vmax.f32 %v540_v22, %v541_v30  ;;  %v554_v39 = vmax.f32 %v552_v23, %v553_v31  ;;  %v561_v40 = vmax.f32 %v559_v24, %v560_v32  ;;  %v568_v41 = vmax.f32 %v566_v25, %v567_v33 }
  0x27   : > { %v522_v42 = vrot.slane %v521_v34, 1  ;;  %v529_v43 = vrot.slane %v528_v35, 1  ;;  %v536_v44 = vrot.slane %v535_v36, 1  ;;  %v549_v45 = vmax.f32 %v547_v29, %v548_v37 }
  0x28   : > { %v543_v46 = vrot.slane %v542_v38, 1  ;;  %v555_v47 = vrot.slane %v554_v39, 2  ;;  %v562_v48 = vrot.slane %v561_v40, 2  ;;  %v569_v49 = vrot.slane %v568_v41, 2 }
  0x29   : > { %v523_v50 = vmax.f32 %v521_v34, %v522_v42  ;;  %v530_v51 = vmax.f32 %v528_v35, %v529_v43  ;;  %v537_v52 = vmax.f32 %v535_v36, %v536_v44  ;;  %v550_v53 = vrot.slane %v549_v45, 1 }
  0x2a   : > { %v544_v54 = vmax.f32 %v542_v38, %v543_v46  ;;  %v556_v55 = vmax.f32 %v554_v39, %v555_v47  ;;  %v563_v56 = vmax.f32 %v561_v40, %v562_v48  ;;  %v570_v57 = vmax.f32 %v568_v41, %v569_v49 }
  0x2b   : > { %v573_v58 = vsub.f32 %v1663_v1, %v523_v50  ;;  %v574_v59 = vsub.f32 %v1665_v2, %v530_v51  ;;  %v575_v60 = vsub.f32 %v1667_v3, %v537_v52  ;;  %v551_v61 = vmax.f32 %v549_v45, %v550_v53 }
  0x2c   : > { %v576_v62 = vsub.f32 %v1673_v6, %v544_v54  ;;  %v557_v63 = vrot.slane %v556_v55, 1  ;;  %v564_v0 = vrot.slane %v563_v56, 1  ;;  %v571_v4 = vrot.slane %v570_v57, 1 }
  0x2d   : > { %v581_v5 = vmul.f32 1.442695, %v573_v58  ;;  %v583_v7 = vmul.f32 1.442695, %v574_v59  ;;  %v585_v8 = vmul.f32 1.442695, %v575_v60  ;;  %v577_v9 = vsub.f32 %v1679_v12, %v551_v61 }
  0x2e   : > { %v587_v10 = vmul.f32 1.442695, %v576_v62  ;;  %v558_v11 = vmax.f32 %v556_v55, %v557_v63  ;;  %v565_v13 = vmax.f32 %v563_v56, %v564_v0  ;;  %v572_v15 = vmax.f32 %v570_v57, %v571_v4 }
  0x2f   : > { %1429 = vpow2.f32 %v581_v5  ;;  %v589_v1 = vmul.f32 1.442695, %v577_v9  ;;  %vm935_vm12 = vcmask 261120   ;;  %vm1119_vm13 = vcmask 523264  }
  0x30   : > { %1431 = vpow2.f32 %v583_v7  ;;  %v578_v2 = vsub.f32 %v1681_v14, %v558_v11  ;;  %v579_v3 = vsub.f32 %v1685_v16, %v565_v13  ;;  %v580_v6 = vsub.f32 %v1687_v21, %v572_v15 }
  0x31   : > { %1433 = vpow2.f32 %v585_v8 }
  0x32   : > { %1435 = vpow2.f32 %v587_v10  ;;  %v591_v17 = vmul.f32 1.442695, %v578_v2  ;;  %v593_v18 = vmul.f32 1.442695, %v579_v3  ;;  %v595_v19 = vmul.f32 1.442695, %v580_v6 }
  0x33   : > { %1437 = vpow2.f32 %v589_v1 }
  0x34   : > { %1439 = vpow2.f32 %v591_v17 }
  0x35   : > { %1441 = vpow2.f32 %v593_v18 }
  0x36   : > { %1443 = vpow2.f32 %v595_v19 }
  0x3c   : > { %v1703_v12 = vpop.eup %1429 }
  0x3d   : > { %v1705_v20 = vpop.eup %1431  ;;  %v597_v14 = vsel %vm516_vm1, %v1703_v12, 0.0 }
  0x3e   : > { %v1709_v22 = vpop.eup %1433  ;;  %v598_v16 = vrot.slane %v597_v14, 4  ;;  %v604_v21 = vsel %vm516_vm1, %v1705_v20, 0.0 }
  0x3f   : > { %v1713_v23 = vpop.eup %1435  ;;  %v605_v24 = vrot.slane %v604_v21, 4  ;;  %v611_v25 = vsel %vm516_vm1, %v1709_v22, 0.0 }
  0x40   : > { %v1717_v26 = vpop.eup %1437  ;;  %v599_v27 = vadd.f32 %v598_v16, %v597_v14  ;;  %v612_v28 = vrot.slane %v611_v25, 4  ;;  %v618_v29 = vsel %vm516_vm1, %v1713_v23, 0.0 }
  0x41   : > { %v1721_v30 = vpop.eup %1439  ;;  %v606_v31 = vadd.f32 %v605_v24, %v604_v21  ;;  %v619_v32 = vrot.slane %v618_v29, 4  ;;  %v625_v33 = vsel %vm516_vm1, %v1717_v26, 0.0 }
  0x42   : > { %v1725_v34 = vpop.eup %1441  ;;  %v600_v35 = vrot.slane %v599_v27, 2  ;;  %v613_v36 = vadd.f32 %v612_v28, %v611_v25  ;;  %v626_v37 = vrot.slane %v625_v33, 4  ;;  %v632_v38 = vsel %vm516_vm1, %v1721_v30, 0.0 }
  0x43   : > { %v1729_v39 = vpop.eup %1443  ;;  %v607_v40 = vrot.slane %v606_v31, 2  ;;  %v620_v41 = vadd.f32 %v619_v32, %v618_v29  ;;  %v633_v42 = vrot.slane %v632_v38, 4  ;;  %v639_v43 = vsel %vm516_vm1, %v1725_v34, 0.0 }
  0x44   : > { %v601_v44 = vadd.f32 %v600_v35, %v599_v27  ;;  %v614_v45 = vrot.slane %v613_v36, 2  ;;  %v627_v46 = vadd.f32 %v626_v37, %v625_v33  ;;  %v640_v47 = vrot.slane %v639_v43, 4 }
  0x45   : > { %v608_v48 = vadd.f32 %v607_v40, %v606_v31  ;;  %v621_v49 = vrot.slane %v620_v41, 2  ;;  %v634_v50 = vadd.f32 %v633_v42, %v632_v38  ;;  %v646_v51 = vsel %vm516_vm1, %v1729_v39, 0.0  ;;  %v792_v42 = vld [vmem:[%s495_s26] sm:$0x3] }
  0x46   : > { %v602_v52 = vrot.slane %v601_v44, 1  ;;  %v615_v53 = vadd.f32 %v614_v45, %v613_v36  ;;  %v628_v54 = vrot.slane %v627_v46, 2  ;;  %v641_v55 = vadd.f32 %v640_v47, %v639_v43  ;;  %v798_v47 = vld [vmem:[%s495_s26 + $0xc] sm:$0x3] }
  0x47   : > { %v609_v56 = vrot.slane %v608_v48, 1  ;;  %v622_v57 = vadd.f32 %v621_v49, %v620_v41  ;;  %v635_v58 = vrot.slane %v634_v50, 2  ;;  %v647_v59 = vrot.slane %v646_v51, 4 }
  0x48   : > { %v603_v60 = vadd.f32 %v602_v52, %v601_v44  ;;  %v616_v61 = vrot.slane %v615_v53, 1  ;;  %v629_v62 = vadd.f32 %v628_v54, %v627_v46  ;;  %v642_v63 = vrot.slane %v641_v55, 2  ;;  %v793_v44 = vld [vmem:[%s495_s26 + $0x2] sm:$0x3]  ;;  %v799_v52 = vld [vmem:[%s495_s26 + $0xe] sm:$0x3] }
  0x49   : > { %v610_v0 = vadd.f32 %v609_v56, %v608_v48  ;;  %v623_v4 = vrot.slane %v622_v57, 1  ;;  %v636_v5 = vadd.f32 %v635_v58, %v634_v50  ;;  %v648_v7 = vadd.f32 %v647_v59, %v646_v51 }
  0x4a   : > { %1445 = vrcp.f32 %v603_v60  ;;  %v617_v8 = vadd.f32 %v616_v61, %v615_v53  ;;  %v630_v9 = vrot.slane %v629_v62, 1  ;;  %v643_v10 = vadd.f32 %v642_v63, %v641_v55  ;;  %v796_v55 = vld [vmem:[%s495_s26 + $0x8] sm:$0x3] }
  0x4b   : > { %1447 = vrcp.f32 %v610_v0  ;;  %v624_v11 = vadd.f32 %v623_v4, %v622_v57  ;;  %v637_v13 = vrot.slane %v636_v5, 1  ;;  %v649_v15 = vrot.slane %v648_v7, 2 }
  0x4c   : > { %1449 = vrcp.f32 %v617_v8  ;;  %v631_v1 = vadd.f32 %v630_v9, %v629_v62  ;;  %v644_v2 = vrot.slane %v643_v10, 1  ;;  %v1527_v41 = vmov 0.0   ;;  %v797_v62 = vld [vmem:[%s495_s26 + $0xa] sm:$0x3] }
  0x4d   : > { %1451 = vrcp.f32 %v624_v11  ;;  %v638_v3 = vadd.f32 %v637_v13, %v636_v5  ;;  %v650_v6 = vadd.f32 %v649_v15, %v648_v7  ;;  %1352 = vmatprep.subr.bf16.mxu0 %v1527_v41  ;;  %1368 = vmatprep.subr.bf16.mxu1 %v1527_v41  ;;  %v800_v46 = vunpack.c.l.bf16 %v792_v42 }
  0x4e   : > { %1453 = vrcp.f32 %v631_v1  ;;  %v645_v17 = vadd.f32 %v644_v2, %v643_v10  ;;  %1376 = vmatprep.mubr.msk.bf16.mxu1 %vm1528_vm3, %v1527_v41  ;;  %v801_v51 = vunpack.c.l.bf16 %v793_v44  ;;  %v806_v54 = vunpack.c.l.bf16 %v798_v47 }
  0x4f   : > { %1455 = vrcp.f32 %v638_v3  ;;  %v651_v18 = vrot.slane %v650_v6, 1  ;;  %v807_v61 = vunpack.c.l.bf16 %v799_v52  ;;  %v804_v5 = vunpack.c.l.bf16 %v796_v55 }
  0x50   : > { %1457 = vrcp.f32 %v645_v17  ;;  %v805_v1 = vunpack.c.l.bf16 %v797_v62 }
  0x51   : > { %v652_v19 = vadd.f32 %v651_v18, %v650_v6 }
  0x53   : > { %1459 = vrcp.f32 %v652_v19 }
  0x57   : > { %v1446_v14 = vpop.eup %1445 }
  0x58   : > { %v1448_v16 = vpop.eup %1447  ;;  %v661_v21 = vmul.f32 %v1446_v14, %v1703_v12 }
  0x59   : > { %v1450_v24 = vpop.eup %1449  ;;  %v662_v25 = vmul.f32 %v1448_v16, %v1705_v20 }
  0x5a   : > { %v1452_v27 = vpop.eup %1451  ;;  %v663_v28 = vmul.f32 %v1450_v24, %v1709_v22 }
  0x5b   : > { %v1454_v29 = vpop.eup %1453  ;;  %v678_v31 = vcombine.low %v661_v21, %v662_v25  ;;  %v664_v32 = vmul.f32 %v1452_v27, %v1713_v23 }
  0x5c   : > { %v1456_v33 = vpop.eup %1455  ;;  %v665_v35 = vmul.f32 %v1454_v29, %v1717_v26  ;;  %v1421_v26 = vld [vmem:[%s1889_s3 + $0x8] sm:$0xff]  }
  0x5d   : > { %v1458_v36 = vpop.eup %1457  ;;  %1346 = vmatprep.mubr.msk.f32.mxu0 %vm682_vm2, %v678_v31  ;;  %v679_v37 = vcombine.low %v663_v28, %v664_v32  ;;  %v666_v12 = vmul.f32 %v1456_v33, %v1721_v30  ;;  %v1422_v30 = vld [vmem:[%s1889_s3] sm:$0xff]  }
  0x5e   : > { %v667_v38 = vmul.f32 %v1458_v36, %v1725_v34  ;;  %v794_v34 = vld [vmem:[%s495_s26 + $0x4] sm:$0x3] }
  0x5f   : > { %1347 = vmatmul.mubr.msk.f32.vlgmr.msra.gmra.mxu0 %vm682_vm2, %v679_v37  ;;  %v680_v20 = vcombine.low %v665_v35, %v666_v12  ;;  %v802_v43 = vunpack.c.l.bf16 %v794_v34 }
  0x60   : > { %v1460_v40 = vpop.eup %1459  ;;  %1353 = vmatpush3.bf16.msra.mxu0 %v1421_v26 }
  0x61   : > { %1349 = vmatprep.mubr.msk.f32.mxu0 %vm682_vm2, %v680_v20  ;;  %v668_v22 = vmul.f32 %v1460_v40, %v1729_v39  ;;  %1354 = vmatprep.subr.bf16.mxu0 %v1527_v41  ;;  %v795_v39 = vld [vmem:[%s495_s26 + $0x6] sm:$0x3]  ;;  %s1529_s26 = smov [#allocation2]  }
  0x62   : > { %v803_v45 = vunpack.c.l.bf16 %v795_v39  ;;  %s1469_s27 = sshll.u32 %s1529_s26, 4  ;;  %s1470_s27 = int_to_ptr.vmem [resolvable:$false] %s1469_s27 }
  0x63   : > { %v681_v23 = vcombine.low %v667_v38, %v668_v22  ;;  %s1471_s17 = scalar_lea.vmem %s1470_s27, 256 }
  0x64   : > { %1355 = vmatpush3.bf16.msra.mxu0 %v1422_v30 }
  0x65   : > { %1350 = vmatmul.mubr.msk.f32.gmra.mxu0 %vm682_vm2, %v681_v23  ;;  %1360 = vmatprep.subr.bf16.mxu0 %v1527_v41 }
  0x66   : > { %1356 = vmatprep.mubr.msk.bf16.mxu0 %vm1528_vm3, %v1527_v41 }
 0x11f   : > { %v1348_v48 = vpop.f32.mrf.mxu0 }
 0x120   : > { %v785_v49 = vcombine.high %v1348_v48, %v1348_v48  ;;  %v810_v50 = vmul.f32 %v1348_v48, %v802_v43 }
 0x121   : > { %v761_v53 = vpop.f32.mrf.mxu0 }
 0x122   : > { %v811_v56 = vmul.f32 %v803_v45, %v785_v49  ;;  %v831_v57 = vsel %vm816_vm4, %v810_v50, 0.0  ;;  %v784_v58 = vcombine.high %v761_v53, %v761_v53  ;;  %v808_v59 = vmul.f32 %v800_v46, %v761_v53 }
 0x123   : > { %v832_v60 = vrot.slane %v831_v57, 4 }
 0x124   : > { %v838_v63 = vsel %vm816_vm4, %v811_v56, 0.0  ;;  %v809_v0 = vmul.f32 %v801_v51, %v784_v58  ;;  %v817_v4 = vsel %vm816_vm4, %v808_v59, 0.0 }
 0x125   : > { %v833_v7 = vadd.f32 %v832_v60, %v831_v57  ;;  %v839_v8 = vrot.slane %v838_v63, 4  ;;  %v818_v9 = vrot.slane %v817_v4, 4  ;;  %v1351_v10 = vpop.f32.mrf.mxu0 }
 0x126   : > { %v824_v11 = vsel %vm816_vm4, %v809_v0, 0.0  ;;  %v787_v13 = vcombine.high %v1351_v10, %v1351_v10  ;;  %v814_v15 = vmul.f32 %v1351_v10, %v806_v54 }
 0x127   : > { %v834_v2 = vrot.slane %v833_v7, 2  ;;  %v840_v3 = vadd.f32 %v839_v8, %v838_v63  ;;  %v819_v6 = vadd.f32 %v818_v9, %v817_v4  ;;  %v825_v17 = vrot.slane %v824_v11, 4  ;;  %v771_v18 = vpop.f32.mrf.mxu0 }
 0x128   : > { %v815_v19 = vmul.f32 %v807_v61, %v787_v13  ;;  %v859_v14 = vsel %vm816_vm4, %v814_v15, 0.0  ;;  %v786_v16 = vcombine.high %v771_v18, %v771_v18  ;;  %v812_v21 = vmul.f32 %v804_v5, %v771_v18 }
 0x129   : > { %v835_v24 = vadd.f32 %v834_v2, %v833_v7  ;;  %v841_v25 = vrot.slane %v840_v3, 2  ;;  %v820_v27 = vrot.slane %v819_v6, 2  ;;  %v826_v28 = vadd.f32 %v825_v17, %v824_v11 }
 0x12a   : > { %v860_v29 = vrot.slane %v859_v14, 4  ;;  %v866_v31 = vsel %vm816_vm4, %v815_v19, 0.0  ;;  %v813_v32 = vmul.f32 %v805_v1, %v786_v16  ;;  %v845_v33 = vsel %vm816_vm4, %v812_v21, 0.0 }
 0x12b   : > { %v836_v35 = vrot.slane %v835_v24, 1  ;;  %v842_v36 = vadd.f32 %v841_v25, %v840_v3  ;;  %v821_v37 = vadd.f32 %v820_v27, %v819_v6  ;;  %v827_v12 = vrot.slane %v826_v28, 2 }
 0x12c   : > { %v861_v20 = vadd.f32 %v860_v29, %v859_v14  ;;  %v867_v38 = vrot.slane %v866_v31, 4  ;;  %v846_v40 = vrot.slane %v845_v33, 4  ;;  %v852_v22 = vsel %vm816_vm4, %v813_v32, 0.0 }
 0x12d   : > { %v837_v23 = vadd.f32 %v836_v35, %v835_v24  ;;  %v843_v26 = vrot.slane %v842_v36, 1  ;;  %v822_v30 = vrot.slane %v821_v37, 1  ;;  %v828_v34 = vadd.f32 %v827_v12, %v826_v28 }
 0x12e   : > { %v862_v39 = vrot.slane %v861_v20, 2  ;;  %v868_v42 = vadd.f32 %v867_v38, %v866_v31  ;;  %v847_v43 = vadd.f32 %v846_v40, %v845_v33  ;;  %v853_v44 = vrot.slane %v852_v22, 4  ;;  %v1306_v31 = vld [vmem:[%s1892_s4] ss:$0 sm:$0xff]  ;;  %s1206_s4 = scalar_lea.hbm %s1878_s14, %s1325_s18 }
 0x12f   : > { %v844_v45 = vadd.f32 %v843_v26, %v842_v36  ;;  %v823_v46 = vadd.f32 %v822_v30, %v821_v37  ;;  %v829_v47 = vrot.slane %v828_v34, 1  ;;  %v875_v52 = vpack.c.bf16 %v837_v23, %v837_v23  ;;  %v979_v33 = vld [vmem:[%s506_s21] sm:$0xff]  ;;  %s1295_s21 = sshll.u32 %s488_s0, 3 }
 0x130   : > { %v863_v48 = vadd.f32 %v862_v39, %v861_v20  ;;  %v869_v49 = vrot.slane %v868_v42, 2  ;;  %v848_v50 = vrot.slane %v847_v43, 2  ;;  %v854_v51 = vadd.f32 %v853_v44, %v852_v22  ;;  %v1424_v39 = vld [vmem:[%s1872_s8] sm:$0xff]   ;;  %s490_s20 = scalar_lea.vmem [#allocation2], %s1295_s21 }
 0x131   : > { %v830_v53 = vadd.f32 %v829_v47, %v828_v34  ;;  %v873_v54 = vpack.c.bf16 %v823_v46, %v823_v46  ;;  %v876_v60 = vpack.c.bf16 %v844_v45, %v844_v45  ;;  %v902_v7 = vunpack.c.l.b16 %v875_v52  ;;  %v1423_v34 = vld [vmem:[%s1872_s8 + $0x8] sm:$0xff]   ;;  %s1208_s1 = sshll.u32 %s490_s20, 4  ;;  %s1209_s1 = int_to_ptr.vmem [resolvable:$true] %s1208_s1 }
 0x132   : > { %v864_v55 = vrot.slane %v863_v48, 1  ;;  %v870_v56 = vadd.f32 %v869_v49, %v868_v42  ;;  %v849_v57 = vadd.f32 %v848_v50, %v847_v43  ;;  %v855_v58 = vrot.slane %v854_v51, 2  ;;  %v1425_v42 = vld [vmem:[%s1874_s10 + $0x18] sm:$0xff]   ;;  %v1426_v43 = vld [vmem:[%s1874_s10 + $0x10] sm:$0xff]   ;;  %v1311_v50 = vld [vmem:[%s1871_s7] ss:$0 sm:$0xff]  ;;  %p1472_p1 = scmp.lt.s32.totalorder %s1209_s1, %s1470_s27 }
 0x133   : > { %v874_v59 = vpack.c.bf16 %v830_v53, %v830_v53  ;;  %v900_v0 = vunpack.c.l.b16 %v873_v54  ;;  %v903_v13 = vunpack.c.l.b16 %v876_v60  ;;  %1369 = vmatpush3.bf16.msra.mxu1 %v1425_v42  ;;  %v1427_v54 = vld [vmem:[%s1874_s10 + $0x8] sm:$0xff]   ;;  %s1465_s25 = scalar_lea.vmem %s1209_s1, 128 }
 0x134   : > { %v871_v61 = vrot.slane %v870_v56, 1  ;;  %v850_v62 = vrot.slane %v849_v57, 1  ;;  %v856_v63 = vadd.f32 %v855_v58, %v854_v51  ;;  %v865_v5 = vadd.f32 %v864_v55, %v863_v48  ;;  %1370 = vmatprep.subr.bf16.mxu1 %v1527_v41  ;;  %v1310_v48 = vld [vmem:[%s1870_s6] ss:$0 sm:$0xff]  ;;  %p1466_p12 = scmp.ne.s32.totalorder %s1209_s1, %s1465_s25  ;;  %p1473_p2 = scmp.lt.s32.totalorder %s1471_s17, %s1465_s25 }
 0x135   : > { %v901_v4 = vunpack.c.l.b16 %v874_v59  ;;  %v1428_v55 = vld [vmem:[%s1874_s10] sm:$0xff]  }
 0x136   : > { %v872_v8 = vadd.f32 %v871_v61, %v870_v56  ;;  %v851_v9 = vadd.f32 %v850_v62, %v849_v57  ;;  %v857_v10 = vrot.slane %v856_v63, 1  ;;  %v879_v2 = vpack.c.bf16 %v865_v5, %v865_v5  ;;  %v1312_v56 = vld [vmem:[%s1873_s9] ss:$0 sm:$0xff]  ;;  %p1467_p13 = pnand %p1466_p12, %p1643_p5  ;;  %p1474_p3 = por %p1473_p2, %p1472_p1 }
 0x137   : > { %v909_v11 = vsel %vm908_vm5, %v901_v4, %v900_v0  ;;  %1371 = vmatpush3.bf16.msra.mxu1 %v1426_v43 }
 0x138   : > { %v911_v15 = vsel %vm910_vm6, %v902_v7, %v909_v11  ;;  %v858_v1 = vadd.f32 %v857_v10, %v856_v63  ;;  %v877_v3 = vpack.c.bf16 %v851_v9, %v851_v9  ;;  %v880_v6 = vpack.c.bf16 %v872_v8, %v872_v8  ;;  %1372 = vmatprep.subr.bf16.mxu1 %v1527_v41  ;;  %p1468_p0 = pneg %p1467_p13 }
 0x139   : > { %v913_v18 = vsel %vm912_vm7, %v903_v13, %v911_v15  ;;  %v906_v16 = vunpack.c.l.b16 %v879_v2 }
 0x13a   : > { %v878_v17 = vpack.c.bf16 %v858_v1, %v858_v1  ;;  %v904_v19 = vunpack.c.l.b16 %v877_v3  ;;  %v907_v24 = vunpack.c.l.b16 %v880_v6  ;;  %p1475_p4 = pnand %p1474_p3, %p1468_p0 }
 0x13b   : > { %1373 = vmatpush3.bf16.msra.mxu1 %v1427_v54 }
 0x13c   : > { %v905_v14 = vunpack.c.l.b16 %v878_v17  ;;  %v915_v21 = vsel %vm914_vm8, %v904_v19, %v913_v18  ;;  %1374 = vmatprep.subr.bf16.mxu1 %v1527_v41  ;;  %v1322_v19 = vld [vmem:[%s1876_s12] ss:$0 sm:$0xff] }
 0x13e   : > { %v917_v25 = vsel %vm916_vm9, %v905_v14, %v915_v21 }
 0x13f   : > { %v919_v27 = vsel %vm918_vm10, %v906_v16, %v917_v25  ;;  %1375 = vmatpush3.bf16.msra.mxu1 %v1428_v55  ;;  %v1323_v16 = vld [vmem:[%s1877_s13] ss:$0 sm:$0xff] }
 0x140   : > { %v921_v28 = vsel %vm920_vm11, %v907_v24, %v919_v27 }
 0x141   : > { %v922_v29 = vpack.c.b16 %v921_v28, %v921_v28 }
 0x143   : > { %1357 = vmatmul.mubr.msk.bf16.vlgmr.msra.gmra.mxu0 %vm935_vm12, %v922_v29 }
 0x144   : > { %1364 = vmatprep.mubr.msk.bf16.mxu0 %vm1528_vm3, %v1527_v41  ;;  %1361 = vmatpush3.bf16.msra.mxu0 %v1423_v34 }
 0x145   : > { %1362 = vmatprep.subr.bf16.mxu0 %v1527_v41  ;;  %v1316_v41 = vld [vmem:[%s1875_s11] ss:$0 sm:$0xff] }
 0x148   : > { %1363 = vmatpush3.bf16.msra.mxu0 %v1424_v39 }
 0x203   : > { %v973_v32 = vpop.f32.mrf.mxu0 }
 0x204   : > { %v974_v35 = vadd.f32 %v1306_v31, %v973_v32 }
 0x205   : > { %v1358_v36 = vpop.f32.mrf.mxu0 }
 0x206   : > { %v980_v37 = vadd.f32 %v979_v33, %v974_v35 }
 0x207   : > { %v976_v12 = vpop.f32.mrf.mxu0 }
 0x208   : > { %v981_v20 = vsel %vm935_vm12, %v980_v37, 0.0 }
 0x209   : > { %982 = vadd.xlane.f32.xlu0 %v981_v20  ;;  %v1359_v38 = vpop.f32.mrf.mxu0 }
 0x292   : > { %v983_v40 = vpop.xlane.xlu0 %982 }
 0x293   : > { %v985_v22 = vmul.f32 0.03125, %v983_v40 }
 0x295   : > { %v986_v23 = vsub.f32 %v980_v37, %v985_v22 }
 0x297   : > { %v987_v26 = vmul.f32 %v986_v23, %v986_v23 }
 0x299   : > { %v988_v30 = vsel %vm935_vm12, %v987_v26, 0.0 }
 0x29a   : > { %989 = vadd.xlane.f32.xlu0 %v988_v30 }
 0x323   : > { %v990_v44 = vpop.xlane.xlu0 %989 }
 0x324   : > { %v991_v45 = vmul.f32 0.03125, %v990_v44 }
 0x326   : > { %v992_v46 = vadd.f32 1e-05, %v991_v45 }
 0x328   : > { %1461 = vrsqrt.f32 %v992_v46 }
 0x335   : > { %v1462_v47 = vpop.eup %1461 }
 0x336   : > { %v994_v49 = vmul.f32 %v1462_v47, %v986_v23 }
 0x338   : > { %v1002_v51 = vmul.f32 %v1310_v48, %v994_v49 }
 0x33a   : > { %v1010_v52 = vadd.f32 %v1311_v50, %v1002_v51 }
 0x33c   : > { %v1011_v53 = vpack.c.bf16 %v1010_v52, %v1010_v52 }
 0x33e   : > { %1365 = vmatmul.mubr.msk.bf16.vlgmr.msra.gmra.mxu0 %vm935_vm12, %v1011_v53 }
 0x3fe   : > { %v1072_v57 = vpop.f32.mrf.mxu0 }
 0x3ff   : > { %v1073_v58 = vadd.f32 %v1312_v56, %v1072_v57 }
 0x400   : > { %v1366_v59 = vpop.f32.mrf.mxu0 }
 0x401   : > { %v1078_v60 = vmax.f32 %v1073_v58, 0.0 }
 0x402   : > { %v1075_v61 = vpop.f32.mrf.mxu0 }
 0x403   : > { %v1079_v62 = vpack.c.bf16 %v1078_v60, %v1078_v60 }
 0x404   : > { %v1367_v63 = vpop.f32.mrf.mxu0 }
 0x405   : > { %1377 = vmatmul.mubr.msk.bf16.vlgmr.msra.gmra.mxu1 %vm1119_vm13, %v1079_v62 }
 0x4c5   : > { %v1157_v0 = vpop.f32.mrf.mxu1 }
 0x4c6   : > { %v1158_v4 = vadd.f32 %v1316_v41, %v1157_v0 }
 0x4c7   : > { %v1378_v5 = vpop.f32.mrf.mxu1 }
 0x4c8   : > { %v1163_v7 = vadd.f32 %v1158_v4, %v1010_v52 }
 0x4c9   : > { %v1160_v8 = vpop.f32.mrf.mxu1 }
 0x4ca   : > { %v1164_v9 = vsel %vm935_vm12, %v1163_v7, 0.0 }
 0x4cb   : > { %1165 = vadd.xlane.f32.xlu1 %v1164_v9  ;;  %v1379_v10 = vpop.f32.mrf.mxu1 }
 0x554   : > { %v1166_v11 = vpop.xlane.xlu1 %1165 }
 0x555   : > { %v1167_v13 = vmul.f32 0.03125, %v1166_v11 }
 0x557   : > { %v1168_v15 = vsub.f32 %v1163_v7, %v1167_v13 }
 0x559   : > { %v1169_v1 = vmul.f32 %v1168_v15, %v1168_v15 }
 0x55b   : > { %v1170_v2 = vsel %vm935_vm12, %v1169_v1, 0.0 }
 0x55c   : > { %1171 = vadd.xlane.f32.xlu1 %v1170_v2 }
 0x5e5   : > { %v1172_v3 = vpop.xlane.xlu1 %1171 }
 0x5e6   : > { %v1173_v6 = vmul.f32 0.03125, %v1172_v3 }
 0x5e8   : > { %v1174_v17 = vadd.f32 1e-05, %v1173_v6 }
 0x5ea   : > { %1463 = vrsqrt.f32 %v1174_v17 }
 0x5f7   : > { %v1464_v18 = vpop.eup %1463 }
 0x5f8   : > { %v1176_v14 = vmul.f32 %v1464_v18, %v1168_v15 }
 0x5fa   : > { %v1184_v21 = vmul.f32 %v1322_v19, %v1176_v14 }
 0x5fc   : > { %v1192_v24 = vadd.f32 %v1323_v16, %v1184_v21 }
 0x5fe   : > { %1193 = vst.msk [vmem:[%s490_s20] sm:$0xff] %vm935_vm12, %v1192_v24 }
 0x5ff   : > { %1478 = shalt.err (!%p1475_p4)
}
 0x600   : > { %s1479_s2 = scalar_lea.hbm %s1206_s4, 128  ;;  %s1483_s21 = scalar_lea.hbm %s1878_s14, 256 }
 0x601   : > { %p1480_p7 = scmp.ne.s32.totalorder %s1206_s4, %s1479_s2  ;;  %p1484_p10 = scmp.lt.s32.totalorder %s1206_s4, %s1878_s14 }
 0x602   : > { %p1485_p11 = scmp.lt.s32.totalorder %s1483_s21, %s1479_s2 }
 0x603   : > { %p1481_p8 = pnand %p1480_p7, %p1643_p5 }
 0x604   : > { %p1486_p12 = por %p1485_p11, %p1484_p10 }
 0x605   : > { %p1482_p9 = pneg %p1481_p8 }
 0x607   : > { %p1487_p13 = pnand %p1486_p12, %p1482_p9 }
 0x609   : > { %1490 = shalt.err (!%p1487_p13)
}
 0x60a   : > { %1380 = dma.vmem_to_hbm [thread:$0]  (%p1643_p5), %s1209_s1, 128, %s1206_s4, %s1195_s5  }
 0x60b PF: > { %p1386_p0 = scmp.ge.s32.totalorder %s1525_s16, 2  ;;  %s1220_s20 = sand.u32 1, %s1513_s29  }
 0x60c   : > { %s1221_s25 = scalar_lea.sflag [#allocation3], %s1220_s20 }
 0x60d   : > { %p1383_p1 = pnand %p1386_p0, %p1647_p6 }
 0x60f   : > { %p1384_p2 = pneg %p1383_p1 }
 0x611   : > { %1508 = dma.done.wait (%p1384_p2), %s1221_s25, 128  }
 0x612   : > { %1510 = vsyncadd (%p1384_p2), %s1221_s25, 4294967168  ;;  %p24_p3 = scmp.ge.s32.totalorder %s1630_s19, 4   ;;  %s1893_s29 = smov %s1517_s30 }
 0x613   : > { %s1894_s30 = smov %s1521_s15  ;;  %s1895_s15 = smov %s1641_s22 }
 0x614   : > { %s1896_s16 = smov %s1630_s19  ;;  %26 = sbr.rel (!%p24_p3) target bundleno = 10 (0xa), region = 117 }
 0x619   :  { %1226 = vsyncpa [#allocation3], 1 }
 0x61a   :  { %1228 = vsyncpa [#allocation3 + $0x1], 1 }

</bundles_post_ra>
